<compile_context>
chip_gen: v7x
topology: tpu7x:2x2x1
jax: 0.10.0
libtpu: 0.0.40
codegen_flags: <defaults>
</compile_context>

<pallas_src>
import math

import jax
import jax.numpy as jnp
from jax.experimental import pallas as pl
from jax.experimental.pallas import tpu as pltpu

_EPS = 1e-5
_LRELU_SLOPE = 0.2
_INV_SQRT2 = 1.0 / math.sqrt(2.0)


def _round_up(v, m):
    return (v + m - 1) // m * m


# ---------------------------------------------------------------------------
# Fused kernel: IN+lrelu -> conv3x3 -> IN+lrelu -> conv3x3 -> shortcut-add/scale
# Activations live in VMEM as (H*W, Cp) with Cp=128-padded channels on lanes.
# ---------------------------------------------------------------------------
def _make_fused_kernel(H, W, Cp, pad_rows, learned_sc, add_shortcut):
    HW = H * W
    Hext = HW + 2 * pad_rows

    def kernel(*refs):
        if learned_sc:
            (x_ref, w1_ref, b1_ref, w2_ref, b2_ref, wsc_ref,
             o_ref, halo_ref) = refs
        else:
            (x_ref, w1_ref, b1_ref, w2_ref, b2_ref,
             o_ref, halo_ref) = refs
            wsc_ref = None

        # Zero the halo rows every grid step (only 2*pad_rows rows) so the
        # scratch is valid regardless of which core handles this grid index.
        zeros_halo = jnp.zeros((pad_rows, Cp), jnp.float32)
        halo_ref[0:pad_rows, :] = zeros_halo
        halo_ref[pad_rows + HW:Hext, :] = zeros_halo

        # Output-pixel column for every row of the extended buffer, (Hext, 1).
        # Every tap window starts at pad_rows + dy*W, i.e. a multiple of W
        # away from pad_rows, so (row - pad_rows) mod W is the output column
        # for all of them.  Offset keeps the iota non-negative before the mod.
        off = (-pad_rows) % W
        col = (jax.lax.broadcasted_iota(jnp.int32, (Hext, 1), 0) + off) % W
        keep_right = col < (W - 1)   # valid source rows for the dx = +1 taps
        keep_left = col > 0          # valid source rows for the dx = -1 taps

        def in_lrelu(v):
            # InstanceNorm2d(affine=False): per-channel stats over H*W,
            # biased variance, eps inside the rsqrt.  Single-pass stats.
            mean = jnp.mean(v, axis=0, keepdims=True)                # (1, Cp)
            var = jnp.mean(v * v, axis=0, keepdims=True) - mean * mean
            t = (v - mean) * jax.lax.rsqrt(var + _EPS)
            return jnp.where(t >= 0.0, t, _LRELU_SLOPE * t)

        def conv3x3(w_ref, b_ref):
            # Read the halo-extended activation once; the dx=+/-1 tap sources
            # are XLU rolls of it (wrap rows land on zero halo and/or get
            # masked).  Each of the 9 taps is an accumulated (HW,Cp)@(Cp,Cp)
            # matmul against a static Cp-row slice of the packed weight.
            hfull = halo_ref[...]                                    # (Hext, Cp)
            h_r = jnp.where(keep_right,
                            pltpu.roll(hfull, shift=Hext - 1, axis=0),
                            0.0)                                     # src[i+1]
            h_l = jnp.where(keep_left,
                            pltpu.roll(hfull, shift=1, axis=0),
                            0.0)                                     # src[i-1]
            acc = None
            for kh in range(3):
                base = pad_rows + (kh - 1) * W   # 8-aligned when W % 8 == 0
                for kw, src in ((0, h_l), (1, hfull), (2, h_r)):
                    tap = kh * 3 + kw
                    d = jnp.dot(src[base:base + HW, :],
                                w_ref[tap * Cp:(tap + 1) * Cp, :],
                                preferred_element_type=jnp.float32)
                    acc = d if acc is None else acc + d
            return acc + b_ref[...]                                  # (1,Cp) bcast

        # Residual branch.
        halo_ref[pad_rows:pad_rows + HW, :] = in_lrelu(x_ref[...])
        t = conv3x3(w1_ref, b1_ref)
        halo_ref[pad_rows:pad_rows + HW, :] = in_lrelu(t)
        t = conv3x3(w2_ref, b2_ref)

        # Shortcut branch + merge.
        if add_shortcut:
            xs = x_ref[...]
            if learned_sc:
                sc = jnp.dot(xs, wsc_ref[...],
                             preferred_element_type=jnp.float32)
            else:
                sc = xs                                              # identity
            t = (t + sc) * _INV_SQRT2

        o_ref[...] = t.astype(o_ref.dtype)

    return kernel


# ---------------------------------------------------------------------------
# Parameter packing (PyTorch layouts -> lane-dense kernel layouts)
# ---------------------------------------------------------------------------
def _pack_conv3x3(w_oihw, cp):
    cout, cin = int(w_oihw.shape[0]), int(w_oihw.shape[1])
    w = jnp.transpose(w_oihw, (2, 3, 1, 0))                   # (3,3,Cin,Cout)
    w = jnp.pad(w, ((0, 0), (0, 0), (0, cp - cin), (0, cp - cout)))
    return w.reshape(9 * cp, cp)      # row index = (kh*3 + kw)*Cp + cin


def _pack_bias(b, cp):
    return jnp.pad(b, (0, cp - int(b.shape[0]))).reshape(1, cp)


def _vmem_limit_bytes(HW, Cp, pad_rows, learned_sc):
    f32 = 4
    act = HW * Cp * f32
    hext = (HW + 2 * pad_rows) * Cp * f32
    weights = 2 * (9 * Cp * Cp + Cp) * f32
    if learned_sc:
        weights += Cp * Cp * f32
    # double-buffered x/out blocks + double-buffered weights + halo scratch
    # + ~8 activation-sized in-kernel temporaries (hfull/h_l/h_r/acc/t/...).
    need = 2 * (2 * act) + 2 * weights + hext + 8 * max(act, hext)
    # Generous headroom, but never more than ~56 MiB (v7x has 64 MiB VMEM).
    return int(min(max(2 * need, 24 * 1024 * 1024), 56 * 1024 * 1024))


# ---------------------------------------------------------------------------
# Forward wrapper
# ---------------------------------------------------------------------------
def adain_resblk_forward(x_nchw, params, *, upsample=False, w_hpf=0):
    """AdainResBlk forward.  x_nchw: (N, Cin, H, W) float32.

    params (PyTorch layouts): "w1_oihw", "b1", "w2_oihw", "b2" and, when
    Cin != Cout, "w_sc_oihw".
    """
    if upsample:
        # TODO(synk): upsample=True (F.interpolate nearest-2x inside residual
        # and shortcut) is not implemented in the fused kernel.
        raise NotImplementedError("upsample=True not supported")

    N, Cin, H, W = x_nchw.shape
    Cout = int(params["b1"].shape[0])
    learned_sc = Cin != Cout
    add_shortcut = (w_hpf == 0)

    Cp = _round_up(max(Cin, Cout, 128), 128)    # lane-dense channel padding
    HW = H * W
    pad_rows = _round_up(W, 8)                  # vertical halo, sublane aligned
    Hext = HW + 2 * pad_rows

    # NCHW -> channel-last flat (N, H*W, Cp), channels zero-padded (model-
    # boundary layout glue; chained blocks would keep this layout throughout).
    x_flat = jnp.transpose(x_nchw, (0, 2, 3, 1)).reshape(N, HW, Cin)
    x_p = jnp.pad(x_flat, ((0, 0), (0, 0), (0, Cp - Cin)))

    w1 = _pack_conv3x3(params["w1_oihw"], Cp)
    b1 = _pack_bias(params["b1"], Cp)
    w2 = _pack_conv3x3(params["w2_oihw"], Cp)
    b2 = _pack_bias(params["b2"], Cp)

    def _const_spec(shape):
        return pl.BlockSpec(shape, lambda n: (0,) * len(shape))

    operands = [x_p, w1, b1, w2, b2]
    in_specs = [
        pl.BlockSpec((None, HW, Cp), lambda n: (n, 0, 0)),      # x (per sample)
        _const_spec((9 * Cp, Cp)),                              # conv1 weight
        _const_spec((1, Cp)),                                   # conv1 bias
        _const_spec((9 * Cp, Cp)),                              # conv2 weight
        _const_spec((1, Cp)),                                   # conv2 bias
    ]
    if learned_sc:
        wsc = jnp.pad(params["w_sc_oihw"][:, :, 0, 0].T,
                      ((0, Cp - Cin), (0, Cp - Cout)))
        operands.append(wsc)
        in_specs.append(_const_spec((Cp, Cp)))                  # shortcut 1x1

    kernel = _make_fused_kernel(H, W, Cp, pad_rows, learned_sc, add_shortcut)

    out_p = pl.pallas_call(
        kernel,
        out_shape=jax.ShapeDtypeStruct((N, HW, Cp), jnp.float32),
        grid=(N,),
        in_specs=in_specs,
        out_specs=pl.BlockSpec((None, HW, Cp), lambda n: (n, 0, 0)),
        scratch_shapes=[pltpu.VMEM((Hext, Cp), jnp.float32)],   # halo buffer
        compiler_params=pltpu.CompilerParams(
            dimension_semantics=("parallel",),
            vmem_limit_bytes=_vmem_limit_bytes(HW, Cp, pad_rows, learned_sc),
        ),
    )(*operands)

    # Back to NCHW, dropping channel padding (model-boundary glue).
    out = out_p[:, :, :Cout].reshape(N, H, W, Cout)
    return jnp.transpose(out, (0, 3, 1, 2))


# ---------------------------------------------------------------------------
# Pure-JAX reference (correctness check only)
# ---------------------------------------------------------------------------
def _ref_forward(x, params, *, upsample=False, w_hpf=0):
    def inorm(v):
        m = jnp.mean(v, axis=(2, 3), keepdims=True)
        var = jnp.mean((v - m) ** 2, axis=(2, 3), keepdims=True)
        return (v - m) / jnp.sqrt(var + _EPS)

    def lrelu(v):
        return jnp.where(v >= 0, v, _LRELU_SLOPE * v)

    def conv(v, w_oihw, b, pad):
        y = jax.lax.conv_general_dilated(
            v, w_oihw, (1, 1), ((pad, pad), (pad, pad)),
            dimension_numbers=("NCHW", "OIHW", "NCHW"))
        return y + b[None, :, None, None] if b is not None else y

    def up2(v):
        return jnp.repeat(jnp.repeat(v, 2, axis=2), 2, axis=3)

    t = lrelu(inorm(x))
    if upsample:
        t = up2(t)
    t = conv(t, params["w1_oihw"], params["b1"], 1)
    t = lrelu(inorm(t))
    t = conv(t, params["w2_oihw"], params["b2"], 1)
    if w_hpf == 0:
        xs = up2(x) if upsample else x
        if "w_sc_oihw" in params:
            xs = conv(xs, params["w_sc_oihw"], None, 0)
        t = (t + xs) / math.sqrt(2.0)
    return t


if __name__ == "__main__":
    # Small shapes: batch=2, dim_in=4, dim_out=8, spatial=16x16, learned_sc=True
    N, C_IN, C_OUT, H, W = 2, 4, 8, 16, 16

    key = jax.random.PRNGKey(0)
    kx, k1, k2, k3, k4, k5 = jax.random.split(key, 6)

    x = jax.random.normal(kx, (N, C_IN, H, W), dtype=jnp.float32)

    # Deterministic synthetic parameters in PyTorch layouts (OIHW conv weights)
    params = {
        "w1_oihw": 0.1 * jax.random.normal(k1, (C_OUT, C_IN, 3, 3), dtype=jnp.float32),
        "b1": 0.1 * jax.random.normal(k2, (C_OUT,), dtype=jnp.float32),
        "w2_oihw": 0.1 * jax.random.normal(k3, (C_OUT, C_OUT, 3, 3), dtype=jnp.float32),
        "b2": 0.1 * jax.random.normal(k4, (C_OUT,), dtype=jnp.float32),
        "w_sc_oihw": 0.1 * jax.random.normal(k5, (C_OUT, C_IN, 1, 1), dtype=jnp.float32),
    }

    fwd = jax.jit(lambda v: adain_resblk_forward(v, params, upsample=False, w_hpf=0))
    out = jax.block_until_ready(fwd(x))

    ref = _ref_forward(x, params, upsample=False, w_hpf=0)

    assert out.shape == (N, C_OUT, H, W), out.shape
    max_err = float(jnp.max(jnp.abs(out - ref)))
    assert max_err < 5e-4, max_err

    print("KERNEL_OK")
</pallas_src>

<mosaic_0001>
module attributes {stable_mosaic.version = 11 : i64} {
  func.func @kernel(%arg0: i32, %arg1: memref<1x256x128xf32, #tpu.memory_space<vmem>>, %arg2: memref<1152x128xf32, #tpu.memory_space<vmem>>, %arg3: memref<1x128xf32, #tpu.memory_space<vmem>>, %arg4: memref<1152x128xf32, #tpu.memory_space<vmem>>, %arg5: memref<1x128xf32, #tpu.memory_space<vmem>>, %arg6: memref<128x128xf32, #tpu.memory_space<vmem>>, %arg7: memref<1x256x128xf32, #tpu.memory_space<vmem>>, %arg8: memref<288x128xf32, #tpu.memory_space<vmem>>) attributes {dimension_semantics = [#tpu.dimension_semantics<parallel>], iteration_bounds = array<i64: 2>, scalar_prefetch = 0 : i64, scratch_operands = 1 : i64, tpu.core_type = #tpu.core_type<tc>, window_params = [{transform_indices = @transform_0, window_bounds = array<i64: 1, 256, 128>}, {pipeline_mode = #tpu.pipeline_mode<synchronous>, transform_indices = @transform_1, window_bounds = array<i64: 1152, 128>}, {pipeline_mode = #tpu.pipeline_mode<synchronous>, transform_indices = @transform_2, window_bounds = array<i64: 1, 128>}, {pipeline_mode = #tpu.pipeline_mode<synchronous>, transform_indices = @transform_3, window_bounds = array<i64: 1152, 128>}, {pipeline_mode = #tpu.pipeline_mode<synchronous>, transform_indices = @transform_4, window_bounds = array<i64: 1, 128>}, {pipeline_mode = #tpu.pipeline_mode<synchronous>, transform_indices = @transform_5, window_bounds = array<i64: 128, 128>}, {transform_indices = @transform_6, window_bounds = array<i64: 1, 256, 128>}]} {
    %cst = arith.constant 0.000000e+00 : f32
    %0 = vector.broadcast %cst : f32 to vector<16x128xf32>
    %c0 = arith.constant 0 : index
    %c0_0 = arith.constant 0 : index
    %1 = vector.load %arg8[%c0, %c0_0] : memref<288x128xf32, #tpu.memory_space<vmem>>, vector<16x128xf32>
    tpu.vector_store %arg8[%c0, %c0_0], %0 {strides = array<i32>} : memref<288x128xf32, #tpu.memory_space<vmem>>, vector<16x128xf32>,
    %c272 = arith.constant 272 : index
    %c0_1 = arith.constant 0 : index
    %2 = vector.load %arg8[%c272, %c0_1] : memref<288x128xf32, #tpu.memory_space<vmem>>, vector<16x128xf32>
    tpu.vector_store %arg8[%c272, %c0_1], %0 {strides = array<i32>} : memref<288x128xf32, #tpu.memory_space<vmem>>, vector<16x128xf32>,
    %3 = tpu.iota {dimensions = array<i32: 0>} : vector<288x1xi32>
    %c0_i32 = arith.constant 0 : i32
    %4 = vector.broadcast %c0_i32 : i32 to vector<288x1xi32>
    %5 = arith.addi %3, %4 : vector<288x1xi32>
    %c16_i32 = arith.constant 16 : i32
    %c0_i32_2 = arith.constant 0 : i32
    %6 = arith.cmpi eq, %c16_i32, %c0_i32_2 : i32
    %c1_i32 = arith.constant 1 : i32
    %7 = arith.select %6, %c1_i32, %c16_i32 : i32
    %8 = vector.broadcast %7 : i32 to vector<288x1xi32>
    %9 = arith.remsi %5, %8 : vector<288x1xi32>
    %c0_i32_3 = arith.constant 0 : i32
    %10 = vector.broadcast %c0_i32_3 : i32 to vector<288x1xi32>
    %11 = arith.cmpi ne, %9, %10 : vector<288x1xi32>
    %c0_i32_4 = arith.constant 0 : i32
    %12 = vector.broadcast %c0_i32_4 : i32 to vector<288x1xi32>
    %13 = arith.cmpi slt, %9, %12 : vector<288x1xi32>
    %c0_i32_5 = arith.constant 0 : i32
    %14 = arith.cmpi slt, %7, %c0_i32_5 : i32
    %15 = vector.broadcast %14 : i1 to vector<288x1xi1>
    %16 = vector.broadcast %15 : vector<288x1xi1> to vector<288x1xi1>
    %17 = arith.xori %13, %16 : vector<288x1xi1>
    %18 = arith.andi %17, %11 : vector<288x1xi1>
    %19 = vector.broadcast %7 : i32 to vector<288x1xi32>
    %20 = arith.addi %9, %19 : vector<288x1xi32>
    %21 = arith.select %18, %20, %9 : vector<288x1xi1>, vector<288x1xi32>
    %c15_i32 = arith.constant 15 : i32
    %22 = vector.broadcast %c15_i32 : i32 to vector<288x1xi32>
    %23 = arith.cmpi slt, %21, %22 : vector<288x1xi32>
    %c0_i32_6 = arith.constant 0 : i32
    %24 = vector.broadcast %c0_i32_6 : i32 to vector<288x1xi32>
    %25 = arith.cmpi sgt, %21, %24 : vector<288x1xi32>
    %c0_7 = arith.constant 0 : index
    %c0_8 = arith.constant 0 : index
    %c0_9 = arith.constant 0 : index
    %26 = vector.load %arg1[%c0_7, %c0_8, %c0_9] : memref<1x256x128xf32, #tpu.memory_space<vmem>>, vector<1x256x128xf32>
    %27 = vector.shape_cast %26 : vector<1x256x128xf32> to vector<256x128xf32>
    %cst_10 = arith.constant dense<0.000000e+00> : vector<128xf32>
    %28 = vector.multi_reduction <add>, %27, %cst_10 [0] : vector<256x128xf32> to vector<128xf32>
    %29 = vector.shape_cast %28 : vector<128xf32> to vector<1x128xf32>
    %cst_11 = arith.constant 2.560000e+02 : f32
    %30 = vector.broadcast %cst_11 : f32 to vector<1x128xf32>
    %31 = arith.divf %29, %30 : vector<1x128xf32>
    %32 = arith.mulf %27, %27 : vector<256x128xf32>
    %cst_12 = arith.constant dense<0.000000e+00> : vector<128xf32>
    %33 = vector.multi_reduction <add>, %32, %cst_12 [0] : vector<256x128xf32> to vector<128xf32>
    %34 = vector.shape_cast %33 : vector<128xf32> to vector<1x128xf32>
    %cst_13 = arith.constant 2.560000e+02 : f32
    %35 = vector.broadcast %cst_13 : f32 to vector<1x128xf32>
    %36 = arith.divf %34, %35 : vector<1x128xf32>
    %37 = arith.mulf %31, %31 : vector<1x128xf32>
    %38 = arith.subf %36, %37 : vector<1x128xf32>
    %39 = vector.broadcast %31 : vector<1x128xf32> to vector<256x128xf32>
    %40 = arith.subf %27, %39 : vector<256x128xf32>
    %cst_14 = arith.constant 9.99999974E-6 : f32
    %41 = vector.broadcast %cst_14 : f32 to vector<1x128xf32>
    %42 = arith.addf %38, %41 : vector<1x128xf32>
    %43 = math.rsqrt %42 : vector<1x128xf32>
    %44 = vector.broadcast %43 : vector<1x128xf32> to vector<256x128xf32>
    %45 = arith.mulf %40, %44 : vector<256x128xf32>
    %cst_15 = arith.constant 0.000000e+00 : f32
    %46 = vector.broadcast %cst_15 : f32 to vector<256x128xf32>
    %47 = arith.cmpf oge, %45, %46 : vector<256x128xf32>
    %cst_16 = arith.constant 2.000000e-01 : f32
    %48 = vector.broadcast %cst_16 : f32 to vector<256x128xf32>
    %49 = arith.mulf %48, %45 : vector<256x128xf32>
    %50 = arith.select %47, %45, %49 : vector<256x128xi1>, vector<256x128xf32>
    %c16 = arith.constant 16 : index
    %c0_17 = arith.constant 0 : index
    %51 = vector.load %arg8[%c16, %c0_17] : memref<288x128xf32, #tpu.memory_space<vmem>>, vector<256x128xf32>
    tpu.vector_store %arg8[%c16, %c0_17], %50 {strides = array<i32>} : memref<288x128xf32, #tpu.memory_space<vmem>>, vector<256x128xf32>,
    %c0_18 = arith.constant 0 : index
    %c0_19 = arith.constant 0 : index
    %52 = vector.load %arg8[%c0_18, %c0_19] : memref<288x128xf32, #tpu.memory_space<vmem>>, vector<288x128xf32>
    %c287_i32 = arith.constant 287 : i32
    %53 = tpu.dynamic_rotate %52 by %c287_i32 dim 0 : vector<288x128xf32>, i32 -> vector<288x128xf32>
    %cst_20 = arith.constant 0.000000e+00 : f32
    %54 = vector.shape_cast %23 : vector<288x1xi1> to vector<288x1xi1>
    %55 = vector.broadcast %54 : vector<288x1xi1> to vector<288x128xi1>
    %56 = vector.broadcast %cst_20 : f32 to vector<288x128xf32>
    %57 = arith.select %55, %53, %56 : vector<288x128xi1>, vector<288x128xf32>
    %c1_i32_21 = arith.constant 1 : i32
    %58 = tpu.dynamic_rotate %52 by %c1_i32_21 dim 0 : vector<288x128xf32>, i32 -> vector<288x128xf32>
    %cst_22 = arith.constant 0.000000e+00 : f32
    %59 = vector.shape_cast %25 : vector<288x1xi1> to vector<288x1xi1>
    %60 = vector.broadcast %59 : vector<288x1xi1> to vector<288x128xi1>
    %61 = vector.broadcast %cst_22 : f32 to vector<288x128xf32>
    %62 = arith.select %60, %58, %61 : vector<288x128xi1>, vector<288x128xf32>
    %63 = vector.extract_strided_slice %62 {offsets = [0, 0], sizes = [256, 128], strides = [1, 1]} : vector<288x128xf32> to vector<256x128xf32>
    %c0_23 = arith.constant 0 : index
    %c0_24 = arith.constant 0 : index
    %64 = vector.load %arg2[%c0_23, %c0_24] : memref<1152x128xf32, #tpu.memory_space<vmem>>, vector<128x128xf32>
    %cst_25 = arith.constant dense<0.000000e+00> : vector<256x128xf32>
    %65 = tpu.matmul %63, %64, %cst_25 {dimension_numbers = #tpu.dot_dimension_numbers<[1], [0], [0], [1], [0, 0, 1, 1], [], []>} : vector<256x128xf32>, vector<128x128xf32>, vector<256x128xf32> -> vector<256x128xf32>
    %66 = vector.extract_strided_slice %52 {offsets = [0, 0], sizes = [256, 128], strides = [1, 1]} : vector<288x128xf32> to vector<256x128xf32>
    %c128 = arith.constant 128 : index
    %c0_26 = arith.constant 0 : index
    %67 = vector.load %arg2[%c128, %c0_26] : memref<1152x128xf32, #tpu.memory_space<vmem>>, vector<128x128xf32>
    %cst_27 = arith.constant dense<0.000000e+00> : vector<256x128xf32>
    %68 = tpu.matmul %66, %67, %cst_27 {dimension_numbers = #tpu.dot_dimension_numbers<[1], [0], [0], [1], [0, 0, 1, 1], [], []>} : vector<256x128xf32>, vector<128x128xf32>, vector<256x128xf32> -> vector<256x128xf32>
    %69 = arith.addf %65, %68 : vector<256x128xf32>
    %70 = vector.extract_strided_slice %57 {offsets = [0, 0], sizes = [256, 128], strides = [1, 1]} : vector<288x128xf32> to vector<256x128xf32>
    %c256 = arith.constant 256 : index
    %c0_28 = arith.constant 0 : index
    %71 = vector.load %arg2[%c256, %c0_28] : memref<1152x128xf32, #tpu.memory_space<vmem>>, vector<128x128xf32>
    %cst_29 = arith.constant dense<0.000000e+00> : vector<256x128xf32>
    %72 = tpu.matmul %70, %71, %cst_29 {dimension_numbers = #tpu.dot_dimension_numbers<[1], [0], [0], [1], [0, 0, 1, 1], [], []>} : vector<256x128xf32>, vector<128x128xf32>, vector<256x128xf32> -> vector<256x128xf32>
    %73 = arith.addf %69, %72 : vector<256x128xf32>
    %74 = vector.extract_strided_slice %62 {offsets = [16, 0], sizes = [256, 128], strides = [1, 1]} : vector<288x128xf32> to vector<256x128xf32>
    %c384 = arith.constant 384 : index
    %c0_30 = arith.constant 0 : index
    %75 = vector.load %arg2[%c384, %c0_30] : memref<1152x128xf32, #tpu.memory_space<vmem>>, vector<128x128xf32>
    %cst_31 = arith.constant dense<0.000000e+00> : vector<256x128xf32>
    %76 = tpu.matmul %74, %75, %cst_31 {dimension_numbers = #tpu.dot_dimension_numbers<[1], [0], [0], [1], [0, 0, 1, 1], [], []>} : vector<256x128xf32>, vector<128x128xf32>, vector<256x128xf32> -> vector<256x128xf32>
    %77 = arith.addf %73, %76 : vector<256x128xf32>
    %78 = vector.extract_strided_slice %52 {offsets = [16, 0], sizes = [256, 128], strides = [1, 1]} : vector<288x128xf32> to vector<256x128xf32>
    %c512 = arith.constant 512 : index
    %c0_32 = arith.constant 0 : index
    %79 = vector.load %arg2[%c512, %c0_32] : memref<1152x128xf32, #tpu.memory_space<vmem>>, vector<128x128xf32>
    %cst_33 = arith.constant dense<0.000000e+00> : vector<256x128xf32>
    %80 = tpu.matmul %78, %79, %cst_33 {dimension_numbers = #tpu.dot_dimension_numbers<[1], [0], [0], [1], [0, 0, 1, 1], [], []>} : vector<256x128xf32>, vector<128x128xf32>, vector<256x128xf32> -> vector<256x128xf32>
    %81 = arith.addf %77, %80 : vector<256x128xf32>
    %82 = vector.extract_strided_slice %57 {offsets = [16, 0], sizes = [256, 128], strides = [1, 1]} : vector<288x128xf32> to vector<256x128xf32>
    %c640 = arith.constant 640 : index
    %c0_34 = arith.constant 0 : index
    %83 = vector.load %arg2[%c640, %c0_34] : memref<1152x128xf32, #tpu.memory_space<vmem>>, vector<128x128xf32>
    %cst_35 = arith.constant dense<0.000000e+00> : vector<256x128xf32>
    %84 = tpu.matmul %82, %83, %cst_35 {dimension_numbers = #tpu.dot_dimension_numbers<[1], [0], [0], [1], [0, 0, 1, 1], [], []>} : vector<256x128xf32>, vector<128x128xf32>, vector<256x128xf32> -> vector<256x128xf32>
    %85 = arith.addf %81, %84 : vector<256x128xf32>
    %86 = vector.extract_strided_slice %62 {offsets = [32, 0], sizes = [256, 128], strides = [1, 1]} : vector<288x128xf32> to vector<256x128xf32>
    %c768 = arith.constant 768 : index
    %c0_36 = arith.constant 0 : index
    %87 = vector.load %arg2[%c768, %c0_36] : memref<1152x128xf32, #tpu.memory_space<vmem>>, vector<128x128xf32>
    %cst_37 = arith.constant dense<0.000000e+00> : vector<256x128xf32>
    %88 = tpu.matmul %86, %87, %cst_37 {dimension_numbers = #tpu.dot_dimension_numbers<[1], [0], [0], [1], [0, 0, 1, 1], [], []>} : vector<256x128xf32>, vector<128x128xf32>, vector<256x128xf32> -> vector<256x128xf32>
    %89 = arith.addf %85, %88 : vector<256x128xf32>
    %90 = vector.extract_strided_slice %52 {offsets = [32, 0], sizes = [256, 128], strides = [1, 1]} : vector<288x128xf32> to vector<256x128xf32>
    %c896 = arith.constant 896 : index
    %c0_38 = arith.constant 0 : index
    %91 = vector.load %arg2[%c896, %c0_38] : memref<1152x128xf32, #tpu.memory_space<vmem>>, vector<128x128xf32>
    %cst_39 = arith.constant dense<0.000000e+00> : vector<256x128xf32>
    %92 = tpu.matmul %90, %91, %cst_39 {dimension_numbers = #tpu.dot_dimension_numbers<[1], [0], [0], [1], [0, 0, 1, 1], [], []>} : vector<256x128xf32>, vector<128x128xf32>, vector<256x128xf32> -> vector<256x128xf32>
    %93 = arith.addf %89, %92 : vector<256x128xf32>
    %94 = vector.extract_strided_slice %57 {offsets = [32, 0], sizes = [256, 128], strides = [1, 1]} : vector<288x128xf32> to vector<256x128xf32>
    %c1024 = arith.constant 1024 : index
    %c0_40 = arith.constant 0 : index
    %95 = vector.load %arg2[%c1024, %c0_40] : memref<1152x128xf32, #tpu.memory_space<vmem>>, vector<128x128xf32>
    %cst_41 = arith.constant dense<0.000000e+00> : vector<256x128xf32>
    %96 = tpu.matmul %94, %95, %cst_41 {dimension_numbers = #tpu.dot_dimension_numbers<[1], [0], [0], [1], [0, 0, 1, 1], [], []>} : vector<256x128xf32>, vector<128x128xf32>, vector<256x128xf32> -> vector<256x128xf32>
    %97 = arith.addf %93, %96 : vector<256x128xf32>
    %c0_42 = arith.constant 0 : index
    %c0_43 = arith.constant 0 : index
    %98 = vector.load %arg3[%c0_42, %c0_43] : memref<1x128xf32, #tpu.memory_space<vmem>>, vector<1x128xf32>
    %99 = vector.broadcast %98 : vector<1x128xf32> to vector<256x128xf32>
    %100 = arith.addf %97, %99 : vector<256x128xf32>
    %cst_44 = arith.constant dense<0.000000e+00> : vector<128xf32>
    %101 = vector.multi_reduction <add>, %100, %cst_44 [0] : vector<256x128xf32> to vector<128xf32>
    %102 = vector.shape_cast %101 : vector<128xf32> to vector<1x128xf32>
    %cst_45 = arith.constant 2.560000e+02 : f32
    %103 = vector.broadcast %cst_45 : f32 to vector<1x128xf32>
    %104 = arith.divf %102, %103 : vector<1x128xf32>
    %105 = arith.mulf %100, %100 : vector<256x128xf32>
    %cst_46 = arith.constant dense<0.000000e+00> : vector<128xf32>
    %106 = vector.multi_reduction <add>, %105, %cst_46 [0] : vector<256x128xf32> to vector<128xf32>
    %107 = vector.shape_cast %106 : vector<128xf32> to vector<1x128xf32>
    %cst_47 = arith.constant 2.560000e+02 : f32
    %108 = vector.broadcast %cst_47 : f32 to vector<1x128xf32>
    %109 = arith.divf %107, %108 : vector<1x128xf32>
    %110 = arith.mulf %104, %104 : vector<1x128xf32>
    %111 = arith.subf %109, %110 : vector<1x128xf32>
    %112 = vector.broadcast %104 : vector<1x128xf32> to vector<256x128xf32>
    %113 = arith.subf %100, %112 : vector<256x128xf32>
    %cst_48 = arith.constant 9.99999974E-6 : f32
    %114 = vector.broadcast %cst_48 : f32 to vector<1x128xf32>
    %115 = arith.addf %111, %114 : vector<1x128xf32>
    %116 = math.rsqrt %115 : vector<1x128xf32>
    %117 = vector.broadcast %116 : vector<1x128xf32> to vector<256x128xf32>
    %118 = arith.mulf %113, %117 : vector<256x128xf32>
    %cst_49 = arith.constant 0.000000e+00 : f32
    %119 = vector.broadcast %cst_49 : f32 to vector<256x128xf32>
    %120 = arith.cmpf oge, %118, %119 : vector<256x128xf32>
    %cst_50 = arith.constant 2.000000e-01 : f32
    %121 = vector.broadcast %cst_50 : f32 to vector<256x128xf32>
    %122 = arith.mulf %121, %118 : vector<256x128xf32>
    %123 = arith.select %120, %118, %122 : vector<256x128xi1>, vector<256x128xf32>
    %c16_51 = arith.constant 16 : index
    %c0_52 = arith.constant 0 : index
    %124 = vector.load %arg8[%c16_51, %c0_52] : memref<288x128xf32, #tpu.memory_space<vmem>>, vector<256x128xf32>
    tpu.vector_store %arg8[%c16_51, %c0_52], %123 {strides = array<i32>} : memref<288x128xf32, #tpu.memory_space<vmem>>, vector<256x128xf32>,
    %c0_53 = arith.constant 0 : index
    %c0_54 = arith.constant 0 : index
    %125 = vector.load %arg8[%c0_53, %c0_54] : memref<288x128xf32, #tpu.memory_space<vmem>>, vector<288x128xf32>
    %c287_i32_55 = arith.constant 287 : i32
    %126 = tpu.dynamic_rotate %125 by %c287_i32_55 dim 0 : vector<288x128xf32>, i32 -> vector<288x128xf32>
    %cst_56 = arith.constant 0.000000e+00 : f32
    %127 = vector.shape_cast %23 : vector<288x1xi1> to vector<288x1xi1>
    %128 = vector.broadcast %127 : vector<288x1xi1> to vector<288x128xi1>
    %129 = vector.broadcast %cst_56 : f32 to vector<288x128xf32>
    %130 = arith.select %128, %126, %129 : vector<288x128xi1>, vector<288x128xf32>
    %c1_i32_57 = arith.constant 1 : i32
    %131 = tpu.dynamic_rotate %125 by %c1_i32_57 dim 0 : vector<288x128xf32>, i32 -> vector<288x128xf32>
    %cst_58 = arith.constant 0.000000e+00 : f32
    %132 = vector.shape_cast %25 : vector<288x1xi1> to vector<288x1xi1>
    %133 = vector.broadcast %132 : vector<288x1xi1> to vector<288x128xi1>
    %134 = vector.broadcast %cst_58 : f32 to vector<288x128xf32>
    %135 = arith.select %133, %131, %134 : vector<288x128xi1>, vector<288x128xf32>
    %136 = vector.extract_strided_slice %135 {offsets = [0, 0], sizes = [256, 128], strides = [1, 1]} : vector<288x128xf32> to vector<256x128xf32>
    %c0_59 = arith.constant 0 : index
    %c0_60 = arith.constant 0 : index
    %137 = vector.load %arg4[%c0_59, %c0_60] : memref<1152x128xf32, #tpu.memory_space<vmem>>, vector<128x128xf32>
    %cst_61 = arith.constant dense<0.000000e+00> : vector<256x128xf32>
    %138 = tpu.matmul %136, %137, %cst_61 {dimension_numbers = #tpu.dot_dimension_numbers<[1], [0], [0], [1], [0, 0, 1, 1], [], []>} : vector<256x128xf32>, vector<128x128xf32>, vector<256x128xf32> -> vector<256x128xf32>
    %139 = vector.extract_strided_slice %125 {offsets = [0, 0], sizes = [256, 128], strides = [1, 1]} : vector<288x128xf32> to vector<256x128xf32>
    %c128_62 = arith.constant 128 : index
    %c0_63 = arith.constant 0 : index
    %140 = vector.load %arg4[%c128_62, %c0_63] : memref<1152x128xf32, #tpu.memory_space<vmem>>, vector<128x128xf32>
    %cst_64 = arith.constant dense<0.000000e+00> : vector<256x128xf32>
    %141 = tpu.matmul %139, %140, %cst_64 {dimension_numbers = #tpu.dot_dimension_numbers<[1], [0], [0], [1], [0, 0, 1, 1], [], []>} : vector<256x128xf32>, vector<128x128xf32>, vector<256x128xf32> -> vector<256x128xf32>
    %142 = arith.addf %138, %141 : vector<256x128xf32>
    %143 = vector.extract_strided_slice %130 {offsets = [0, 0], sizes = [256, 128], strides = [1, 1]} : vector<288x128xf32> to vector<256x128xf32>
    %c256_65 = arith.constant 256 : index
    %c0_66 = arith.constant 0 : index
    %144 = vector.load %arg4[%c256_65, %c0_66] : memref<1152x128xf32, #tpu.memory_space<vmem>>, vector<128x128xf32>
    %cst_67 = arith.constant dense<0.000000e+00> : vector<256x128xf32>
    %145 = tpu.matmul %143, %144, %cst_67 {dimension_numbers = #tpu.dot_dimension_numbers<[1], [0], [0], [1], [0, 0, 1, 1], [], []>} : vector<256x128xf32>, vector<128x128xf32>, vector<256x128xf32> -> vector<256x128xf32>
    %146 = arith.addf %142, %145 : vector<256x128xf32>
    %147 = vector.extract_strided_slice %135 {offsets = [16, 0], sizes = [256, 128], strides = [1, 1]} : vector<288x128xf32> to vector<256x128xf32>
    %c384_68 = arith.constant 384 : index
    %c0_69 = arith.constant 0 : index
    %148 = vector.load %arg4[%c384_68, %c0_69] : memref<1152x128xf32, #tpu.memory_space<vmem>>, vector<128x128xf32>
    %cst_70 = arith.constant dense<0.000000e+00> : vector<256x128xf32>
    %149 = tpu.matmul %147, %148, %cst_70 {dimension_numbers = #tpu.dot_dimension_numbers<[1], [0], [0], [1], [0, 0, 1, 1], [], []>} : vector<256x128xf32>, vector<128x128xf32>, vector<256x128xf32> -> vector<256x128xf32>
    %150 = arith.addf %146, %149 : vector<256x128xf32>
    %151 = vector.extract_strided_slice %125 {offsets = [16, 0], sizes = [256, 128], strides = [1, 1]} : vector<288x128xf32> to vector<256x128xf32>
    %c512_71 = arith.constant 512 : index
    %c0_72 = arith.constant 0 : index
    %152 = vector.load %arg4[%c512_71, %c0_72] : memref<1152x128xf32, #tpu.memory_space<vmem>>, vector<128x128xf32>
    %cst_73 = arith.constant dense<0.000000e+00> : vector<256x128xf32>
    %153 = tpu.matmul %151, %152, %cst_73 {dimension_numbers = #tpu.dot_dimension_numbers<[1], [0], [0], [1], [0, 0, 1, 1], [], []>} : vector<256x128xf32>, vector<128x128xf32>, vector<256x128xf32> -> vector<256x128xf32>
    %154 = arith.addf %150, %153 : vector<256x128xf32>
    %155 = vector.extract_strided_slice %130 {offsets = [16, 0], sizes = [256, 128], strides = [1, 1]} : vector<288x128xf32> to vector<256x128xf32>
    %c640_74 = arith.constant 640 : index
    %c0_75 = arith.constant 0 : index
    %156 = vector.load %arg4[%c640_74, %c0_75] : memref<1152x128xf32, #tpu.memory_space<vmem>>, vector<128x128xf32>
    %cst_76 = arith.constant dense<0.000000e+00> : vector<256x128xf32>
    %157 = tpu.matmul %155, %156, %cst_76 {dimension_numbers = #tpu.dot_dimension_numbers<[1], [0], [0], [1], [0, 0, 1, 1], [], []>} : vector<256x128xf32>, vector<128x128xf32>, vector<256x128xf32> -> vector<256x128xf32>
    %158 = arith.addf %154, %157 : vector<256x128xf32>
    %159 = vector.extract_strided_slice %135 {offsets = [32, 0], sizes = [256, 128], strides = [1, 1]} : vector<288x128xf32> to vector<256x128xf32>
    %c768_77 = arith.constant 768 : index
    %c0_78 = arith.constant 0 : index
    %160 = vector.load %arg4[%c768_77, %c0_78] : memref<1152x128xf32, #tpu.memory_space<vmem>>, vector<128x128xf32>
    %cst_79 = arith.constant dense<0.000000e+00> : vector<256x128xf32>
    %161 = tpu.matmul %159, %160, %cst_79 {dimension_numbers = #tpu.dot_dimension_numbers<[1], [0], [0], [1], [0, 0, 1, 1], [], []>} : vector<256x128xf32>, vector<128x128xf32>, vector<256x128xf32> -> vector<256x128xf32>
    %162 = arith.addf %158, %161 : vector<256x128xf32>
    %163 = vector.extract_strided_slice %125 {offsets = [32, 0], sizes = [256, 128], strides = [1, 1]} : vector<288x128xf32> to vector<256x128xf32>
    %c896_80 = arith.constant 896 : index
    %c0_81 = arith.constant 0 : index
    %164 = vector.load %arg4[%c896_80, %c0_81] : memref<1152x128xf32, #tpu.memory_space<vmem>>, vector<128x128xf32>
    %cst_82 = arith.constant dense<0.000000e+00> : vector<256x128xf32>
    %165 = tpu.matmul %163, %164, %cst_82 {dimension_numbers = #tpu.dot_dimension_numbers<[1], [0], [0], [1], [0, 0, 1, 1], [], []>} : vector<256x128xf32>, vector<128x128xf32>, vector<256x128xf32> -> vector<256x128xf32>
    %166 = arith.addf %162, %165 : vector<256x128xf32>
    %167 = vector.extract_strided_slice %130 {offsets = [32, 0], sizes = [256, 128], strides = [1, 1]} : vector<288x128xf32> to vector<256x128xf32>
    %c1024_83 = arith.constant 1024 : index
    %c0_84 = arith.constant 0 : index
    %168 = vector.load %arg4[%c1024_83, %c0_84] : memref<1152x128xf32, #tpu.memory_space<vmem>>, vector<128x128xf32>
    %cst_85 = arith.constant dense<0.000000e+00> : vector<256x128xf32>
    %169 = tpu.matmul %167, %168, %cst_85 {dimension_numbers = #tpu.dot_dimension_numbers<[1], [0], [0], [1], [0, 0, 1, 1], [], []>} : vector<256x128xf32>, vector<128x128xf32>, vector<256x128xf32> -> vector<256x128xf32>
    %170 = arith.addf %166, %169 : vector<256x128xf32>
    %c0_86 = arith.constant 0 : index
    %c0_87 = arith.constant 0 : index
    %171 = vector.load %arg5[%c0_86, %c0_87] : memref<1x128xf32, #tpu.memory_space<vmem>>, vector<1x128xf32>
    %172 = vector.broadcast %171 : vector<1x128xf32> to vector<256x128xf32>
    %173 = arith.addf %170, %172 : vector<256x128xf32>
    %c0_88 = arith.constant 0 : index
    %c0_89 = arith.constant 0 : index
    %c0_90 = arith.constant 0 : index
    %174 = vector.load %arg1[%c0_88, %c0_89, %c0_90] : memref<1x256x128xf32, #tpu.memory_space<vmem>>, vector<1x256x128xf32>
    %175 = vector.shape_cast %174 : vector<1x256x128xf32> to vector<256x128xf32>
    %c0_91 = arith.constant 0 : index
    %c0_92 = arith.constant 0 : index
    %176 = vector.load %arg6[%c0_91, %c0_92] : memref<128x128xf32, #tpu.memory_space<vmem>>, vector<128x128xf32>
    %cst_93 = arith.constant dense<0.000000e+00> : vector<256x128xf32>
    %177 = tpu.matmul %175, %176, %cst_93 {dimension_numbers = #tpu.dot_dimension_numbers<[1], [0], [0], [1], [0, 0, 1, 1], [], []>} : vector<256x128xf32>, vector<128x128xf32>, vector<256x128xf32> -> vector<256x128xf32>
    %178 = arith.addf %173, %177 : vector<256x128xf32>
    %cst_94 = arith.constant 0.707106769 : f32
    %179 = vector.broadcast %cst_94 : f32 to vector<256x128xf32>
    %180 = arith.mulf %178, %179 : vector<256x128xf32>
    %c0_95 = arith.constant 0 : index
    %c0_96 = arith.constant 0 : index
    %c0_97 = arith.constant 0 : index
    %181 = vector.load %arg7[%c0_95, %c0_96, %c0_97] : memref<1x256x128xf32, #tpu.memory_space<vmem>>, vector<1x256x128xf32>
    %182 = vector.shape_cast %181 : vector<1x256x128xf32> to vector<256x128xf32>
    %183 = vector.shape_cast %180 : vector<256x128xf32> to vector<1x256x128xf32>
    tpu.vector_store %arg7[%c0_95, %c0_96, %c0_97], %183 {strides = array<i32>} : memref<1x256x128xf32, #tpu.memory_space<vmem>>, vector<1x256x128xf32>,
    return
  }
  func.func @transform_0(%arg0: i32) -> (i32, i32, i32) {
    %c0_i32 = arith.constant 0 : i32
    %c0_i32_0 = arith.constant 0 : i32
    %c0_i32_1 = arith.constant 0 : i32
    return %arg0, %c0_i32, %c0_i32_0 : i32, i32, i32
  }
  func.func @transform_1(%arg0: i32) -> (i32, i32) {
    %c0_i32 = arith.constant 0 : i32
    %c0_i32_0 = arith.constant 0 : i32
    %c0_i32_1 = arith.constant 0 : i32
    return %c0_i32, %c0_i32_0 : i32, i32
  }
  func.func @transform_2(%arg0: i32) -> (i32, i32) {
    %c0_i32 = arith.constant 0 : i32
    %c0_i32_0 = arith.constant 0 : i32
    %c0_i32_1 = arith.constant 0 : i32
    return %c0_i32, %c0_i32_0 : i32, i32
  }
  func.func @transform_3(%arg0: i32) -> (i32, i32) {
    %c0_i32 = arith.constant 0 : i32
    %c0_i32_0 = arith.constant 0 : i32
    %c0_i32_1 = arith.constant 0 : i32
    return %c0_i32, %c0_i32_0 : i32, i32
  }
  func.func @transform_4(%arg0: i32) -> (i32, i32) {
    %c0_i32 = arith.constant 0 : i32
    %c0_i32_0 = arith.constant 0 : i32
    %c0_i32_1 = arith.constant 0 : i32
    return %c0_i32, %c0_i32_0 : i32, i32
  }
  func.func @transform_5(%arg0: i32) -> (i32, i32) {
    %c0_i32 = arith.constant 0 : i32
    %c0_i32_0 = arith.constant 0 : i32
    %c0_i32_1 = arith.constant 0 : i32
    return %c0_i32, %c0_i32_0 : i32, i32
  }
  func.func @transform_6(%arg0: i32) -> (i32, i32, i32) {
    %c0_i32 = arith.constant 0 : i32
    %c0_i32_0 = arith.constant 0 : i32
    %c0_i32_1 = arith.constant 0 : i32
    return %arg0, %c0_i32, %c0_i32_0 : i32, i32, i32
  }
}

</mosaic_0001>

<bundles_post_ra>
// kernel: _lambda_.1
= control target key start
LH: loop header
LB: loop body
LE: loop exit
PB: predicated region body
PF: predicated region fallthrough
CT: control target
= control target key end

     0   :  { %11 = vsyncpa [#allocation4], 0  ;;  %s11351_s21 = smov 0   ;;  %s14697_s0 = inlined_call_operand.vmem [shape: f32[2,256,128], index: 0, kind: input, shape index: {}]   ;;  %s14698_s1 = inlined_call_operand.hbm [shape: f32[1152,128], index: 1, kind: input, shape index: {}]   ;;  %s14699_s2 = inlined_call_operand.vmem [shape: f32[1,128], index: 2, kind: input, shape index: {}]   ;;  %s14700_s3 = inlined_call_operand.vmem [shape: f32[1152,128], index: 3, kind: input, shape index: {}]   ;;  %s14701_s4 = inlined_call_operand.vmem [shape: f32[1,128], index: 4, kind: input, shape index: {}]   ;;  %s14702_s5 = inlined_call_operand.vmem [shape: f32[128,128], index: 5, kind: input, shape index: {}]   ;;  %s14703_s6 = inlined_call_operand.vmem [shape: f32[2,256,128], index: 6, kind: output, shape index: {}]  }
   0x1 LB: > { %s11357_s22 = sadd.s32 4294967295, %s11310_s21   ;;  %p7405_p0 = scmp.ge.s32.totalorder %s11310_s21, 1  ;;  %s11310_s21 = sphi %s11351_s21, %s17_s21  }
   0x2   : > { %p179_p1 = scmp.lt.s32.totalorder %s11310_s21, 3  ;;  %s11312_s23 = smov [#allocation3]  }
   0x3   : > { %s191_s24 = sshll.u32 %s11312_s23, 4  ;;  %p14704_p3 = scmp.eq.s32.totalorder %s11357_s22, 0  ;;  %s192_s24 = int_to_ptr.vmem [resolvable:$true] %s191_s24 }
   0x4   : > { %p11361_p2 = pnand %p7405_p0, %p179_p1  ;;  %s11272_s29 = scalar_lea.hbm %s14698_s1, 18432 }
   0x5   : > { %p11273_p6 = scmp.ne.s32.totalorder %s14698_s1, %s11272_s29  ;;  %p11279_p10 = scmp.lt.u32.totalorder %s11272_s29, %s14698_s1 }
   0x6   : > { %s15051_s25 = scalar_select %p11361_p2, 1, 0 }
   0x7   : > { %p11248_p4 = pneg %p11361_p2 }
   0x9   : > { %p11370_p5 = pnand %p14704_p3, %p11248_p4 }
   0xb   : > { %p11274_p7 = pneg %p11370_p5 }
   0xd   : > { %p11275_p8 = pnand %p11274_p7, %p11273_p6 }
   0xf   : > { %p11276_p9 = pneg %p11275_p8 }
  0x11   : > { %p11281_p11 = pnand %p11279_p10, %p11276_p9 }
  0x13   : > { %11284 = shalt.err (!%p11281_p11)
}
  0x14   : > { %s11285_s10 = scalar_lea.vmem %s192_s24, 18432  ;;  %p11293_p1 = scmp.lt.s32.totalorder %s192_s24, %s192_s24 }
  0x15   : > { %p11286_p12 = scmp.ne.s32.totalorder %s192_s24, %s11285_s10  ;;  %p11294_p4 = scmp.lt.s32.totalorder %s11285_s10, %s11285_s10 }
  0x17   : > { %p11288_p13 = pnand %p11286_p12, %p11274_p7  ;;  %p11295_p3 = por %p11294_p4, %p11293_p1 }
  0x19   : > { %p11289_p0 = pneg %p11288_p13 }
  0x1b   : > { %p11296_p2 = pnand %p11295_p3, %p11289_p0 }
  0x1d   : > { %11299 = shalt.err (!%p11296_p2)
}
  0x1e   : > { %s11313_s11 = smov 128   ;;  %s11314_s12 = smov 8  }
  0x1f   : > { %11251 = dma.hbm_to_vmem [thread:$0]  (!%p11370_p5), %s14698_s1, 18432, %s192_s24, [#allocation4], %s11313_s11, %s11313_s11, %s11314_s12  }
  0x20   : > { %p15053_p6 = scmp.ne.s32.totalorder %s15051_s25, 0 }
  0x22   : > { %227 = sbr.rel (%p15053_p6) target bundleno = 1802 (0x70a), region = 44 }
  0x29   : > { %p15054_p8 = scmp.eq.s32.totalorder %s11357_s22, 0 }
  0x2b   : > { %11305 = dma.done.wait (%p15054_p8), [#allocation4], 18432   ;;  %p15055_p7 = pmov %p15054_p8 }
  0x2c   : > { %p257_p2 = scmp.lt.s32.totalorder %s11357_s22, 1  ;;  %v14706_v0 = vmov 0.0   ;;  %v1563_v1 = vld [vmem:[#allocation3 + $0x80] sm:$0xff]  ;;  %v1564_v2 = vld [vmem:[#allocation3 + $0x88] sm:$0xff]  ;;  %v1565_v3 = vld [vmem:[#allocation3 + $0x90] sm:$0xff] }
  0x2d   : > { %11307 = vsyncadd (%p15055_p7), [#allocation4], 4294948864  ;;  %8556 = vmatprep.mubr.f32.mxu0 %v14706_v0  ;;  %v10044_v4 = vpack.c.bf16 %v1564_v2, %v1563_v1  ;;  %v1566_v5 = vld [vmem:[#allocation3 + $0x98] sm:$0xff]  ;;  %v1567_v7 = vld [vmem:[#allocation3 + $0xa0] sm:$0xff] }
  0x2e   : > { %s15765_s22 = smov (!%p257_p2, %s11357_s22), 1  ;;  %v10048_v6 = vpack.c.bf16 %v1566_v5, %v1565_v3  ;;  %v1568_v8 = vld [vmem:[#allocation3 + $0xa8] sm:$0xff]  ;;  %v1569_v10 = vld [vmem:[#allocation3 + $0xb0] sm:$0xff]  ;;  %v1570_v11 = vld [vmem:[#allocation3 + $0xb8] sm:$0xff] }
  0x2f   : > { %s7610_s15 = sshll.u32 %s15765_s22, 8  ;;  %10045 = vmatprep.subr.bf16.mxu0 %v10044_v4  ;;  %v10052_v9 = vpack.c.bf16 %v1568_v8, %v1567_v7  ;;  %v10056_v20 = vpack.c.bf16 %v1570_v11, %v1569_v10  ;;  %v1571_v23 = vld [vmem:[#allocation3 + $0xc0] sm:$0xff]  ;;  %v1572_v24 = vld [vmem:[#allocation3 + $0xc8] sm:$0xff]  ;;  %v1573_v34 = vld [vmem:[#allocation3 + $0xd0] sm:$0xff] }
  0x30   : > { %s11407_s18 = scalar_lea.vmem %s14697_s0, %s7610_s15  ;;  %10047 = vmatpush3.bf16.msra.mxu0 %v10044_v4  ;;  %v10060_v31 = vpack.c.bf16 %v1572_v24, %v1571_v23  ;;  %v1574_v35 = vld [vmem:[#allocation3 + $0xd8] sm:$0xff]  ;;  %v1575_v45 = vld [vmem:[#allocation3 + $0xe0] sm:$0xff]  ;;  %v1576_v46 = vld [vmem:[#allocation3 + $0xe8] sm:$0xff] }
  0x31   : > { %10049 = vmatprep.subr.bf16.mxu0 %v10048_v6  ;;  %v11410_v12 = vld [vmem:[%s11407_s18] sm:$0xff]  ;;  %v11413_v13 = vld [vmem:[%s11407_s18 + $0x8] sm:$0xff]  ;;  %v11416_v14 = vld [vmem:[%s11407_s18 + $0x10] sm:$0xff]  ;;  %v10064_v42 = vpack.c.bf16 %v1574_v35, %v1573_v34  ;;  %v10068_v53 = vpack.c.bf16 %v1576_v46, %v1575_v45 }
  0x32   : > { %v11419_v15 = vld [vmem:[%s11407_s18 + $0x18] sm:$0xff]  ;;  %v844_v16 = vadd.f32 %v11413_v13, %v11410_v12  ;;  %v883_v17 = vmul.f32 %v11410_v12, %v11410_v12  ;;  %v884_v18 = vmul.f32 %v11413_v13, %v11413_v13  ;;  %v885_v19 = vmul.f32 %v11416_v14, %v11416_v14  ;;  %v11430_v21 = vld [vmem:[%s11407_s18 + $0x20] sm:$0xff]  ;;  %v11436_v27 = vld [vmem:[%s11407_s18 + $0x28] sm:$0xff] }
  0x33   : > { %v886_v25 = vmul.f32 %v11419_v15, %v11419_v15  ;;  %v887_v29 = vmul.f32 %v11430_v21, %v11430_v21  ;;  %v11442_v32 = vld [vmem:[%s11407_s18 + $0x30] sm:$0xff]  ;;  %v888_v36 = vmul.f32 %v11436_v27, %v11436_v27  ;;  %v11448_v38 = vld [vmem:[%s11407_s18 + $0x38] sm:$0xff]  ;;  %v11454_v43 = vld [vmem:[%s11407_s18 + $0x40] sm:$0xff] }
  0x34   : > { %10051 = vmatpush3.bf16.msra.mxu0 %v10048_v6  ;;  %v845_v22 = vadd.f32 %v844_v16, %v11416_v14  ;;  %v915_v26 = vadd.f32 %v884_v18, %v883_v17  ;;  %v889_v40 = vmul.f32 %v11442_v32, %v11442_v32  ;;  %v890_v47 = vmul.f32 %v11448_v38, %v11448_v38  ;;  %v11460_v49 = vld [vmem:[%s11407_s18 + $0x48] sm:$0xff]  ;;  %v11466_v54 = vld [vmem:[%s11407_s18 + $0x50] sm:$0xff]  ;;  %v1578_v57 = vld [vmem:[#allocation3 + $0xf8] sm:$0xff] }
  0x35   : > { %10053 = vmatprep.subr.bf16.mxu0 %v10052_v9  ;;  %v891_v51 = vmul.f32 %v11454_v43, %v11454_v43  ;;  %v1577_v56 = vld [vmem:[#allocation3 + $0xf0] sm:$0xff]  ;;  %v892_v58 = vmul.f32 %v11460_v49, %v11460_v49  ;;  %v11472_v60 = vld [vmem:[%s11407_s18 + $0x58] sm:$0xff]  ;;  %v893_v62 = vmul.f32 %v11466_v54, %v11466_v54  ;;  %v11478_v2 = vld [vmem:[%s11407_s18 + $0x60] sm:$0xff] }
  0x36   : > { %v846_v28 = vadd.f32 %v845_v22, %v11419_v15  ;;  %v916_v30 = vadd.f32 %v915_v26, %v885_v19  ;;  %v10072_v1 = vpack.c.bf16 %v1578_v57, %v1577_v56  ;;  %v1547_v4 = vld [vmem:[#allocation3] sm:$0xff]  ;;  %v1548_v5 = vld [vmem:[#allocation3 + $0x8] sm:$0xff]  ;;  %v894_v6 = vmul.f32 %v11472_v60, %v11472_v60  ;;  %v11490_v17 = vld [vmem:[%s11407_s18 + $0x70] sm:$0xff] }
  0x37   : > { %v11484_v8 = vld [vmem:[%s11407_s18 + $0x68] sm:$0xff]  ;;  %v895_v10 = vmul.f32 %v11478_v2, %v11478_v2  ;;  %v10076_v16 = vpack.c.bf16 %v1548_v5, %v1547_v4  ;;  %v1549_v22 = vld [vmem:[#allocation3 + $0x10] sm:$0xff]  ;;  %v1550_v23 = vld [vmem:[#allocation3 + $0x18] sm:$0xff]  ;;  %v897_v26 = vmul.f32 %v11490_v17, %v11490_v17 }
  0x38   : > { %10055 = vmatpush3.bf16.msra.mxu0 %v10052_v9  ;;  %v847_v33 = vadd.f32 %v846_v28, %v11430_v21  ;;  %v917_v37 = vadd.f32 %v916_v30, %v886_v25  ;;  %v896_v19 = vmul.f32 %v11484_v8, %v11484_v8  ;;  %v11496_v24 = vld [vmem:[%s11407_s18 + $0x78] sm:$0xff]  ;;  %v1551_v35 = vld [vmem:[#allocation3 + $0x20] sm:$0xff] }
  0x39   : > { %10057 = vmatprep.subr.bf16.mxu0 %v10056_v20  ;;  %v11527_v56 = vld [vmem:[%s11407_s18 + $0xa0] sm:$0xff] }
  0x3a   : > { %v848_v39 = vadd.f32 %v847_v33, %v11436_v27  ;;  %v918_v41 = vadd.f32 %v917_v37, %v887_v29  ;;  %v11502_v29 = vld [vmem:[%s11407_s18 + $0x80] sm:$0xff]  ;;  %v898_v33 = vmul.f32 %v11496_v24, %v11496_v24  ;;  %v11509_v37 = vld [vmem:[%s11407_s18 + $0x88] sm:$0xff]  ;;  %v903_v4 = vmul.f32 %v11527_v56, %v11527_v56 }
  0x3b   : > { %v900_v46 = vmul.f32 %v11509_v37, %v11509_v37 }
  0x3c   : > { %10059 = vmatpush3.bf16.msra.mxu0 %v10056_v20  ;;  %v849_v44 = vadd.f32 %v848_v39, %v11442_v32  ;;  %v919_v48 = vadd.f32 %v918_v41, %v888_v36  ;;  %v1552_v36 = vld [vmem:[#allocation3 + $0x28] sm:$0xff] }
  0x3d   : > { %10061 = vmatprep.subr.bf16.mxu0 %v10060_v31  ;;  %v10084_v45 = vpack.c.bf16 %v1552_v36, %v1551_v35  ;;  %v11557_v35 = vld [vmem:[%s11407_s18 + $0xc8] sm:$0xff] }
  0x3e   : > { %v850_v50 = vadd.f32 %v849_v44, %v11448_v38  ;;  %v920_v52 = vadd.f32 %v919_v48, %v889_v40  ;;  %v899_v40 = vmul.f32 %v11502_v29, %v11502_v29  ;;  %v1553_v48 = vld [vmem:[#allocation3 + $0x30] sm:$0xff] }
  0x40   : > { %10063 = vmatpush3.bf16.msra.mxu0 %v10060_v31  ;;  %v851_v55 = vadd.f32 %v850_v50, %v11454_v43  ;;  %v921_v59 = vadd.f32 %v920_v52, %v890_v47  ;;  %v10080_v31 = vpack.c.bf16 %v1550_v23, %v1549_v22  ;;  %v1554_v50 = vld [vmem:[#allocation3 + $0x38] sm:$0xff] }
  0x41   : > { %10065 = vmatprep.subr.bf16.mxu0 %v10064_v42 }
  0x42   : > { %v852_v61 = vadd.f32 %v851_v55, %v11460_v49  ;;  %v922_v63 = vadd.f32 %v921_v59, %v891_v51  ;;  %v11521_v51 = vld [vmem:[%s11407_s18 + $0x98] sm:$0xff] }
  0x43   : > { %v902_v59 = vmul.f32 %v11521_v51, %v11521_v51 }
  0x44   : > { %10067 = vmatpush3.bf16.msra.mxu0 %v10064_v42  ;;  %v853_v3 = vadd.f32 %v852_v61, %v11466_v54  ;;  %v923_v7 = vadd.f32 %v922_v63, %v892_v58  ;;  %v11515_v42 = vld [vmem:[%s11407_s18 + $0x90] sm:$0xff]  ;;  %v10088_v58 = vpack.c.bf16 %v1554_v50, %v1553_v48  ;;  %v1556_v63 = vld [vmem:[#allocation3 + $0x48] sm:$0xff]  ;;  %v1562_v50 = vld [vmem:[#allocation3 + $0x78] sm:$0xff] }
  0x45   : > { %10069 = vmatprep.subr.bf16.mxu0 %v10068_v53  ;;  %v1561_v48 = vld [vmem:[#allocation3 + $0x70] sm:$0xff] }
  0x46   : > { %v854_v9 = vadd.f32 %v853_v3, %v11472_v60  ;;  %v924_v11 = vadd.f32 %v923_v7, %v893_v62  ;;  %v1555_v62 = vld [vmem:[#allocation3 + $0x40] sm:$0xff] }
  0x48   : > { %10071 = vmatpush3.bf16.msra.mxu0 %v10068_v53  ;;  %v855_v18 = vadd.f32 %v854_v9, %v11478_v2  ;;  %v925_v20 = vadd.f32 %v924_v11, %v894_v6  ;;  %v901_v53 = vmul.f32 %v11515_v42, %v11515_v42  ;;  %v11539_v6 = vld [vmem:[%s11407_s18 + $0xb0] sm:$0xff]  ;;  %v10092_v9 = vpack.c.bf16 %v1556_v63, %v1555_v62 }
  0x49   : > { %10073 = vmatprep.subr.bf16.mxu0 %v10072_v1  ;;  %v905_v22 = vmul.f32 %v11539_v6, %v11539_v6 }
  0x4a   : > { %v856_v25 = vadd.f32 %v855_v18, %v11484_v8  ;;  %v926_v28 = vadd.f32 %v925_v20, %v895_v10  ;;  %v1558_v18 = vld [vmem:[#allocation3 + $0x58] sm:$0xff] }
  0x4c   : > { %10075 = vmatpush3.bf16.msra.mxu0 %v10072_v1  ;;  %v857_v30 = vadd.f32 %v856_v25, %v11490_v17  ;;  %v927_v34 = vadd.f32 %v926_v28, %v896_v19  ;;  %v11533_v1 = vld [vmem:[%s11407_s18 + $0xa8] sm:$0xff]  ;;  %v11545_v19 = vld [vmem:[%s11407_s18 + $0xb8] sm:$0xff]  ;;  %v11551_v25 = vld [vmem:[%s11407_s18 + $0xc0] sm:$0xff] }
  0x4d   : > { %10077 = vmatprep.subr.bf16.mxu0 %v10076_v16  ;;  %v904_v10 = vmul.f32 %v11533_v1, %v11533_v1 }
  0x4e   : > { %v858_v39 = vadd.f32 %v857_v30, %v11496_v24  ;;  %v928_v41 = vadd.f32 %v927_v34, %v897_v26  ;;  %v906_v30 = vmul.f32 %v11545_v19, %v11545_v19  ;;  %v1560_v34 = vld [vmem:[#allocation3 + $0x68] sm:$0xff] }
  0x4f   : > { %8557 = vmatmul.mubr.f32.vlgmr.msra.gmra.mrb[0].mxu0 %v14706_v0 }
  0x50   : > { %10079 = vmatpush3.bf16.msra.mxu0 %v10076_v16  ;;  %v859_v44 = vadd.f32 %v858_v39, %v11502_v29  ;;  %v929_v47 = vadd.f32 %v928_v41, %v898_v33  ;;  %v1557_v16 = vld [vmem:[#allocation3 + $0x50] sm:$0xff]  ;;  %v1559_v33 = vld [vmem:[#allocation3 + $0x60] sm:$0xff]  ;;  %v907_v39 = vmul.f32 %v11551_v25, %v11551_v25 }
  0x51   : > { %10081 = vmatprep.subr.bf16.mxu0 %v10080_v31  ;;  %v10096_v28 = vpack.c.bf16 %v1558_v18, %v1557_v16  ;;  %v11563_v41 = vld [vmem:[%s11407_s18 + $0xd0] sm:$0xff] }
  0x52   : > { %v860_v52 = vadd.f32 %v859_v44, %v11509_v37  ;;  %v930_v55 = vadd.f32 %v929_v47, %v899_v40 }
  0x54   : > { %10083 = vmatpush3.bf16.msra.mxu0 %v10080_v31  ;;  %v861_v57 = vadd.f32 %v860_v52, %v11515_v42  ;;  %v931_v61 = vadd.f32 %v930_v55, %v900_v46  ;;  %v908_v46 = vmul.f32 %v11557_v35, %v11557_v35  ;;  %v11569_v52 = vld [vmem:[%s11407_s18 + $0xd8] sm:$0xff]  ;;  %v909_v55 = vmul.f32 %v11563_v41, %v11563_v41 }
  0x55   : > { %10085 = vmatprep.subr.bf16.mxu0 %v10084_v45  ;;  %v910_v62 = vmul.f32 %v11569_v52, %v11569_v52 }
  0x56   : > { %v862_v3 = vadd.f32 %v861_v57, %v11521_v51  ;;  %v932_v5 = vadd.f32 %v931_v61, %v901_v53  ;;  %v10104_v61 = vpack.c.bf16 %v1562_v50, %v1561_v48 }
  0x58   : > { %10087 = vmatpush3.bf16.msra.mxu0 %v10084_v45  ;;  %v863_v7 = vadd.f32 %v862_v3, %v11527_v56  ;;  %v933_v11 = vadd.f32 %v932_v5, %v902_v59  ;;  %v10100_v45 = vpack.c.bf16 %v1560_v34, %v1559_v33  ;;  %v2029_v3 = vld [vmem:[#allocation3 + $0x100] sm:$0xff]  ;;  %v11581_v5 = vld [vmem:[%s11407_s18 + $0xe8] sm:$0xff] }
  0x59   : > { %10089 = vmatprep.subr.bf16.mxu0 %v10088_v58 }
  0x5a   : > { %v864_v20 = vadd.f32 %v863_v7, %v11533_v1  ;;  %v934_v23 = vadd.f32 %v933_v11, %v903_v4  ;;  %v2030_v4 = vld [vmem:[#allocation3 + $0x108] sm:$0xff]  ;;  %v842_v11 = vld [vmem:[%s11407_s18 + $0xf0] sm:$0xff] }
  0x5b   : > { %v11588_v18 = vpack.c.bf16 %v2030_v4, %v2029_v3 }
  0x5c   : > { %10091 = vmatpush3.bf16.msra.mxu0 %v10088_v58  ;;  %v865_v26 = vadd.f32 %v864_v20, %v11539_v6  ;;  %v935_v31 = vadd.f32 %v934_v23, %v904_v10  ;;  %v11575_v58 = vld [vmem:[%s11407_s18 + $0xe0] sm:$0xff]  ;;  %v912_v20 = vmul.f32 %v11581_v5, %v11581_v5  ;;  %v843_v23 = vld [vmem:[%s11407_s18 + $0xf8] sm:$0xff] }
  0x5d   : > { %10093 = vmatprep.subr.bf16.mxu0 %v10092_v9  ;;  %v914_v33 = vmul.f32 %v843_v23, %v843_v23 }
  0x5e   : > { %v866_v36 = vadd.f32 %v865_v26, %v11545_v19  ;;  %v936_v40 = vadd.f32 %v935_v31, %v905_v22 }
  0x60   : > { %10095 = vmatpush3.bf16.msra.mxu0 %v10092_v9  ;;  %v867_v44 = vadd.f32 %v866_v36, %v11551_v25  ;;  %v937_v47 = vadd.f32 %v936_v40, %v906_v30  ;;  %v911_v9 = vmul.f32 %v11575_v58, %v11575_v58 }
  0x61   : > { %10097 = vmatprep.subr.bf16.mxu0 %v10096_v28 }
  0x62   : > { %v868_v53 = vadd.f32 %v867_v44, %v11557_v35  ;;  %v938_v57 = vadd.f32 %v937_v47, %v907_v39 }
  0x64   : > { %10099 = vmatpush3.bf16.msra.mxu0 %v10096_v28  ;;  %v869_v59 = vadd.f32 %v868_v53, %v11563_v41  ;;  %v939_v63 = vadd.f32 %v938_v57, %v908_v46  ;;  %v913_v28 = vmul.f32 %v842_v11, %v842_v11 }
  0x65   : > { %10101 = vmatprep.subr.bf16.mxu0 %v10100_v45 }
  0x66   : > { %v870_v7 = vadd.f32 %v869_v59, %v11569_v52  ;;  %v940_v10 = vadd.f32 %v939_v63, %v909_v55 }
  0x68   : > { %10103 = vmatpush3.bf16.msra.mxu0 %v10100_v45  ;;  %v871_v16 = vadd.f32 %v870_v7, %v11575_v58  ;;  %v941_v22 = vadd.f32 %v940_v10, %v910_v62 }
  0x69   : > { %10105 = vmatprep.subr.bf16.mxu0 %v10104_v61 }
  0x6a   : > { %v872_v26 = vadd.f32 %v871_v16, %v11581_v5  ;;  %v942_v30 = vadd.f32 %v941_v22, %v911_v9 }
  0x6c   : > { %10107 = vmatpush3.bf16.msra.mxu0 %v10104_v61  ;;  %v873_v31 = vadd.f32 %v872_v26, %v842_v11  ;;  %v943_v34 = vadd.f32 %v942_v30, %v912_v20 }
  0x6d   : > { %10109 = vmatprep.subr.bf16.mxu0 %v11588_v18 }
  0x6e   : > { %v874_v36 = vadd.f32 %v873_v31, %v843_v23  ;;  %v944_v39 = vadd.f32 %v943_v34, %v913_v28 }
  0x70   : > { %v875_v40 = vrot.slane %v874_v36, 4  ;;  %v945_v44 = vadd.f32 %v944_v39, %v914_v33 }
  0x72   : > { %v876_v45 = vadd.f32 %v875_v40, %v874_v36  ;;  %v946_v46 = vrot.slane %v945_v44, 4 }
  0x74   : > { %v877_v47 = vrot.slane %v876_v45, 2  ;;  %v947_v48 = vadd.f32 %v946_v46, %v945_v44 }
  0x76   : > { %v878_v50 = vadd.f32 %v877_v47, %v876_v45  ;;  %v948_v53 = vrot.slane %v947_v48, 2 }
  0x78   : > { %v879_v55 = vrot.slane %v878_v50, 1  ;;  %v949_v57 = vadd.f32 %v948_v53, %v947_v48 }
  0x7a   : > { %v880_v59 = vadd.f32 %v879_v55, %v878_v50  ;;  %v950_v62 = vrot.slane %v949_v57, 1 }
  0x7c   : > { %v11595_v61 = vmul.f32 0.00390625, %v880_v59  ;;  %v951_v63 = vadd.f32 %v950_v62, %v949_v57 }
  0x7e   : > { %v953_v3 = vmul.f32 %v11595_v61, %v11595_v61  ;;  %v952_v4 = vmul.f32 0.00390625, %v951_v63  ;;  %v955_v10 = vsub.f32 %v11410_v12, %v11595_v61  ;;  %v956_v11 = vsub.f32 %v11413_v13, %v11595_v61 }
  0x7f   : > { %v957_v16 = vsub.f32 %v11416_v14, %v11595_v61  ;;  %v958_v20 = vsub.f32 %v11419_v15, %v11595_v61  ;;  %v959_v22 = vsub.f32 %v11430_v21, %v11595_v61  ;;  %v960_v23 = vsub.f32 %v11436_v27, %v11595_v61 }
  0x80   : > { %v954_v7 = vsub.f32 %v952_v4, %v953_v3  ;;  %v961_v12 = vsub.f32 %v11442_v32, %v11595_v61  ;;  %v962_v27 = vsub.f32 %v11448_v38, %v11595_v61  ;;  %v963_v31 = vsub.f32 %v11454_v43, %v11595_v61 }
  0x81   : > { %v964_v43 = vsub.f32 %v11460_v49, %v11595_v61  ;;  %v965_v50 = vsub.f32 %v11466_v54, %v11595_v61  ;;  %v966_v49 = vsub.f32 %v11472_v60, %v11595_v61  ;;  %v967_v54 = vsub.f32 %v11478_v2, %v11595_v61 }
  0x82   : > { %v987_v9 = vadd.f32 1e-05, %v954_v7  ;;  %v968_v60 = vsub.f32 %v11484_v8, %v11595_v61  ;;  %v969_v2 = vsub.f32 %v11490_v17, %v11595_v61  ;;  %v970_v8 = vsub.f32 %v11496_v24, %v11595_v61 }
  0x83   : > { %v971_v17 = vsub.f32 %v11502_v29, %v11595_v61  ;;  %v972_v24 = vsub.f32 %v11509_v37, %v11595_v61  ;;  %v973_v29 = vsub.f32 %v11515_v42, %v11595_v61  ;;  %v974_v37 = vsub.f32 %v11521_v51, %v11595_v61 }
  0x84   : > { %11266 = vrsqrt.f32 %v987_v9  ;;  %v975_v42 = vsub.f32 %v11527_v56, %v11595_v61  ;;  %v976_v51 = vsub.f32 %v11533_v1, %v11595_v61  ;;  %v977_v56 = vsub.f32 %v11539_v6, %v11595_v61 }
  0x85   : > { %v978_v1 = vsub.f32 %v11545_v19, %v11595_v61  ;;  %v979_v6 = vsub.f32 %v11551_v25, %v11595_v61  ;;  %v980_v19 = vsub.f32 %v11557_v35, %v11595_v61  ;;  %v981_v25 = vsub.f32 %v11563_v41, %v11595_v61 }
  0x86   : > { %v982_v35 = vsub.f32 %v11569_v52, %v11595_v61  ;;  %v983_v41 = vsub.f32 %v11575_v58, %v11595_v61  ;;  %v271_v52 = vlaneseq  ;;  %v984_v58 = vsub.f32 %v11581_v5, %v11595_v61 }
  0x8e   : > { %v11611_v26 = vpop.eup %11266 }
  0x8f   : > { %v989_v28 = vmul.f32 %v11611_v26, %v955_v10  ;;  %v990_v13 = vmul.f32 %v11611_v26, %v956_v11  ;;  %v991_v14 = vmul.f32 %v11611_v26, %v957_v16  ;;  %v992_v30 = vmul.f32 %v11611_v26, %v958_v20 }
  0x90   : > { %v993_v15 = vmul.f32 %v11611_v26, %v959_v22  ;;  %v994_v21 = vmul.f32 %v11611_v26, %v960_v23  ;;  %v995_v39 = vmul.f32 %v11611_v26, %v961_v12  ;;  %v996_v48 = vmul.f32 %v11611_v26, %v962_v27 }
  0x91   : > { %vm1021_vm0 = vcmp.ge.f32.partialorder %v989_v28, 0.0  ;;  %v1053_v32 = vmul.f32 0.2, %v989_v28  ;;  %vm1022_vm1 = vcmp.ge.f32.partialorder %v990_v13, 0.0  ;;  %v1054_v33 = vmul.f32 0.2, %v990_v13 }
  0x92   : > { %vm1023_vm2 = vcmp.ge.f32.partialorder %v991_v14, 0.0  ;;  %v1055_v34 = vmul.f32 0.2, %v991_v14  ;;  %v1056_v36 = vmul.f32 0.2, %v992_v30  ;;  %vm1024_vm3 = vcmp.ge.f32.partialorder %v992_v30, 0.0 }
  0x93   : > { %v11626_v40 = vsel %vm1021_vm0, %v989_v28, %v1053_v32  ;;  %v11628_v44 = vsel %vm1022_vm1, %v990_v13, %v1054_v33  ;;  %v1057_v45 = vmul.f32 0.2, %v993_v15  ;;  %vm1025_vm4 = vcmp.ge.f32.partialorder %v993_v15, 0.0 }
  0x94   : > { %15056 = vst [vmem:[#allocation6_spill] sm:$0xff] %v11626_v40  ;;  %15057 = vst [vmem:[#allocation7_spill] sm:$0xff] %v11628_v44  ;;  %8559 = vmatprep.mubr.f32.mxu0 %v11626_v40  ;;  %v11631_v38 = vsel %vm1023_vm2, %v991_v14, %v1055_v34  ;;  %v11637_v46 = vsel %vm1024_vm3, %v992_v30, %v1056_v36  ;;  %v1058_v47 = vmul.f32 0.2, %v994_v21  ;;  %vm1026_vm5 = vcmp.ge.f32.partialorder %v994_v21, 0.0 }
  0x95   : > { %8560 = vmatmul.mubr.f32.gmra.mrb[2].mxu0 %v11628_v44  ;;  %v11642_v53 = vsel %vm1025_vm4, %v993_v15, %v1057_v45  ;;  %v1059_v55 = vmul.f32 0.2, %v995_v39  ;;  %v997_v57 = vmul.f32 %v11611_v26, %v963_v31  ;;  %vm1027_vm6 = vcmp.ge.f32.partialorder %v995_v39, 0.0 }
  0x96   : > { %8562 = vmatprep.mubr.f32.mxu0 %v11631_v38  ;;  %v11649_v59 = vsel %vm1026_vm5, %v994_v21, %v1058_v47  ;;  %v1060_v62 = vmul.f32 0.2, %v996_v48  ;;  %v998_v63 = vmul.f32 %v11611_v26, %v964_v43  ;;  %vm1028_vm7 = vcmp.ge.f32.partialorder %v996_v48, 0.0 }
  0x97   : > { %v11654_v3 = vsel %vm1027_vm6, %v995_v39, %v1059_v55  ;;  %v1061_v4 = vmul.f32 0.2, %v997_v57  ;;  %v999_v7 = vmul.f32 %v11611_v26, %v965_v50  ;;  %vm1029_vm8 = vcmp.ge.f32.partialorder %v997_v57, 0.0 }
  0x98   : > { %v11661_v9 = vsel %vm1028_vm7, %v996_v48, %v1060_v62  ;;  %v1062_v10 = vmul.f32 0.2, %v998_v63  ;;  %v1000_v11 = vmul.f32 %v11611_v26, %v966_v49  ;;  %vm1030_vm9 = vcmp.ge.f32.partialorder %v998_v63, 0.0 }
  0x99   : > { %8563 = vmatmul.mubr.f32.gmra.mrb[4].mxu0 %v11637_v46  ;;  %v11666_v16 = vsel %vm1029_vm8, %v997_v57, %v1061_v4  ;;  %v1063_v20 = vmul.f32 0.2, %v999_v7  ;;  %v1001_v22 = vmul.f32 %v11611_v26, %v967_v54  ;;  %vm1031_vm10 = vcmp.ge.f32.partialorder %v999_v7, 0.0 }
  0x9a   : > { %8565 = vmatprep.mubr.f32.mxu0 %v11642_v53  ;;  %v11673_v23 = vsel %vm1030_vm9, %v998_v63, %v1062_v10  ;;  %v1064_v12 = vmul.f32 0.2, %v1000_v11  ;;  %v1002_v28 = vmul.f32 %v11611_v26, %v968_v60  ;;  %vm1032_vm11 = vcmp.ge.f32.partialorder %v1000_v11, 0.0 }
  0x9b   : > { %v11678_v13 = vsel %vm1031_vm10, %v999_v7, %v1063_v20  ;;  %v1065_v14 = vmul.f32 0.2, %v1001_v22  ;;  %v1003_v30 = vmul.f32 %v11611_v26, %v969_v2  ;;  %vm1033_vm12 = vcmp.ge.f32.partialorder %v1001_v22, 0.0 }
  0x9c   : > { %v11685_v15 = vsel %vm1032_vm11, %v1000_v11, %v1064_v12  ;;  %v1066_v21 = vmul.f32 0.2, %v1002_v28  ;;  %v1004_v27 = vmul.f32 %v11611_v26, %v970_v8  ;;  %vm1034_vm13 = vcmp.ge.f32.partialorder %v1002_v28, 0.0 }
  0x9d   : > { %8566 = vmatmul.mubr.f32.gmra.mrb[6].mxu0 %v11649_v59  ;;  %v11690_v31 = vsel %vm1033_vm12, %v1001_v22, %v1065_v14  ;;  %v1067_v32 = vmul.f32 0.2, %v1003_v30  ;;  %v1005_v33 = vmul.f32 %v11611_v26, %v971_v17  ;;  %vm1035_vm14 = vcmp.ge.f32.partialorder %v1003_v30, 0.0 }
  0x9e   : > { %8568 = vmatprep.mubr.f32.mxu0 %v11654_v3  ;;  %v11697_v34 = vsel %vm1034_vm13, %v1002_v28, %v1066_v21  ;;  %v1068_v36 = vmul.f32 0.2, %v1004_v27  ;;  %v1006_v39 = vmul.f32 %v11611_v26, %v972_v24  ;;  %vm1036_vm15 = vcmp.ge.f32.partialorder %v1004_v27, 0.0 }
  0x9f   : > { %v11702_v45 = vsel %vm1035_vm14, %v1003_v30, %v1067_v32  ;;  %v1069_v43 = vmul.f32 0.2, %v1005_v33  ;;  %v1007_v47 = vmul.f32 %v11611_v26, %v973_v29  ;;  %vm1037_vm0 = vcmp.ge.f32.partialorder %v1005_v33, 0.0 }
  0xa0   : > { %v11709_v48 = vsel %vm1036_vm15, %v1004_v27, %v1068_v36  ;;  %v1070_v50 = vmul.f32 0.2, %v1006_v39  ;;  %v1008_v55 = vmul.f32 %v11611_v26, %v974_v37  ;;  %vm1038_vm1 = vcmp.ge.f32.partialorder %v1006_v39, 0.0 }
  0xa1   : > { %8569 = vmatmul.mubr.f32.gmra.mrb[8].mxu0 %v11661_v9  ;;  %v11714_v57 = vsel %vm1037_vm0, %v1005_v33, %v1069_v43  ;;  %v1071_v49 = vmul.f32 0.2, %v1007_v47  ;;  %v1009_v62 = vmul.f32 %v11611_v26, %v975_v42  ;;  %vm1039_vm2 = vcmp.ge.f32.partialorder %v1007_v47, 0.0 }
  0xa2   : > { %8571 = vmatprep.mubr.f32.mxu0 %v11666_v16  ;;  %v11721_v63 = vsel %vm1038_vm1, %v1006_v39, %v1070_v50  ;;  %v1072_v54 = vmul.f32 0.2, %v1008_v55  ;;  %v1010_v4 = vmul.f32 %v11611_v26, %v976_v51  ;;  %vm1040_vm3 = vcmp.ge.f32.partialorder %v1008_v55, 0.0 }
  0xa3   : > { %v11726_v7 = vsel %vm1039_vm2, %v1007_v47, %v1071_v49  ;;  %v1073_v60 = vmul.f32 0.2, %v1009_v62  ;;  %v1011_v10 = vmul.f32 %v11611_v26, %v977_v56  ;;  %vm1041_vm4 = vcmp.ge.f32.partialorder %v1009_v62, 0.0 }
  0xa4   : > { %v11733_v11 = vsel %vm1040_vm3, %v1008_v55, %v1072_v54  ;;  %v1074_v2 = vmul.f32 0.2, %v1010_v4  ;;  %v1012_v20 = vmul.f32 %v11611_v26, %v978_v1  ;;  %vm1042_vm5 = vcmp.ge.f32.partialorder %v1010_v4, 0.0 }
  0xa5   : > { %8572 = vmatmul.mubr.f32.gmra.mrb[10].mxu0 %v11673_v23  ;;  %v11738_v22 = vsel %vm1041_vm4, %v1009_v62, %v1073_v60  ;;  %v1075_v8 = vmul.f32 0.2, %v1011_v10  ;;  %v1013_v12 = vmul.f32 %v11611_v26, %v979_v6  ;;  %vm1043_vm6 = vcmp.ge.f32.partialorder %v1011_v10, 0.0 }
  0xa6   : > { %8574 = vmatprep.mubr.f32.mxu0 %v11678_v13  ;;  %v11745_v28 = vsel %vm1042_vm5, %v1010_v4, %v1074_v2  ;;  %v1076_v17 = vmul.f32 0.2, %v1012_v20  ;;  %v1014_v14 = vmul.f32 %v11611_v26, %v980_v19  ;;  %vm1044_vm7 = vcmp.ge.f32.partialorder %v1012_v20, 0.0  ;;  %v2031_v19 = vld [vmem:[#allocation3 + $0x110] sm:$0xff]  ;;  %v2032_v2 = vld [vmem:[#allocation3 + $0x118] sm:$0xff] }
  0xa7   : > { %v11750_v30 = vsel %vm1043_vm6, %v1011_v10, %v1075_v8  ;;  %v1077_v24 = vmul.f32 0.2, %v1013_v12  ;;  %v1015_v21 = vmul.f32 %v11611_v26, %v981_v25  ;;  %vm1045_vm8 = vcmp.ge.f32.partialorder %v1013_v12, 0.0 }
  0xa8   : > { %v11755_v27 = vsel %vm1044_vm7, %v1012_v20, %v1076_v17  ;;  %v1078_v29 = vmul.f32 0.2, %v1014_v14  ;;  %v1016_v32 = vmul.f32 %v11611_v26, %v982_v35  ;;  %vm1046_vm9 = vcmp.ge.f32.partialorder %v1014_v14, 0.0 }
  0xa9   : > { %8575 = vmatmul.mubr.f32.gmra.mrb[12].mxu0 %v11685_v15  ;;  %v11760_v33 = vsel %vm1045_vm8, %v1013_v12, %v1077_v24  ;;  %v1079_v37 = vmul.f32 0.2, %v1015_v21  ;;  %v1017_v36 = vmul.f32 %v11611_v26, %v983_v41  ;;  %vm1047_vm10 = vcmp.ge.f32.partialorder %v1015_v21, 0.0  ;;  %v2033_v41 = vld [vmem:[#allocation3 + $0x120] sm:$0xff]  ;;  %v2034_v24 = vld [vmem:[#allocation3 + $0x128] sm:$0xff] }
  0xaa   : > { %8577 = vmatprep.mubr.f32.mxu0 %v11690_v31  ;;  %v11765_v39 = vsel %vm1046_vm9, %v1014_v14, %v1078_v29  ;;  %v1080_v42 = vmul.f32 0.2, %v1016_v32  ;;  %v1018_v43 = vmul.f32 %v11611_v26, %v984_v58  ;;  %vm1048_vm11 = vcmp.ge.f32.partialorder %v1016_v32, 0.0 }
  0xab   : > { %v11768_v47 = vsel %vm1047_vm10, %v1015_v21, %v1079_v37  ;;  %v1081_v5 = vmul.f32 0.2, %v1017_v36  ;;  %v11770_v51 = vshrl.u32 %v271_v52, 7  ;;  %vm1049_vm12 = vcmp.ge.f32.partialorder %v1017_v36, 0.0  ;;  %v6388_v52 = vld [vmem:[%s14700_s3 + $0x3b0] sm:$0xff] }
  0xac   : > { %v11774_v50 = vsel %vm1048_vm11, %v1016_v32, %v1080_v42  ;;  %v1082_v55 = vmul.f32 0.2, %v1018_v43  ;;  %vm1050_vm13 = vcmp.ge.f32.partialorder %v1018_v43, 0.0  ;;  %v11785_v54 = vrot.slane %v14706_v0, 7  ;;  %v2035_v42 = vld [vmem:[#allocation3 + $0x130] sm:$0xff]  ;;  %v2042_v0 = vld [vmem:[#allocation3 + $0x168] sm:$0xff] }
  0xad   : > { %8578 = vmatmul.mubr.f32.gmra.mrb[14].mxu0 %v11697_v34  ;;  %15058 = vst [vmem:[#allocation8_spill] sm:$0xff] %v11774_v50  ;;  %v11776_v56 = vsel %vm1049_vm12, %v1017_v36, %v1081_v5  ;;  %v312_v49 = vand.u32 15, %v11770_v51  ;;  %v274_v62 = vadd.s32 16, %v11770_v51  ;;  %v276_v4 = vadd.s32 32, %v11770_v51 }
  0xae   : > { %8580 = vmatprep.mubr.f32.mxu0 %v11702_v45  ;;  %15059 = vst [vmem:[#allocation9_spill] sm:$0xff] %v11776_v56  ;;  %v11782_v1 = vsel %vm1050_vm13, %v1018_v43, %v1082_v55  ;;  %15061 = vst [vmem:[#allocation11_spill] sm:$0xff] %v11785_v54  ;;  %v1368_v6 = vrot.slane %v11626_v40, 7  ;;  %v15062_v60 = vmov 0  ;;  %vm14779_vm15 = vcmp.lt.s32.totalorder %v11770_v51, 1  ;;  %v2036_v43 = vld [vmem:[#allocation3 + $0x138] sm:$0xff] }
  0xaf   : > { %15060 = vst [vmem:[#allocation10_spill] sm:$0xff] %v11782_v1  ;;  %vm11789_vm14 = vcmp.gt.s32.totalorder %v312_v49, 0  ;;  %v326_v10 = vand.u32 15, %v274_v62  ;;  %v1369_v20 = vrot.slane %v11628_v44, 7  ;;  %v340_v25 = vand.u32 15, %v276_v4 }
  0xb0   : > { %v15063_v60 = vsel %vm11789_vm14, 4294967295, %v15062_v60  ;;  %v278_v8 = vadd.s32 48, %v11770_v51  ;;  %v15065_v12 = vmov 0  ;;  %v11807_v35 = vsel %vm14779_vm15, %v11785_v54, %v1368_v6 }
  0xb1   : > { %8581 = vmatmul.mubr.f32.gmra.mrb[16].mxu0 %v11709_v48  ;;  %15064 = vst [vmem:[#allocation12_spill] sm:$0xff] %v15063_v60  ;;  %vm11800_vm0 = vcmp.gt.s32.totalorder %v326_v10, 0  ;;  %v1370_v17 = vrot.slane %v11631_v38, 7  ;;  %v10112_v14 = vpack.c.bf16 %v2032_v2, %v2031_v19  ;;  %v11817_v21 = vsel %vm14779_vm15, %v1368_v6, %v1369_v20  ;;  %v2037_v2 = vld [vmem:[#allocation3 + $0x140] sm:$0xff] }
  0xb2   : > { %8583 = vmatprep.mubr.f32.mxu0 %v11714_v57  ;;  %v15066_v12 = vsel %vm11800_vm0, 4294967295, %v15065_v12  ;;  %vm11819_vm1 = vcmp.gt.s32.totalorder %v340_v25, 0  ;;  %v1371_v29 = vrot.slane %v11637_v46, 7  ;;  %v354_v32 = vand.u32 15, %v278_v8 }
  0xb3   : > { %15067 = vst [vmem:[#allocation13_spill] sm:$0xff] %v15066_v12  ;;  %v11826_v58 = vsel %vm14779_vm15, %v1369_v20, %v1370_v17  ;;  %v280_v37 = vadd.s32 64, %v11770_v51  ;;  %v10116_v36 = vpack.c.bf16 %v2034_v24, %v2033_v41  ;;  %v1373_v49 = vrot.slane %v11649_v59, 7  ;;  %v2038_v20 = vld [vmem:[#allocation3 + $0x148] sm:$0xff] }
  0xb4   : > { %v11836_v5 = vsel %vm14779_vm15, %v1370_v17, %v1371_v29  ;;  %vm11838_vm2 = vcmp.gt.s32.totalorder %v354_v32, 0  ;;  %v282_v62 = vadd.s32 80, %v11770_v51  ;;  %v1374_v10 = vrot.slane %v11654_v3, 7 }
  0xb5   : > { %8584 = vmatmul.mubr.f32.gmra.mrb[18].mxu0 %v11721_v63  ;;  %v368_v6 = vand.u32 15, %v280_v37  ;;  %v10120_v19 = vpack.c.bf16 %v2036_v43, %v2035_v42  ;;  %v1375_v8 = vrot.slane %v11661_v9, 7  ;;  %v15072_v41 = vmov 0  ;;  %v2040_v37 = vld [vmem:[#allocation3 + $0x158] sm:$0xff] }
  0xb6   : > { %8586 = vmatprep.mubr.f32.mxu0 %v11726_v7  ;;  %v382_v17 = vand.u32 15, %v282_v62  ;;  %v11865_v24 = vsel %vm14779_vm15, %v1373_v49, %v1374_v10  ;;  %v10124_v32 = vpack.c.bf16 %v2038_v20, %v2037_v2  ;;  %v15076_v42 = vmov 0 }
  0xb7   : > { %vm11859_vm3 = vcmp.gt.s32.totalorder %v368_v6, 0  ;;  %15075 = vst [vmem:[#allocation15_spill] sm:$0xff] %v11865_v24  ;;  %v1377_v43 = vrot.slane %v11673_v23, 7  ;;  %v1378_v6 = vrot.slane %v11678_v13, 7  ;;  %v286_v2 = vadd.s32 112, %v11770_v51 }
  0xb8   : > { %v15073_v41 = vsel %vm11859_vm3, 4294967295, %v15072_v41  ;;  %vm11876_vm4 = vcmp.gt.s32.totalorder %v382_v17, 0  ;;  %v1379_v17 = vrot.slane %v11685_v15, 7  ;;  %v1380_v60 = vrot.slane %v11690_v31, 7 }
  0xb9   : > { %8587 = vmatmul.mubr.f32.gmra.mrb[20].mxu0 %v11733_v11  ;;  %15074 = vst [vmem:[#allocation14_spill] sm:$0xff] %v15073_v41  ;;  %v15077_v42 = vsel %vm11876_vm4, 4294967295, %v15076_v42 }
  0xba   : > { %8589 = vmatprep.mubr.f32.mxu0 %v11738_v22  ;;  %15078 = vst [vmem:[#allocation16_spill] sm:$0xff] %v15077_v42  ;;  %v2044_v42 = vld [vmem:[#allocation3 + $0x178] sm:$0xff] }
  0xbd   : > { %8590 = vmatmul.mubr.f32.gmra.mrb[22].mxu0 %v11745_v28 }
  0xbe   : > { %8592 = vmatprep.mubr.f32.mxu0 %v11750_v30 }
  0xc1   : > { %8593 = vmatmul.mubr.f32.gmra.mrb[24].mxu0 %v11755_v27 }
  0xc2   : > { %8595 = vmatprep.mubr.f32.mxu0 %v11760_v33 }
  0xc5   : > { %8596 = vmatmul.mubr.f32.gmra.mrb[26].mxu0 %v11765_v39 }
  0xc6   : > { %8598 = vmatprep.mubr.f32.mxu0 %v11768_v47 }
  0xc9   : > { %8599 = vmatmul.mubr.f32.gmra.mrb[28].mxu0 %v11774_v50 }
  0xca   : > { %8601 = vmatprep.mubr.f32.mxu0 %v11776_v56 }
  0xcd   : > { %8602 = vmatmul.mubr.f32.gmra.mrb[30].mxu0 %v11782_v1 }
  0xce   : > { %8636 = vmatprep.mubr.msk.f32.mxu0 %vm11789_vm14, %v11785_v54 }
  0xd1   : > { %8637 = vmatmul.mubr.f32.vlgmr.msra.gmra.mrb[0].mxu0 %v11785_v54 }
  0xd2   : > { %10111 = vmatpush3.bf16.msra.mxu0 %v11588_v18  ;;  %8639 = vmatprep.mubr.msk.f32.mxu0 %vm11800_vm0, %v11807_v35  ;;  %v1372_v18 = vrot.slane %v11642_v53, 7 }
  0xd3   : > { %10113 = vmatprep.subr.bf16.mxu0 %v10112_v14 }
  0xd4   : > { %v11846_v4 = vsel %vm14779_vm15, %v1371_v29, %v1372_v18  ;;  %v11855_v25 = vsel %vm14779_vm15, %v1372_v18, %v1373_v49  ;;  %v1376_v29 = vrot.slane %v11666_v16, 7  ;;  %v2039_v18 = vld [vmem:[#allocation3 + $0x150] sm:$0xff] }
  0xd5   : > { %8640 = vmatmul.mubr.f32.gmra.mrb[2].mxu0 %v11817_v21  ;;  %v10128_v20 = vpack.c.bf16 %v2040_v37, %v2039_v18  ;;  %v11903_v18 = vsel %vm14779_vm15, %v1377_v43, %v1378_v6  ;;  %v410_v37 = vand.u32 15, %v286_v2  ;;  %v290_v2 = vadd.s32 144, %v11770_v51 }
  0xd6   : > { %8642 = vmatprep.mubr.msk.f32.mxu0 %vm11819_vm1, %v11826_v58  ;;  %10115 = vmatpush3.bf16.msra.mxu0 %v10112_v14  ;;  %v284_v14 = vadd.s32 96, %v11770_v51  ;;  %v11883_v62 = vsel %vm14779_vm15, %v1375_v8, %v1376_v29  ;;  %15084 = vst [vmem:[#allocation20_spill] sm:$0xff] %v11903_v18 }
  0xd7   : > { %10117 = vmatprep.subr.bf16.mxu0 %v10116_v36  ;;  %15079 = vst [vmem:[#allocation17_spill] sm:$0xff] %v11883_v62  ;;  %vm11916_vm6 = vcmp.gt.s32.totalorder %v410_v37, 0  ;;  %v438_v37 = vand.u32 15, %v290_v2 }
  0xd8   : > { %v396_v49 = vand.u32 15, %v284_v14  ;;  %v288_v14 = vadd.s32 128, %v11770_v51 }
  0xd9   : > { %8643 = vmatmul.mubr.f32.gmra.mrb[4].mxu0 %v11836_v5  ;;  %vm11956_vm8 = vcmp.gt.s32.totalorder %v438_v37, 0 }
  0xda   : > { %8645 = vmatprep.mubr.msk.f32.mxu0 %vm11838_vm2, %v11846_v4  ;;  %10119 = vmatpush3.bf16.msra.mxu0 %v10116_v36  ;;  %v11874_v36 = vsel %vm14779_vm15, %v1374_v10, %v1375_v8  ;;  %v2041_v10 = vld [vmem:[#allocation3 + $0x160] sm:$0xff]  ;;  %vm11895_vm5 = vcmp.gt.s32.totalorder %v396_v49, 0  ;;  %v15081_v8 = vmov 0  ;;  %v424_v49 = vand.u32 15, %v288_v14 }
  0xdb   : > { %10121 = vmatprep.subr.bf16.mxu0 %v10120_v19  ;;  %v15082_v8 = vsel %vm11895_vm5, 4294967295, %v15081_v8  ;;  %v10132_v54 = vpack.c.bf16 %v2042_v0, %v2041_v10  ;;  %v15086_v0 = vmov 0  ;;  %v11922_v10 = vsel %vm14779_vm15, %v1379_v17, %v1380_v60 }
  0xdc   : > { %15083 = vst [vmem:[#allocation19_spill] sm:$0xff] %v15082_v8  ;;  %v15087_v0 = vsel %vm11916_vm6, 4294967295, %v15086_v0  ;;  %15089 = vst [vmem:[#allocation23_spill] sm:$0xff] %v11922_v10  ;;  %v1382_v8 = vrot.slane %v11702_v45, 7  ;;  %vm11933_vm7 = vcmp.gt.s32.totalorder %v424_v49, 0  ;;  %v15091_v14 = vmov 0 }
  0xdd   : > { %8646 = vmatmul.mubr.f32.gmra.mrb[6].mxu0 %v11855_v25  ;;  %15088 = vst [vmem:[#allocation22_spill] sm:$0xff] %v15087_v0  ;;  %v15092_v14 = vsel %vm11933_vm7, 4294967295, %v15091_v14  ;;  %v292_v0 = vadd.s32 160, %v11770_v51  ;;  %v15096_v49 = vmov 0  ;;  %v15210_v41 = vld [vmem:[#allocation20_spill] sm:$0xff] }
  0xde   : > { %8648 = vmatprep.mubr.msk.f32.mxu0 %vm11859_vm3, %v11865_v24  ;;  %10123 = vmatpush3.bf16.msra.mxu0 %v10120_v19  ;;  %v11893_v19 = vsel %vm14779_vm15, %v1376_v29, %v1377_v43  ;;  %v2043_v29 = vld [vmem:[#allocation3 + $0x170] sm:$0xff]  ;;  %v1381_v43 = vrot.slane %v11697_v34, 7  ;;  %15093 = vst [vmem:[#allocation25_spill] sm:$0xff] %v15092_v14  ;;  %v15097_v49 = vsel %vm11956_vm8, 4294967295, %v15096_v49  ;;  %v2307_v14 = vld [vmem:[#allocation3 + $0x1a8] sm:$0xff] }
  0xdf   : > { %10125 = vmatprep.subr.bf16.mxu0 %v10124_v32  ;;  %15080 = vst [vmem:[#allocation18_spill] sm:$0xff] %v11893_v19  ;;  %15098 = vst [vmem:[#allocation28_spill] sm:$0xff] %v15097_v49  ;;  %v452_v2 = vand.u32 15, %v292_v0  ;;  %v296_v49 = vadd.s32 192, %v11770_v51 }
  0xe1   : > { %8649 = vmatmul.mubr.f32.gmra.mrb[8].mxu0 %v11874_v36  ;;  %vm11975_vm9 = vcmp.gt.s32.totalorder %v452_v2, 0 }
  0xe2   : > { %8651 = vmatprep.mubr.msk.f32.mxu0 %vm11876_vm4, %v11883_v62  ;;  %10127 = vmatpush3.bf16.msra.mxu0 %v10124_v32  ;;  %v11912_v32 = vsel %vm14779_vm15, %v1378_v6, %v1379_v17  ;;  %v2302_v6 = vld [vmem:[#allocation3 + $0x180] sm:$0xff]  ;;  %v1383_v17 = vrot.slane %v11709_v48, 7 }
  0xe3   : > { %10129 = vmatprep.subr.bf16.mxu0 %v10128_v20  ;;  %15085 = vst [vmem:[#allocation21_spill] sm:$0xff] %v11912_v32 }
  0xe5   : > { %8652 = vmatmul.mubr.f32.gmra.mrb[10].mxu0 %v11893_v19  ;;  %v2303_v19 = vld [vmem:[#allocation3 + $0x188] sm:$0xff] }
  0xe6   : > { %8654 = vmatprep.mubr.msk.f32.mxu0 %vm11895_vm5, %v11903_v18  ;;  %10131 = vmatpush3.bf16.msra.mxu0 %v10128_v20  ;;  %v10136_v18 = vpack.c.bf16 %v2044_v42, %v2043_v29  ;;  %v11931_v20 = vsel %vm14779_vm15, %v1380_v60, %v1381_v43  ;;  %v11940_v42 = vsel %vm14779_vm15, %v1381_v43, %v1382_v8  ;;  %v1384_v29 = vrot.slane %v11714_v57, 7  ;;  %v15209_v12 = vld [vmem:[#allocation18_spill] sm:$0xff] }
  0xe7   : > { %10133 = vmatprep.subr.bf16.mxu0 %v10132_v54  ;;  %15090 = vst [vmem:[#allocation24_spill] sm:$0xff] %v11931_v20  ;;  %15094 = vst [vmem:[#allocation26_spill] sm:$0xff] %v11940_v42  ;;  %v1385_v60 = vrot.slane %v11721_v63, 7  ;;  %v294_v43 = vadd.s32 176, %v11770_v51 }
  0xe9   : > { %8655 = vmatmul.mubr.f32.gmra.mrb[12].mxu0 %v11912_v32  ;;  %v466_v37 = vand.u32 15, %v294_v43  ;;  %v15106_v43 = vmov 0 }
  0xea   : > { %8657 = vmatprep.mubr.msk.f32.mxu0 %vm11916_vm6, %v11922_v10  ;;  %10135 = vmatpush3.bf16.msra.mxu0 %v10132_v54  ;;  %v11944_v10 = vpack.c.bf16 %v2303_v19, %v2302_v6  ;;  %v11952_v54 = vsel %vm14779_vm15, %v1382_v8, %v1383_v17  ;;  %v11962_v19 = vsel %vm14779_vm15, %v1383_v17, %v1384_v29  ;;  %v1386_v6 = vrot.slane %v11726_v7, 7 }
  0xeb   : > { %10137 = vmatprep.subr.bf16.mxu0 %v10136_v18  ;;  %15095 = vst [vmem:[#allocation27_spill] sm:$0xff] %v11952_v54  ;;  %15099 = vst [vmem:[#allocation29_spill] sm:$0xff] %v11962_v19  ;;  %v11972_v8 = vsel %vm14779_vm15, %v1384_v29, %v1385_v60  ;;  %v15101_v17 = vmov 0  ;;  %vm11993_vm10 = vcmp.gt.s32.totalorder %v466_v37, 0  ;;  %v1391_v37 = vrot.slane %v11755_v27, 7 }
  0xec   : > { %15100 = vst [vmem:[#allocation30_spill] sm:$0xff] %v11972_v8  ;;  %v15102_v17 = vsel %vm11975_vm9, 4294967295, %v15101_v17  ;;  %v11981_v0 = vsel %vm14779_vm15, %v1385_v60, %v1386_v6  ;;  %v15107_v43 = vsel %vm11993_vm10, 4294967295, %v15106_v43  ;;  %v1389_v60 = vrot.slane %v11745_v28, 7 }
  0xed   : > { %8658 = vmatmul.mubr.f32.gmra.mrb[14].mxu0 %v11931_v20  ;;  %15103 = vst [vmem:[#allocation31_spill] sm:$0xff] %v15102_v17  ;;  %15104 = vst [vmem:[#allocation32_spill] sm:$0xff] %v11981_v0  ;;  %v298_v17 = vadd.s32 208, %v11770_v51 }
  0xee   : > { %8660 = vmatprep.mubr.msk.f32.mxu0 %vm11933_vm7, %v11940_v42  ;;  %10139 = vmatpush3.bf16.msra.mxu0 %v10136_v18  ;;  %v1387_v18 = vrot.slane %v11733_v11, 7  ;;  %15108 = vst [vmem:[#allocation34_spill] sm:$0xff] %v15107_v43  ;;  %v1392_v43 = vrot.slane %v11760_v33, 7  ;;  %v1191_v42 = vrot.slane %v11642_v53, 1 }
  0xef   : > { %10141 = vmatprep.subr.bf16.mxu0 %v11944_v10 }
  0xf0   : > { %v11991_v29 = vsel %vm14779_vm15, %v1386_v6, %v1387_v18 }
  0xf1   : > { %8661 = vmatmul.mubr.f32.gmra.mrb[16].mxu0 %v11952_v54  ;;  %v1388_v54 = vrot.slane %v11738_v22, 7  ;;  %15105 = vst [vmem:[#allocation33_spill] sm:$0xff] %v11991_v29 }
  0xf2   : > { %8663 = vmatprep.mubr.msk.f32.mxu0 %vm11956_vm8, %v11962_v19  ;;  %v480_v19 = vand.u32 15, %v296_v49  ;;  %v15111_v49 = vmov 0 }
  0xf3   : > { %v12000_v2 = vsel %vm14779_vm15, %v1387_v18, %v1388_v54  ;;  %v12010_v6 = vsel %vm14779_vm15, %v1388_v54, %v1389_v60  ;;  %v300_v18 = vadd.s32 224, %v11770_v51 }
  0xf4   : > { %15109 = vst [vmem:[#allocation35_spill] sm:$0xff] %v12000_v2  ;;  %15110 = vst [vmem:[#allocation36_spill] sm:$0xff] %v12010_v6  ;;  %vm12014_vm11 = vcmp.gt.s32.totalorder %v480_v19, 0  ;;  %v1393_v19 = vrot.slane %v11765_v39, 7 }
  0xf5   : > { %8664 = vmatmul.mubr.f32.gmra.mrb[18].mxu0 %v11972_v8  ;;  %v1390_v8 = vrot.slane %v11750_v30, 7  ;;  %v15112_v49 = vsel %vm12014_vm11, 4294967295, %v15111_v49 }
  0xf6   : > { %8666 = vmatprep.mubr.msk.f32.mxu0 %vm11975_vm9, %v11981_v0  ;;  %15113 = vst [vmem:[#allocation37_spill] sm:$0xff] %v15112_v49  ;;  %v1394_v49 = vrot.slane %v11768_v47, 7 }
  0xf7   : > { %v12020_v0 = vsel %vm14779_vm15, %v1389_v60, %v1390_v8  ;;  %v12029_v54 = vsel %vm14779_vm15, %v1390_v8, %v1391_v37  ;;  %v15116_v60 = vmov 0  ;;  %v12048_v8 = vsel %vm14779_vm15, %v1392_v43, %v1393_v19 }
  0xf8   : > { %15114 = vst [vmem:[#allocation38_spill] sm:$0xff] %v12020_v0  ;;  %15115 = vst [vmem:[#allocation39_spill] sm:$0xff] %v12029_v54 }
  0xf9   : > { %8667 = vmatmul.mubr.f32.gmra.mrb[20].mxu0 %v11991_v29  ;;  %v494_v29 = vand.u32 15, %v298_v17  ;;  %v12039_v17 = vsel %vm14779_vm15, %v1391_v37, %v1392_v43  ;;  %15120 = vst [vmem:[#allocation42_spill] sm:$0xff] %v12048_v8  ;;  %v12057_v37 = vsel %vm14779_vm15, %v1393_v19, %v1394_v49  ;;  %v15126_v19 = vmov 0 }
  0xfa   : > { %8669 = vmatprep.mubr.msk.f32.mxu0 %vm11993_vm10, %v12000_v2  ;;  %v302_v2 = vadd.s32 240, %v11770_v51  ;;  %15119 = vst [vmem:[#allocation41_spill] sm:$0xff] %v12039_v17  ;;  %15124 = vst [vmem:[#allocation44_spill] sm:$0xff] %v12057_v37 }
  0xfb   : > { %vm12033_vm12 = vcmp.gt.s32.totalorder %v494_v29, 0  ;;  %v1395_v29 = vrot.slane %v11774_v50, 7 }
  0xfc   : > { %v15117_v60 = vsel %vm12033_vm12, 4294967295, %v15116_v60 }
  0xfd   : > { %8670 = vmatmul.mubr.f32.gmra.mrb[22].mxu0 %v12010_v6  ;;  %15118 = vst [vmem:[#allocation40_spill] sm:$0xff] %v15117_v60  ;;  %v508_v6 = vand.u32 15, %v300_v18  ;;  %v522_v18 = vand.u32 15, %v302_v2  ;;  %v273_v60 = vadd.s32 8, %v11770_v51  ;;  %v12067_v43 = vsel %vm14779_vm15, %v1394_v49, %v1395_v29 }
  0xfe   : > { %8672 = vmatprep.mubr.msk.f32.mxu0 %vm12014_vm11, %v12020_v0  ;;  %v15121_v0 = vmov 0  ;;  %15125 = vst [vmem:[#allocation45_spill] sm:$0xff] %v12067_v43 }
  0xff   : > { %vm12051_vm13 = vcmp.gt.s32.totalorder %v508_v6, 0  ;;  %v14767_v6 = vrot.slane %v11782_v1, 7  ;;  %vm12070_vm14 = vcmp.gt.s32.totalorder %v522_v18, 0  ;;  %v15131_v18 = vmov 0.0  }
 0x100   : > { %v15122_v0 = vsel %vm12051_vm13, 4294967295, %v15121_v0  ;;  %v15127_v19 = vsel %vm12070_vm14, 4294967295, %v15126_v19 }
 0x101   : > { %8673 = vmatmul.mubr.f32.gmra.mrb[24].mxu0 %v12029_v54  ;;  %15123 = vst [vmem:[#allocation43_spill] sm:$0xff] %v15122_v0  ;;  %v1396_v54 = vrot.slane %v11776_v56, 7  ;;  %15128 = vst [vmem:[#allocation46_spill] sm:$0xff] %v15127_v19  ;;  %v1187_v0 = vrot.slane %v11626_v40, 1  ;;  %v2304_v40 = vld [vmem:[#allocation3 + $0x190] sm:$0xff]  ;;  %v15133_v19 = vmov 0 }
 0x102   : > { %8675 = vmatprep.mubr.msk.f32.mxu0 %vm12033_vm12, %v12039_v17  ;;  %v2306_v17 = vld [vmem:[#allocation3 + $0x1a0] sm:$0xff] }
 0x103   : > { %v12076_v2 = vsel %vm14779_vm15, %v1395_v29, %v1396_v54  ;;  %v12087_v49 = vsel %vm14779_vm15, %v1396_v54, %v14767_v6  ;;  %v275_v29 = vadd.s32 24, %v11770_v51 }
 0x104   : > { %15129 = vst [vmem:[#allocation47_spill] sm:$0xff] %v12076_v2  ;;  %15130 = vst [vmem:[#allocation48_spill] sm:$0xff] %v12087_v49 }
 0x105   : > { %8676 = vmatmul.mubr.f32.gmra.mrb[26].mxu0 %v12048_v8  ;;  %v319_v8 = vand.u32 15, %v273_v60  ;;  %v1188_v60 = vrot.slane %v11628_v44, 1  ;;  %v333_v6 = vand.u32 15, %v275_v29  ;;  %v15137_v29 = vmov 0 }
 0x106   : > { %8678 = vmatprep.mubr.msk.f32.mxu0 %vm12051_vm13, %v12057_v37  ;;  %v12090_v37 = vrot.slane %v15131_v18, 1  ;;  %vm14891_vm13 = vcmp.lt.s32.totalorder %v11770_v51, 7  ;;  %v1189_v18 = vrot.slane %v11631_v38, 1 }
 0x107   : > { %v12108_v44 = vsel %vm14891_vm13, %v1187_v0, %v1188_v60  ;;  %vm12116_vm15 = vcmp.lt.s32.totalorder %v333_v6, 15  ;;  %v2309_v6 = vld [vmem:[#allocation3 + $0x1b8] sm:$0xff] }
 0x108   : > { %15132 = vst [vmem:[#allocation49_spill] sm:$0xff] %v12090_v37  ;;  %v1255_v54 = vsel %vm14891_vm13, %v12090_v37, %v1187_v0  ;;  %15136 = vst [vmem:[#allocation51_spill] sm:$0xff] %v12108_v44  ;;  %v15138_v29 = vsel %vm12116_vm15, 4294967295, %v15137_v29  ;;  %v12122_v0 = vsel %vm14891_vm13, %v1188_v60, %v1189_v18 }
 0x109   : > { %8679 = vmatmul.mubr.f32.gmra.mrb[28].mxu0 %v12067_v43  ;;  %v2305_v43 = vld [vmem:[#allocation3 + $0x198] sm:$0xff]  ;;  %15139 = vst [vmem:[#allocation52_spill] sm:$0xff] %v15138_v29  ;;  %15140 = vst [vmem:[#allocation53_spill] sm:$0xff] %v12122_v0 }
 0x10a   : > { %8681 = vmatprep.mubr.msk.f32.mxu0 %vm12070_vm14, %v12076_v2  ;;  %vm12096_vm14 = vcmp.lt.s32.totalorder %v319_v8, 15  ;;  %v277_v2 = vadd.s32 40, %v11770_v51  ;;  %v1190_v8 = vrot.slane %v11637_v46, 1 }
 0x10b   : > { %v15134_v19 = vsel %vm12096_vm14, 4294967295, %v15133_v19 }
 0x10c   : > { %15135 = vst [vmem:[#allocation50_spill] sm:$0xff] %v15134_v19  ;;  %v10148_v19 = vpack.c.bf16 %v2307_v14, %v2306_v17  ;;  %v12135_v60 = vsel %vm14891_vm13, %v1190_v8, %v1191_v42  ;;  %v1193_v14 = vrot.slane %v11654_v3, 1  ;;  %v281_v17 = vadd.s32 72, %v11770_v51 }
 0x10d   : > { %8682 = vmatmul.mubr.f32.gmra.mrb[30].mxu0 %v12087_v49  ;;  %v10144_v49 = vpack.c.bf16 %v2305_v43, %v2304_v40  ;;  %v347_v40 = vand.u32 15, %v277_v2  ;;  %v279_v43 = vadd.s32 56, %v11770_v51  ;;  %15142 = vst [vmem:[#allocation55_spill] sm:$0xff] %v12135_v60  ;;  %v15143_v2 = vmov 0 }
 0x10e   : > { %8716 = vmatprep.mubr.f32.mxu0 %v12090_v37  ;;  %v2308_v37 = vld [vmem:[#allocation3 + $0x1b0] sm:$0xff] }
 0x111   : > { %8717 = vmatmul.mubr.msk.f32.vlgmr.msra.gmra.mrb[0].mxu0 %vm12096_vm14, %v1255_v54  ;;  %v12127_v54 = vsel %vm14891_vm13, %v1189_v18, %v1190_v8  ;;  %vm12138_vm14 = vcmp.lt.s32.totalorder %v347_v40, 15  ;;  %v361_v18 = vand.u32 15, %v279_v43  ;;  %v10152_v8 = vpack.c.bf16 %v2309_v6, %v2308_v37 }
 0x112   : > { %10143 = vmatpush3.bf16.msra.mxu0 %v11944_v10  ;;  %8719 = vmatprep.mubr.f32.mxu0 %v12108_v44  ;;  %15141 = vst [vmem:[#allocation54_spill] sm:$0xff] %v12127_v54  ;;  %v1192_v10 = vrot.slane %v11649_v59, 1  ;;  %v15144_v2 = vsel %vm12138_vm14, 4294967295, %v15143_v2  ;;  %v2310_v44 = vld [vmem:[#allocation3 + $0x1c0] sm:$0xff]  ;;  %v15147_v40 = vmov 0  ;;  %v375_v43 = vand.u32 15, %v281_v17 }
 0x113   : > { %10145 = vmatprep.subr.bf16.mxu0 %v10144_v49  ;;  %15145 = vst [vmem:[#allocation56_spill] sm:$0xff] %v15144_v2  ;;  %v283_v37 = vadd.s32 88, %v11770_v51  ;;  %v1196_v2 = vrot.slane %v11673_v23, 1 }
 0x114   : > { %v12146_v29 = vsel %vm14891_vm13, %v1191_v42, %v1192_v10  ;;  %v12160_v42 = vsel %vm14891_vm13, %v1192_v10, %v1193_v14  ;;  %v1197_v10 = vrot.slane %v11678_v13, 1 }
 0x115   : > { %8720 = vmatmul.mubr.msk.f32.gmra.mrb[2].mxu0 %vm12116_vm15, %v12122_v0  ;;  %15146 = vst [vmem:[#allocation57_spill] sm:$0xff] %v12146_v29  ;;  %v1194_v0 = vrot.slane %v11661_v9, 1  ;;  %vm12154_vm15 = vcmp.lt.s32.totalorder %v361_v18, 15  ;;  %15150 = vst [vmem:[#allocation59_spill] sm:$0xff] %v12160_v42  ;;  %v2312_v18 = vld [vmem:[#allocation3 + $0x1d0] sm:$0xff]  ;;  %v389_v17 = vand.u32 15, %v283_v37 }
 0x116   : > { %8722 = vmatprep.mubr.f32.mxu0 %v12127_v54  ;;  %10147 = vmatpush3.bf16.msra.mxu0 %v10144_v49  ;;  %v2311_v54 = vld [vmem:[#allocation3 + $0x1c8] sm:$0xff]  ;;  %v1195_v49 = vrot.slane %v11666_v16, 1  ;;  %v15148_v40 = vsel %vm12154_vm15, 4294967295, %v15147_v40  ;;  %v1199_v37 = vrot.slane %v11690_v31, 1 }
 0x117   : > { %10149 = vmatprep.subr.bf16.mxu0 %v10148_v19  ;;  %15149 = vst [vmem:[#allocation58_spill] sm:$0xff] %v15148_v40  ;;  %v12165_v6 = vsel %vm14891_vm13, %v1193_v14, %v1194_v0  ;;  %v1198_v40 = vrot.slane %v11685_v15, 1 }
 0x118   : > { %15151 = vst [vmem:[#allocation60_spill] sm:$0xff] %v12165_v6  ;;  %v12179_v14 = vsel %vm14891_vm13, %v1194_v0, %v1195_v49  ;;  %v12192_v0 = vsel %vm14891_vm13, %v1196_v2, %v1197_v10 }
 0x119   : > { %8723 = vmatmul.mubr.msk.f32.gmra.mrb[4].mxu0 %vm12138_vm14, %v12135_v60  ;;  %v2313_v60 = vld [vmem:[#allocation3 + $0x1d8] sm:$0xff]  ;;  %vm12173_vm14 = vcmp.lt.s32.totalorder %v375_v43, 15  ;;  %15155 = vst [vmem:[#allocation62_spill] sm:$0xff] %v12179_v14  ;;  %v2314_v43 = vld [vmem:[#allocation3 + $0x1e0] sm:$0xff]  ;;  %15157 = vst [vmem:[#allocation64_spill] sm:$0xff] %v12192_v0 }
 0x11a   : > { %8725 = vmatprep.mubr.f32.mxu0 %v12146_v29  ;;  %10151 = vmatpush3.bf16.msra.mxu0 %v10148_v19  ;;  %v10156_v29 = vpack.c.bf16 %v2311_v54, %v2310_v44  ;;  %v15152_v19 = vmov 0  ;;  %v285_v44 = vadd.s32 104, %v11770_v51  ;;  %v12184_v54 = vsel %vm14891_vm13, %v1195_v49, %v1196_v2 }
 0x11b   : > { %10153 = vmatprep.subr.bf16.mxu0 %v10152_v8  ;;  %v15153_v19 = vsel %vm12173_vm14, 4294967295, %v15152_v19  ;;  %15156 = vst [vmem:[#allocation63_spill] sm:$0xff] %v12184_v54 }
 0x11c   : > { %15154 = vst [vmem:[#allocation61_spill] sm:$0xff] %v15153_v19  ;;  %v403_v49 = vand.u32 15, %v285_v44  ;;  %v1200_v19 = vrot.slane %v11697_v34, 1 }
 0x11d   : > { %8726 = vmatmul.mubr.msk.f32.gmra.mrb[6].mxu0 %vm12154_vm15, %v12160_v42  ;;  %v2315_v42 = vld [vmem:[#allocation3 + $0x1e8] sm:$0xff]  ;;  %vm12195_vm15 = vcmp.lt.s32.totalorder %v389_v17, 15  ;;  %v1201_v17 = vrot.slane %v11702_v45, 1 }
 0x11e   : > { %8728 = vmatprep.mubr.f32.mxu0 %v12165_v6  ;;  %10155 = vmatpush3.bf16.msra.mxu0 %v10152_v8  ;;  %v10160_v6 = vpack.c.bf16 %v2313_v60, %v2312_v18  ;;  %v15158_v8 = vmov 0  ;;  %v287_v60 = vadd.s32 120, %v11770_v51  ;;  %v12203_v18 = vsel %vm14891_vm13, %v1197_v10, %v1198_v40 }
 0x11f   : > { %10157 = vmatprep.subr.bf16.mxu0 %v10156_v29  ;;  %v15159_v8 = vsel %vm12195_vm15, 4294967295, %v15158_v8  ;;  %15161 = vst [vmem:[#allocation66_spill] sm:$0xff] %v12203_v18  ;;  %v10164_v2 = vpack.c.bf16 %v2315_v42, %v2314_v43  ;;  %v12217_v10 = vsel %vm14891_vm13, %v1198_v40, %v1199_v37  ;;  %v289_v42 = vadd.s32 136, %v11770_v51 }
 0x120   : > { %15160 = vst [vmem:[#allocation65_spill] sm:$0xff] %v15159_v8  ;;  %v417_v44 = vand.u32 15, %v287_v60  ;;  %v12222_v43 = vsel %vm14891_vm13, %v1199_v37, %v1200_v19  ;;  %v1202_v8 = vrot.slane %v11709_v48, 1  ;;  %v12230_v40 = vsel %vm14891_vm13, %v1200_v19, %v1201_v17 }
 0x121   : > { %8729 = vmatmul.mubr.msk.f32.gmra.mrb[8].mxu0 %vm12173_vm14, %v12179_v14  ;;  %v2316_v14 = vld [vmem:[#allocation3 + $0x1f0] sm:$0xff]  ;;  %vm12211_vm14 = vcmp.lt.s32.totalorder %v403_v49, 15  ;;  %15165 = vst [vmem:[#allocation68_spill] sm:$0xff] %v12222_v43  ;;  %v2575_v49 = vld [vmem:[#allocation3 + $0x200] sm:$0xff]  ;;  %15166 = vst [vmem:[#allocation69_spill] sm:$0xff] %v12230_v40  ;;  %v431_v37 = vand.u32 15, %v289_v42 }
 0x122   : > { %8731 = vmatprep.mubr.f32.mxu0 %v12184_v54  ;;  %10159 = vmatpush3.bf16.msra.mxu0 %v10156_v29  ;;  %v2317_v54 = vld [vmem:[#allocation3 + $0x1f8] sm:$0xff]  ;;  %v15162_v29 = vmov 0  ;;  %v1203_v60 = vrot.slane %v11714_v57, 1  ;;  %v15171_v42 = vmov 0 }
 0x123   : > { %10161 = vmatprep.subr.bf16.mxu0 %v10160_v6  ;;  %v15163_v29 = vsel %vm12211_vm14, 4294967295, %v15162_v29 }
 0x124   : > { %15164 = vst [vmem:[#allocation67_spill] sm:$0xff] %v15163_v29  ;;  %v1204_v29 = vrot.slane %v11721_v63, 1 }
 0x125   : > { %8732 = vmatmul.mubr.msk.f32.gmra.mrb[10].mxu0 %vm12195_vm15, %v12192_v0  ;;  %v2576_v0 = vld [vmem:[#allocation3 + $0x208] sm:$0xff]  ;;  %vm12233_vm15 = vcmp.lt.s32.totalorder %v417_v44, 15  ;;  %v1205_v44 = vrot.slane %v11726_v7, 1 }
 0x126   : > { %8734 = vmatprep.mubr.f32.mxu0 %v12203_v18  ;;  %10163 = vmatpush3.bf16.msra.mxu0 %v10160_v6  ;;  %v10168_v18 = vpack.c.bf16 %v2317_v54, %v2316_v14  ;;  %v15167_v6 = vmov 0  ;;  %v291_v14 = vadd.s32 152, %v11770_v51  ;;  %v12241_v54 = vsel %vm14891_vm13, %v1201_v17, %v1202_v8 }
 0x127   : > { %10165 = vmatprep.subr.bf16.mxu0 %v10164_v2  ;;  %v15168_v6 = vsel %vm12233_vm15, 4294967295, %v15167_v6  ;;  %15170 = vst [vmem:[#allocation71_spill] sm:$0xff] %v12241_v54  ;;  %v12244_v19 = vpack.c.bf16 %v2576_v0, %v2575_v49  ;;  %v293_v0 = vadd.s32 168, %v11770_v51  ;;  %v12262_v49 = vsel %vm14891_vm13, %v1203_v60, %v1204_v29 }
 0x128   : > { %15169 = vst [vmem:[#allocation70_spill] sm:$0xff] %v15168_v6  ;;  %v445_v17 = vand.u32 15, %v291_v14  ;;  %15175 = vst [vmem:[#allocation74_spill] sm:$0xff] %v12262_v49  ;;  %v1206_v6 = vrot.slane %v11733_v11, 1  ;;  %v295_v14 = vadd.s32 184, %v11770_v51 }
 0x129   : > { %8735 = vmatmul.mubr.msk.f32.gmra.mrb[12].mxu0 %vm12211_vm14, %v12217_v10  ;;  %vm12251_vm14 = vcmp.lt.s32.totalorder %v431_v37, 15  ;;  %v459_v37 = vand.u32 15, %v293_v0 }
 0x12a   : > { %8737 = vmatprep.mubr.f32.mxu0 %v12222_v43  ;;  %10167 = vmatpush3.bf16.msra.mxu0 %v10164_v2  ;;  %v15172_v42 = vsel %vm12251_vm14, 4294967295, %v15171_v42  ;;  %v12257_v2 = vsel %vm14891_vm13, %v1202_v8, %v1203_v60  ;;  %v12271_v8 = vsel %vm14891_vm13, %v1204_v29, %v1205_v44  ;;  %v1207_v60 = vrot.slane %v11738_v22, 1 }
 0x12b   : > { %10169 = vmatprep.subr.bf16.mxu0 %v10168_v18  ;;  %15173 = vst [vmem:[#allocation72_spill] sm:$0xff] %v15172_v42  ;;  %15174 = vst [vmem:[#allocation73_spill] sm:$0xff] %v12257_v2  ;;  %v12282_v42 = vsel %vm14891_vm13, %v1205_v44, %v1206_v6  ;;  %v1209_v29 = vrot.slane %v11750_v30, 1  ;;  %v473_v44 = vand.u32 15, %v295_v14  ;;  %v1211_v14 = vrot.slane %v11760_v33, 1 }
 0x12c   : > { %15176 = vst [vmem:[#allocation75_spill] sm:$0xff] %v12271_v8  ;;  %15180 = vst [vmem:[#allocation77_spill] sm:$0xff] %v12282_v42  ;;  %v12296_v0 = vsel %vm14891_vm13, %v1206_v6, %v1207_v60 }
 0x12d   : > { %8738 = vmatmul.mubr.msk.f32.gmra.mrb[14].mxu0 %vm12233_vm15, %v12230_v40  ;;  %vm12274_vm15 = vcmp.lt.s32.totalorder %v445_v17, 15  ;;  %v15181_v17 = vmov 0  ;;  %15184 = vst [vmem:[#allocation79_spill] sm:$0xff] %v12296_v0  ;;  %v299_v40 = vadd.s32 216, %v11770_v51 }
 0x12e   : > { %8740 = vmatprep.mubr.f32.mxu0 %v12241_v54  ;;  %10171 = vmatpush3.bf16.msra.mxu0 %v10168_v18  ;;  %v15177_v18 = vmov 0 }
 0x12f   : > { %10173 = vmatprep.subr.bf16.mxu0 %v12244_v19  ;;  %v15178_v18 = vsel %vm12274_vm15, 4294967295, %v15177_v18 }
 0x130   : > { %15179 = vst [vmem:[#allocation76_spill] sm:$0xff] %v15178_v18  ;;  %v1210_v18 = vrot.slane %v11755_v27, 1 }
 0x131   : > { %8741 = vmatmul.mubr.msk.f32.gmra.mrb[16].mxu0 %vm12251_vm14, %v12257_v2  ;;  %v1208_v2 = vrot.slane %v11745_v28, 1  ;;  %vm12290_vm14 = vcmp.lt.s32.totalorder %v459_v37, 15  ;;  %v15187_v37 = vmov 0 }
 0x132   : > { %8743 = vmatprep.mubr.f32.mxu0 %v12262_v49  ;;  %v15182_v17 = vsel %vm12290_vm14, 4294967295, %v15181_v17  ;;  %v297_v49 = vadd.s32 200, %v11770_v51 }
 0x133   : > { %15183 = vst [vmem:[#allocation78_spill] sm:$0xff] %v15182_v17  ;;  %v12301_v54 = vsel %vm14891_vm13, %v1207_v60, %v1208_v2  ;;  %v12311_v6 = vsel %vm14891_vm13, %v1208_v2, %v1209_v29  ;;  %v1212_v17 = vrot.slane %v11765_v39, 1 }
 0x134   : > { %15185 = vst [vmem:[#allocation80_spill] sm:$0xff] %v12301_v54  ;;  %15186 = vst [vmem:[#allocation81_spill] sm:$0xff] %v12311_v6  ;;  %v487_v60 = vand.u32 15, %v297_v49  ;;  %v15191_v49 = vmov 0 }
 0x135   : > { %8744 = vmatmul.mubr.msk.f32.gmra.mrb[18].mxu0 %vm12274_vm15, %v12271_v8  ;;  %v11270_v8 = vld [vmem:[%s11407_s18 + $0xf0] sm:$0xff]  ;;  %vm12314_vm15 = vcmp.lt.s32.totalorder %v473_v44, 15  ;;  %v1213_v44 = vrot.slane %v11768_v47, 1 }
 0x136   : > { %8746 = vmatprep.mubr.f32.mxu0 %v12282_v42  ;;  %v985_v42 = vsub.f32 %v11270_v8, %v11595_v61  ;;  %v15188_v37 = vsel %vm12314_vm15, 4294967295, %v15187_v37  ;;  %v12322_v8 = vsel %vm14891_vm13, %v1209_v29, %v1210_v18  ;;  %v12337_v29 = vsel %vm14891_vm13, %v1210_v18, %v1211_v14 }
 0x137   : > { %15189 = vst [vmem:[#allocation82_spill] sm:$0xff] %v15188_v37  ;;  %15190 = vst [vmem:[#allocation83_spill] sm:$0xff] %v12322_v8  ;;  %v1214_v37 = vrot.slane %v11774_v50, 1 }
 0x138   : > { %v1019_v2 = vmul.f32 %v11611_v26, %v985_v42  ;;  %15194 = vst [vmem:[#allocation85_spill] sm:$0xff] %v12337_v29  ;;  %v12342_v42 = vsel %vm14891_vm13, %v1211_v14, %v1212_v17  ;;  %v1215_v14 = vrot.slane %v11776_v56, 1 }
 0x139   : > { %8747 = vmatmul.mubr.msk.f32.gmra.mrb[20].mxu0 %vm12290_vm14, %v12296_v0  ;;  %vm12331_vm14 = vcmp.lt.s32.totalorder %v487_v60, 15  ;;  %v301_v0 = vadd.s32 232, %v11770_v51  ;;  %15195 = vst [vmem:[#allocation86_spill] sm:$0xff] %v12342_v42  ;;  %v12350_v60 = vsel %vm14891_vm13, %v1212_v17, %v1213_v44  ;;  %v12361_v43 = vsel %vm14891_vm13, %v1213_v44, %v1214_v37 }
 0x13a   : > { %8749 = vmatprep.mubr.f32.mxu0 %v12301_v54  ;;  %v15192_v49 = vsel %vm12331_vm14, 4294967295, %v15191_v49  ;;  %v501_v54 = vand.u32 15, %v299_v40  ;;  %v15196_v40 = vmov 0  ;;  %15199 = vst [vmem:[#allocation88_spill] sm:$0xff] %v12361_v43  ;;  %v12376_v17 = vsel %vm14891_vm13, %v1214_v37, %v1215_v14 }
 0x13b   : > { %15193 = vst [vmem:[#allocation84_spill] sm:$0xff] %v15192_v49  ;;  %v515_v18 = vand.u32 15, %v301_v0  ;;  %v1216_v49 = vrot.slane %v11782_v1, 1  ;;  %15203 = vst [vmem:[#allocation90_spill] sm:$0xff] %v12376_v17 }
 0x13c   : > { %vm12353_vm12 = vcmp.lt.s32.totalorder %v501_v54, 15  ;;  %v15200_v54 = vmov 0 }
 0x13d   : > { %8750 = vmatmul.mubr.msk.f32.gmra.mrb[22].mxu0 %vm12314_vm15, %v12311_v6  ;;  %v1083_v6 = vmul.f32 0.2, %v1019_v2  ;;  %vm1051_vm15 = vcmp.ge.f32.partialorder %v1019_v2, 0.0  ;;  %v15197_v40 = vsel %vm12353_vm12, 4294967295, %v15196_v40 }
 0x13e   : > { %8752 = vmatprep.mubr.f32.mxu0 %v12322_v8  ;;  %15198 = vst [vmem:[#allocation87_spill] sm:$0xff] %v15197_v40  ;;  %v303_v8 = vadd.s32 248, %v11770_v51  ;;  %v3401_v40 = vld [vmem:[#allocation3 + $0x3b8] sm:$0xff] }
 0x140   : > { %v529_v0 = vand.u32 15, %v303_v8  ;;  %v2577_v8 = vld [vmem:[#allocation3 + $0x210] sm:$0xff] }
 0x141   : > { %8753 = vmatmul.mubr.msk.f32.gmra.mrb[24].mxu0 %vm12331_vm14, %v12337_v29  ;;  %v12364_v29 = vsel %vm1051_vm15, %v1019_v2, %v1083_v6  ;;  %vm12370_vm14 = vcmp.lt.s32.totalorder %v515_v18, 15  ;;  %v12381_v6 = vsel %vm14891_vm13, %v1215_v14, %v1216_v49  ;;  %v15205_v2 = vmov 0  ;;  %v2578_v18 = vld [vmem:[#allocation3 + $0x218] sm:$0xff] }
 0x142   : > { %8755 = vmatprep.mubr.f32.mxu0 %v12342_v42  ;;  %v15201_v54 = vsel %vm12370_vm14, 4294967295, %v15200_v54  ;;  %v14880_v44 = vrot.slane %v12364_v29, 1  ;;  %15204 = vst [vmem:[#allocation91_spill] sm:$0xff] %v12381_v6  ;;  %vm12387_vm15 = vcmp.lt.s32.totalorder %v529_v0, 15  ;;  %v10176_v14 = vpack.c.bf16 %v2578_v18, %v2577_v8  ;;  %v2579_v0 = vld [vmem:[#allocation3 + $0x220] sm:$0xff]  ;;  %v2584_v8 = vld [vmem:[#allocation3 + $0x248] sm:$0xff] }
 0x143   : > { %15202 = vst [vmem:[#allocation89_spill] sm:$0xff] %v15201_v54  ;;  %v15206_v2 = vsel %vm12387_vm15, 4294967295, %v15205_v2  ;;  %v2586_v18 = vld [vmem:[#allocation3 + $0x258] sm:$0xff] }
 0x144   : > { %15207 = vst [vmem:[#allocation92_spill] sm:$0xff] %v15206_v2  ;;  %v12395_v37 = vsel %vm14891_vm13, %v1216_v49, %v14880_v44  ;;  %v2581_v44 = vld [vmem:[#allocation3 + $0x230] sm:$0xff]  ;;  %v2582_v2 = vld [vmem:[#allocation3 + $0x238] sm:$0xff] }
 0x145   : > { %8756 = vmatmul.mubr.msk.f32.gmra.mrb[26].mxu0 %vm12353_vm12, %v12350_v60  ;;  %v15305_v54 = vld [vmem:[#allocation49_spill] sm:$0xff] }
 0x146   : > { %8758 = vmatprep.mubr.f32.mxu0 %v12361_v43 }
 0x149   : > { %8759 = vmatmul.mubr.msk.f32.gmra.mrb[28].mxu0 %vm12370_vm14, %v12376_v17 }
 0x14a   : > { %8761 = vmatprep.mubr.f32.mxu0 %v12381_v6  ;;  %v2580_v6 = vld [vmem:[#allocation3 + $0x228] sm:$0xff] }
 0x14b   : > { %v10180_v49 = vpack.c.bf16 %v2580_v6, %v2579_v0  ;;  %v2585_v6 = vld [vmem:[#allocation3 + $0x250] sm:$0xff]  ;;  %v15212_v0 = vld [vmem:[#allocation23_spill] sm:$0xff] }
 0x14d   : > { %8762 = vmatmul.mubr.msk.f32.gmra.mrb[30].mxu0 %vm12387_vm15, %v12395_v37 }
 0x14e   : > { %8796 = vmatprep.mubr.msk.f32.mxu0 %vm11800_vm0, %v11807_v35  ;;  %v10184_v35 = vpack.c.bf16 %v2582_v2, %v2581_v44  ;;  %v10192_v44 = vpack.c.bf16 %v2586_v18, %v2585_v6  ;;  %v2587_v2 = vld [vmem:[#allocation3 + $0x260] sm:$0xff]  ;;  %v2849_v18 = vld [vmem:[#allocation3 + $0x288] sm:$0xff] }
 0x14f   : > { %v2848_v6 = vld [vmem:[#allocation3 + $0x280] sm:$0xff] }
 0x151   : > { %8797 = vmatmul.mubr.f32.vlgmr.msra.gmra.mrb[0].mxu0 %v11817_v21  ;;  %v2583_v21 = vld [vmem:[#allocation3 + $0x240] sm:$0xff] }
 0x152   : > { %10175 = vmatpush3.bf16.msra.mxu0 %v12244_v19  ;;  %8799 = vmatprep.mubr.msk.f32.mxu0 %vm11819_vm1, %v11826_v58  ;;  %v10188_v19 = vpack.c.bf16 %v2584_v8, %v2583_v21  ;;  %v2589_v21 = vld [vmem:[#allocation3 + $0x270] sm:$0xff]  ;;  %v2590_v8 = vld [vmem:[#allocation3 + $0x278] sm:$0xff] }
 0x153   : > { %10177 = vmatprep.subr.bf16.mxu0 %v10176_v14 }
 0x155   : > { %8800 = vmatmul.mubr.f32.gmra.mrb[2].mxu0 %v11836_v5 }
 0x156   : > { %8802 = vmatprep.mubr.msk.f32.mxu0 %vm11838_vm2, %v11846_v4  ;;  %10179 = vmatpush3.bf16.msra.mxu0 %v10176_v14  ;;  %v2588_v14 = vld [vmem:[#allocation3 + $0x268] sm:$0xff] }
 0x157   : > { %10181 = vmatprep.subr.bf16.mxu0 %v10180_v49 }
 0x159   : > { %8803 = vmatmul.mubr.f32.gmra.mrb[4].mxu0 %v11855_v25 }
 0x15a   : > { %8805 = vmatprep.mubr.msk.f32.mxu0 %vm11859_vm3, %v11865_v24  ;;  %10183 = vmatpush3.bf16.msra.mxu0 %v10180_v49  ;;  %v10196_v49 = vpack.c.bf16 %v2588_v14, %v2587_v2  ;;  %v15214_v24 = vld [vmem:[#allocation26_spill] sm:$0xff]  ;;  %v10204_v2 = vpack.c.bf16 %v2849_v18, %v2848_v6  ;;  %v15216_v14 = vld [vmem:[#allocation27_spill] sm:$0xff]  ;;  %v11271_v6 = vld [vmem:[%s11407_s18 + $0xf8] sm:$0xff] }
 0x15b   : > { %10185 = vmatprep.subr.bf16.mxu0 %v10184_v35  ;;  %v986_v18 = vsub.f32 %v11271_v6, %v11595_v61  ;;  %v15233_v61 = vld [vmem:[#allocation44_spill] sm:$0xff]  ;;  %v15234_v6 = vld [vmem:[#allocation43_spill] sm:$0xff] }
 0x15d   : > { %8806 = vmatmul.mubr.f32.gmra.mrb[6].mxu0 %v11874_v36 }
 0x15e   : > { %8808 = vmatprep.mubr.msk.f32.mxu0 %vm11876_vm4, %v11883_v62  ;;  %10187 = vmatpush3.bf16.msra.mxu0 %v10184_v35  ;;  %v10200_v35 = vpack.c.bf16 %v2590_v8, %v2589_v21  ;;  %v15220_v21 = vld [vmem:[#allocation32_spill] sm:$0xff]  ;;  %v15226_v62 = vld [vmem:[#allocation38_spill] sm:$0xff]  ;;  %v15229_v8 = vld [vmem:[#allocation41_spill] sm:$0xff] }
 0x15f   : > { %10189 = vmatprep.subr.bf16.mxu0 %v10188_v19 }
 0x161   : > { %8809 = vmatmul.mubr.f32.gmra.mrb[8].mxu0 %v15209_v12 }
 0x162   : > { %8811 = vmatprep.mubr.msk.f32.mxu0 %vm11895_vm5, %v15210_v41  ;;  %10191 = vmatpush3.bf16.msra.mxu0 %v10188_v19  ;;  %v15223_v19 = vld [vmem:[#allocation35_spill] sm:$0xff] }
 0x163   : > { %10193 = vmatprep.subr.bf16.mxu0 %v10192_v44 }
 0x165   : > { %8812 = vmatmul.mubr.f32.gmra.mrb[10].mxu0 %v11912_v32  ;;  %v15217_v32 = vld [vmem:[#allocation29_spill] sm:$0xff] }
 0x166   : > { %8814 = vmatprep.mubr.msk.f32.mxu0 %vm11916_vm6, %v15212_v0  ;;  %10195 = vmatpush3.bf16.msra.mxu0 %v10192_v44  ;;  %v15219_v44 = vld [vmem:[#allocation30_spill] sm:$0xff] }
 0x167   : > { %10197 = vmatprep.subr.bf16.mxu0 %v10196_v49 }
 0x169   : > { %8815 = vmatmul.mubr.f32.gmra.mrb[12].mxu0 %v11931_v20  ;;  %v15222_v20 = vld [vmem:[#allocation33_spill] sm:$0xff] }
 0x16a   : > { %8817 = vmatprep.mubr.msk.f32.mxu0 %vm11933_vm7, %v15214_v24  ;;  %10199 = vmatpush3.bf16.msra.mxu0 %v10196_v49  ;;  %v304_v49 = vadd.s32 256, %v11770_v51 }
 0x16b   : > { %10201 = vmatprep.subr.bf16.mxu0 %v10200_v35 }
 0x16d   : > { %8818 = vmatmul.mubr.f32.gmra.mrb[14].mxu0 %v15216_v14  ;;  %v15225_v14 = vld [vmem:[#allocation36_spill] sm:$0xff] }
 0x16e   : > { %8820 = vmatprep.mubr.msk.f32.mxu0 %vm11956_vm8, %v15217_v32  ;;  %10203 = vmatpush3.bf16.msra.mxu0 %v10200_v35  ;;  %v15228_v32 = vld [vmem:[#allocation39_spill] sm:$0xff]  ;;  %v536_v35 = vand.u32 15, %v304_v49 }
 0x16f   : > { %10205 = vmatprep.subr.bf16.mxu0 %v10204_v2 }
 0x171   : > { %8821 = vmatmul.mubr.f32.gmra.mrb[16].mxu0 %v15219_v44  ;;  %v1020_v44 = vmul.f32 %v11611_v26, %v986_v18  ;;  %v15236_v18 = vld [vmem:[#allocation45_spill] sm:$0xff] }
 0x172   : > { %8823 = vmatprep.mubr.msk.f32.mxu0 %vm11975_vm9, %v15220_v21  ;;  %v15230_v21 = vld [vmem:[#allocation40_spill] sm:$0xff] }
 0x173   : > { %vm15231_vm13 = vnez %v15230_v21  ;;  %vm1052_vm0 = vcmp.ge.f32.partialorder %v1020_v44, 0.0  ;;  %v15238_v21 = vld [vmem:[#allocation46_spill] sm:$0xff] }
 0x175   : > { %8824 = vmatmul.mubr.f32.gmra.mrb[18].mxu0 %v15222_v20  ;;  %v15232_v20 = vld [vmem:[#allocation42_spill] sm:$0xff] }
 0x176   : > { %8826 = vmatprep.mubr.msk.f32.mxu0 %vm11993_vm10, %v15223_v19  ;;  %v1084_v19 = vmul.f32 0.2, %v1020_v44  ;;  %vm15235_vm10 = vnez %v15234_v6  ;;  %v15243_v6 = vrot.slane %v11782_v1, 7 }
 0x178   : > { %v12461_v26 = vsel %vm1052_vm0, %v1020_v44, %v1084_v19  ;;  %v15246_v19 = vld [vmem:[#allocation48_spill] sm:$0xff] }
 0x179   : > { %8827 = vmatmul.mubr.f32.gmra.mrb[20].mxu0 %v15225_v14  ;;  %v15240_v14 = vmov 0 }
 0x17a   : > { %8829 = vmatprep.mubr.msk.f32.mxu0 %vm12014_vm11, %v15226_v62  ;;  %v1398_v62 = vrot.slane %v12364_v29, 7  ;;  %vm12468_vm11 = vcmp.gt.s32.totalorder %v536_v35, 0  ;;  %v2850_v35 = vld [vmem:[#allocation3 + $0x290] sm:$0xff] }
 0x17b   : > { %v15241_v14 = vsel %vm12468_vm11, 4294967295, %v15240_v14 }
 0x17c   : > { %15242 = vst [vmem:[#allocation18_spill] sm:$0xff] %v15241_v14 }
 0x17d   : > { %8830 = vmatmul.mubr.f32.gmra.mrb[22].mxu0 %v15228_v32  ;;  %v15237_v32 = vld [vmem:[#allocation47_spill] sm:$0xff] }
 0x17e   : > { %8832 = vmatprep.mubr.msk.f32.mxu0 %vm15231_vm13, %v15229_v8  ;;  %vm15239_vm13 = vnez %v15238_v21  ;;  %v14901_v8 = vrot.slane %v12461_v26, 7  ;;  %v2851_v21 = vld [vmem:[#allocation3 + $0x298] sm:$0xff] }
 0x181   : > { %8833 = vmatmul.mubr.f32.gmra.mrb[24].mxu0 %v15232_v20  ;;  %v2855_v20 = vld [vmem:[#allocation3 + $0x2b8] sm:$0xff] }
 0x182   : > { %8835 = vmatprep.mubr.msk.f32.mxu0 %vm15235_vm10, %v15233_v61  ;;  %vm15244_vm10 = vcmp.lt.s32.totalorder %v11770_v51, 1  ;;  %v2853_v61 = vld [vmem:[#allocation3 + $0x2a8] sm:$0xff] }
 0x183   : > { %v12476_v49 = vsel %vm15244_vm10, %v15243_v6, %v1398_v62  ;;  %vm15247_vm0 = vmmov %vm15244_vm10  ;;  %v10208_v6 = vpack.c.bf16 %v2851_v21, %v2850_v35  ;;  %v2857_v21 = vld [vmem:[#allocation3 + $0x2c8] sm:$0xff]  ;;  %v2860_v35 = vld [vmem:[#allocation3 + $0x2e0] sm:$0xff] }
 0x184   : > { %15245 = vst [vmem:[#allocation20_spill] sm:$0xff] %v12476_v49  ;;  %v12486_v44 = vsel %vm15247_vm0, %v1398_v62, %v14901_v8  ;;  %v3128_v8 = vld [vmem:[#allocation3 + $0x338] sm:$0xff] }
 0x185   : > { %8836 = vmatmul.mubr.f32.gmra.mrb[26].mxu0 %v15236_v18  ;;  %v2852_v18 = vld [vmem:[#allocation3 + $0x2a0] sm:$0xff] }
 0x186   : > { %8838 = vmatprep.mubr.msk.f32.mxu0 %vm15239_vm13, %v15237_v32  ;;  %v15248_v32 = vld [vmem:[#allocation6_spill] sm:$0xff]  ;;  %v10212_v14 = vpack.c.bf16 %v2853_v61, %v2852_v18  ;;  %v2859_v61 = vld [vmem:[#allocation3 + $0x2d8] sm:$0xff] }
 0x189   : > { %8839 = vmatmul.mubr.f32.gmra.mrb[28].mxu0 %v15246_v19  ;;  %v15249_v19 = vld [vmem:[#allocation7_spill] sm:$0xff] }
 0x18a   : > { %8841 = vmatprep.mubr.msk.f32.mxu0 %vm12468_vm11, %v12476_v49  ;;  %v2854_v49 = vld [vmem:[#allocation3 + $0x2b0] sm:$0xff] }
 0x18b   : > { %v10216_v62 = vpack.c.bf16 %v2855_v20, %v2854_v49  ;;  %v2861_v20 = vld [vmem:[#allocation3 + $0x2e8] sm:$0xff]  ;;  %v2862_v49 = vld [vmem:[#allocation3 + $0x2f0] sm:$0xff] }
 0x18d   : > { %8842 = vmatmul.mubr.f32.gmra.mrb[30].mxu0 %v12486_v44 }
 0x18e   : > { %8876 = vmatprep.mubr.f32.mxu0 %v15248_v32  ;;  %v2856_v32 = vld [vmem:[#allocation3 + $0x2c0] sm:$0xff] }
 0x191   : > { %8877 = vmatmul.mubr.f32.vlgmr.msra.gmra.mrb[0].mxu0 %v15249_v19  ;;  %v2858_v19 = vld [vmem:[#allocation3 + $0x2d0] sm:$0xff] }
 0x192   : > { %10207 = vmatpush3.bf16.msra.mxu0 %v10204_v2  ;;  %8879 = vmatprep.mubr.f32.mxu0 %v11631_v38  ;;  %v10220_v2 = vpack.c.bf16 %v2857_v21, %v2856_v32  ;;  %v10224_v18 = vpack.c.bf16 %v2859_v61, %v2858_v19  ;;  %v3121_v32 = vld [vmem:[#allocation3 + $0x300] sm:$0xff]  ;;  %v3122_v21 = vld [vmem:[#allocation3 + $0x308] sm:$0xff]  ;;  %v3123_v19 = vld [vmem:[#allocation3 + $0x310] sm:$0xff] }
 0x193   : > { %10209 = vmatprep.subr.bf16.mxu0 %v10208_v6  ;;  %v3124_v61 = vld [vmem:[#allocation3 + $0x318] sm:$0xff] }
 0x195   : > { %8880 = vmatmul.mubr.f32.gmra.mrb[2].mxu0 %v11637_v46 }
 0x196   : > { %8882 = vmatprep.mubr.f32.mxu0 %v11642_v53  ;;  %10211 = vmatpush3.bf16.msra.mxu0 %v10208_v6  ;;  %v2863_v6 = vld [vmem:[#allocation3 + $0x2f8] sm:$0xff] }
 0x197   : > { %10213 = vmatprep.subr.bf16.mxu0 %v10212_v14 }
 0x199   : > { %8883 = vmatmul.mubr.f32.gmra.mrb[4].mxu0 %v11649_v59 }
 0x19a   : > { %8885 = vmatprep.mubr.f32.mxu0 %v11654_v3  ;;  %10215 = vmatpush3.bf16.msra.mxu0 %v10212_v14  ;;  %v10228_v14 = vpack.c.bf16 %v2861_v20, %v2860_v35  ;;  %v10240_v35 = vpack.c.bf16 %v3124_v61, %v3123_v19  ;;  %v3125_v20 = vld [vmem:[#allocation3 + $0x320] sm:$0xff] }
 0x19b   : > { %10217 = vmatprep.subr.bf16.mxu0 %v10216_v62  ;;  %v3129_v61 = vld [vmem:[#allocation3 + $0x340] sm:$0xff] }
 0x19d   : > { %8886 = vmatmul.mubr.f32.gmra.mrb[6].mxu0 %v11661_v9 }
 0x19e   : > { %8888 = vmatprep.mubr.f32.mxu0 %v11666_v16  ;;  %10219 = vmatpush3.bf16.msra.mxu0 %v10216_v62  ;;  %v10232_v62 = vpack.c.bf16 %v2863_v6, %v2862_v49  ;;  %v15251_v49 = vld [vmem:[#allocation53_spill] sm:$0xff]  ;;  %v15252_v6 = vld [vmem:[#allocation52_spill] sm:$0xff] }
 0x19f   : > { %10221 = vmatprep.subr.bf16.mxu0 %v10220_v2  ;;  %vm15253_vm10 = vnez %v15252_v6  ;;  %v15259_v6 = vld [vmem:[#allocation59_spill] sm:$0xff] }
 0x1a1   : > { %8889 = vmatmul.mubr.f32.gmra.mrb[8].mxu0 %v11673_v23 }
 0x1a2   : > { %8891 = vmatprep.mubr.f32.mxu0 %v11678_v13  ;;  %10223 = vmatpush3.bf16.msra.mxu0 %v10220_v2  ;;  %v10236_v2 = vpack.c.bf16 %v3122_v21, %v3121_v32  ;;  %v3127_v21 = vld [vmem:[#allocation3 + $0x330] sm:$0xff] }
 0x1a3   : > { %10225 = vmatprep.subr.bf16.mxu0 %v10224_v18  ;;  %v10248_v19 = vpack.c.bf16 %v3128_v8, %v3127_v21  ;;  %v3133_v21 = vld [vmem:[#allocation3 + $0x360] sm:$0xff] }
 0x1a5   : > { %8892 = vmatmul.mubr.f32.gmra.mrb[10].mxu0 %v11685_v15 }
 0x1a6   : > { %8894 = vmatprep.mubr.f32.mxu0 %v11690_v31  ;;  %10227 = vmatpush3.bf16.msra.mxu0 %v10224_v18  ;;  %v15250_v18 = vld [vmem:[#allocation51_spill] sm:$0xff] }
 0x1a7   : > { %10229 = vmatprep.subr.bf16.mxu0 %v10228_v14 }
 0x1a9   : > { %8895 = vmatmul.mubr.f32.gmra.mrb[12].mxu0 %v11697_v34 }
 0x1aa   : > { %8897 = vmatprep.mubr.f32.mxu0 %v11702_v45  ;;  %10231 = vmatpush3.bf16.msra.mxu0 %v10228_v14  ;;  %v3126_v14 = vld [vmem:[#allocation3 + $0x328] sm:$0xff] }
 0x1ab   : > { %10233 = vmatprep.subr.bf16.mxu0 %v10232_v62  ;;  %v10244_v32 = vpack.c.bf16 %v3126_v14, %v3125_v20  ;;  %v3131_v14 = vld [vmem:[#allocation3 + $0x350] sm:$0xff] }
 0x1ad   : > { %8898 = vmatmul.mubr.f32.gmra.mrb[14].mxu0 %v11709_v48 }
 0x1ae   : > { %8900 = vmatprep.mubr.f32.mxu0 %v11714_v57  ;;  %10235 = vmatpush3.bf16.msra.mxu0 %v10232_v62  ;;  %v15254_v62 = vld [vmem:[#allocation54_spill] sm:$0xff] }
 0x1af   : > { %10237 = vmatprep.subr.bf16.mxu0 %v10236_v2 }
 0x1b1   : > { %8901 = vmatmul.mubr.f32.gmra.mrb[16].mxu0 %v11721_v63 }
 0x1b2   : > { %8903 = vmatprep.mubr.f32.mxu0 %v11726_v7 }
 0x1b5   : > { %8904 = vmatmul.mubr.f32.gmra.mrb[18].mxu0 %v11733_v11 }
 0x1b6   : > { %8906 = vmatprep.mubr.f32.mxu0 %v11738_v22 }
 0x1b9   : > { %8907 = vmatmul.mubr.f32.gmra.mrb[20].mxu0 %v11745_v28 }
 0x1ba   : > { %8909 = vmatprep.mubr.f32.mxu0 %v11750_v30 }
 0x1bd   : > { %8910 = vmatmul.mubr.f32.gmra.mrb[22].mxu0 %v11755_v27 }
 0x1be   : > { %8912 = vmatprep.mubr.f32.mxu0 %v11760_v33 }
 0x1c1   : > { %8913 = vmatmul.mubr.f32.gmra.mrb[24].mxu0 %v11765_v39 }
 0x1c2   : > { %8915 = vmatprep.mubr.f32.mxu0 %v11768_v47 }
 0x1c5   : > { %8916 = vmatmul.mubr.f32.gmra.mrb[26].mxu0 %v11774_v50  ;;  %v15258_v50 = vld [vmem:[#allocation57_spill] sm:$0xff] }
 0x1c6   : > { %8918 = vmatprep.mubr.f32.mxu0 %v11776_v56  ;;  %v15256_v56 = vld [vmem:[#allocation56_spill] sm:$0xff] }
 0x1c7   : > { %vm15257_vm0 = vnez %v15256_v56  ;;  %v15263_v56 = vld [vmem:[#allocation62_spill] sm:$0xff] }
 0x1c9   : > { %8919 = vmatmul.mubr.f32.gmra.mrb[28].mxu0 %v11782_v1  ;;  %v15255_v1 = vld [vmem:[#allocation55_spill] sm:$0xff] }
 0x1ca   : > { %8921 = vmatprep.mubr.f32.mxu0 %v12364_v29 }
 0x1cd   : > { %8922 = vmatmul.mubr.f32.gmra.mrb[30].mxu0 %v12461_v26 }
 0x1ce   : > { %8956 = vmatprep.mubr.f32.mxu0 %v15250_v18  ;;  %v3130_v18 = vld [vmem:[#allocation3 + $0x348] sm:$0xff] }
 0x1cf   : > { %v10252_v20 = vpack.c.bf16 %v3130_v18, %v3129_v61  ;;  %v3135_v18 = vld [vmem:[#allocation3 + $0x370] sm:$0xff] }
 0x1d1   : > { %8957 = vmatmul.mubr.msk.f32.vlgmr.msra.gmra.mrb[0].mxu0 %vm15253_vm10, %v15251_v49  ;;  %v15260_v49 = vld [vmem:[#allocation58_spill] sm:$0xff] }
 0x1d2   : > { %10239 = vmatpush3.bf16.msra.mxu0 %v10236_v2  ;;  %8959 = vmatprep.mubr.f32.mxu0 %v15254_v62  ;;  %vm15261_vm10 = vnez %v15260_v49  ;;  %v15262_v2 = vld [vmem:[#allocation60_spill] sm:$0xff]  ;;  %v3132_v62 = vld [vmem:[#allocation3 + $0x358] sm:$0xff] }
 0x1d3   : > { %10241 = vmatprep.subr.bf16.mxu0 %v10240_v35  ;;  %v10256_v8 = vpack.c.bf16 %v3132_v62, %v3131_v14  ;;  %v15267_v49 = vld [vmem:[#allocation64_spill] sm:$0xff]  ;;  %v3394_v14 = vld [vmem:[#allocation3 + $0x380] sm:$0xff] }
 0x1d5   : > { %8960 = vmatmul.mubr.msk.f32.gmra.mrb[2].mxu0 %vm15257_vm0, %v15255_v1  ;;  %v15264_v1 = vld [vmem:[#allocation61_spill] sm:$0xff] }
 0x1d6   : > { %8962 = vmatprep.mubr.f32.mxu0 %v15258_v50  ;;  %10243 = vmatpush3.bf16.msra.mxu0 %v10240_v35  ;;  %vm15265_vm0 = vnez %v15264_v1  ;;  %v15266_v35 = vld [vmem:[#allocation63_spill] sm:$0xff] }
 0x1d7   : > { %10245 = vmatprep.subr.bf16.mxu0 %v10244_v32  ;;  %v3134_v50 = vld [vmem:[#allocation3 + $0x368] sm:$0xff] }
 0x1d8   : > { %v10260_v61 = vpack.c.bf16 %v3134_v50, %v3133_v21  ;;  %v15271_v1 = vld [vmem:[#allocation67_spill] sm:$0xff]  ;;  %v15278_v21 = vld [vmem:[#allocation73_spill] sm:$0xff] }
 0x1d9   : > { %8963 = vmatmul.mubr.msk.f32.gmra.mrb[4].mxu0 %vm15261_vm10, %v15259_v6  ;;  %v15268_v6 = vld [vmem:[#allocation65_spill] sm:$0xff] }
 0x1da   : > { %8965 = vmatprep.mubr.f32.mxu0 %v15262_v2  ;;  %10247 = vmatpush3.bf16.msra.mxu0 %v10244_v32  ;;  %vm15269_vm10 = vnez %v15268_v6  ;;  %v15270_v32 = vld [vmem:[#allocation66_spill] sm:$0xff]  ;;  %v3136_v2 = vld [vmem:[#allocation3 + $0x378] sm:$0xff] }
 0x1db   : > { %10249 = vmatprep.subr.bf16.mxu0 %v10248_v19  ;;  %v10264_v62 = vpack.c.bf16 %v3136_v2, %v3135_v18  ;;  %v15274_v6 = vld [vmem:[#allocation69_spill] sm:$0xff]  ;;  %v15282_v2 = vld [vmem:[#allocation75_spill] sm:$0xff] }
 0x1dc   : > { %v15285_v18 = vld [vmem:[#allocation77_spill] sm:$0xff] }
 0x1dd   : > { %8966 = vmatmul.mubr.msk.f32.gmra.mrb[6].mxu0 %vm15265_vm0, %v15263_v56  ;;  %vm15272_vm0 = vnez %v15271_v1  ;;  %v15281_v1 = vld [vmem:[#allocation74_spill] sm:$0xff] }
 0x1de   : > { %8968 = vmatprep.mubr.f32.mxu0 %v15266_v35  ;;  %10251 = vmatpush3.bf16.msra.mxu0 %v10248_v19  ;;  %v15273_v19 = vld [vmem:[#allocation68_spill] sm:$0xff]  ;;  %v3395_v35 = vld [vmem:[#allocation3 + $0x388] sm:$0xff] }
 0x1df   : > { %10253 = vmatprep.subr.bf16.mxu0 %v10252_v20  ;;  %v10268_v50 = vpack.c.bf16 %v3395_v35, %v3394_v14  ;;  %v15290_v35 = vld [vmem:[#allocation81_spill] sm:$0xff]  ;;  %v15291_v14 = vld [vmem:[#allocation82_spill] sm:$0xff] }
 0x1e0   : > { %vm15292_vm13 = vnez %v15291_v14 }
 0x1e1   : > { %8969 = vmatmul.mubr.msk.f32.gmra.mrb[8].mxu0 %vm15269_vm10, %v15267_v49  ;;  %v15275_v49 = vld [vmem:[#allocation70_spill] sm:$0xff] }
 0x1e2   : > { %8971 = vmatprep.mubr.f32.mxu0 %v15270_v32  ;;  %10255 = vmatpush3.bf16.msra.mxu0 %v10252_v20  ;;  %vm15276_vm10 = vnez %v15275_v49  ;;  %v15277_v20 = vld [vmem:[#allocation71_spill] sm:$0xff]  ;;  %v15279_v32 = vld [vmem:[#allocation72_spill] sm:$0xff] }
 0x1e3   : > { %10257 = vmatprep.subr.bf16.mxu0 %v10256_v8  ;;  %vm15280_vm11 = vnez %v15279_v32  ;;  %v15286_v49 = vld [vmem:[#allocation79_spill] sm:$0xff] }
 0x1e4   : > { %v15293_v32 = vld [vmem:[#allocation83_spill] sm:$0xff] }
 0x1e5   : > { %8972 = vmatmul.mubr.msk.f32.gmra.mrb[10].mxu0 %vm15272_vm0, %v12217_v10 }
 0x1e6   : > { %8974 = vmatprep.mubr.f32.mxu0 %v15273_v19  ;;  %10259 = vmatpush3.bf16.msra.mxu0 %v10256_v8  ;;  %v15283_v8 = vld [vmem:[#allocation76_spill] sm:$0xff] }
 0x1e7   : > { %10261 = vmatprep.subr.bf16.mxu0 %v10260_v61  ;;  %vm15284_vm0 = vnez %v15283_v8 }
 0x1e9   : > { %8975 = vmatmul.mubr.msk.f32.gmra.mrb[12].mxu0 %vm15276_vm10, %v15274_v6  ;;  %v15287_v6 = vld [vmem:[#allocation78_spill] sm:$0xff] }
 0x1ea   : > { %8977 = vmatprep.mubr.f32.mxu0 %v15277_v20  ;;  %10263 = vmatpush3.bf16.msra.mxu0 %v10260_v61  ;;  %vm15288_vm10 = vnez %v15287_v6  ;;  %v15289_v61 = vld [vmem:[#allocation80_spill] sm:$0xff]  ;;  %v1218_v6 = vrot.slane %v12461_v26, 1 }
 0x1eb   : > { %10265 = vmatprep.subr.bf16.mxu0 %v10264_v62 }
 0x1ed   : > { %8978 = vmatmul.mubr.msk.f32.gmra.mrb[14].mxu0 %vm15280_vm11, %v15278_v21 }
 0x1ee   : > { %8980 = vmatprep.mubr.f32.mxu0 %v15281_v1  ;;  %10267 = vmatpush3.bf16.msra.mxu0 %v10264_v62  ;;  %v15294_v62 = vld [vmem:[#allocation85_spill] sm:$0xff]  ;;  %v15295_v1 = vld [vmem:[#allocation84_spill] sm:$0xff] }
 0x1ef   : > { %10269 = vmatprep.subr.bf16.mxu0 %v10268_v50  ;;  %vm15296_vm11 = vnez %v15295_v1 }
 0x1f1   : > { %8981 = vmatmul.mubr.msk.f32.gmra.mrb[16].mxu0 %vm15284_vm0, %v15282_v2 }
 0x1f2   : > { %8983 = vmatprep.mubr.f32.mxu0 %v15285_v18 }
 0x1f5   : > { %8984 = vmatmul.mubr.msk.f32.gmra.mrb[18].mxu0 %vm15288_vm10, %v15286_v49 }
 0x1f6   : > { %8986 = vmatprep.mubr.f32.mxu0 %v15289_v61  ;;  %v305_v61 = vadd.s32 264, %v11770_v51 }
 0x1f8   : > { %v543_v1 = vand.u32 15, %v305_v61 }
 0x1f9   : > { %8987 = vmatmul.mubr.msk.f32.gmra.mrb[20].mxu0 %vm15292_vm13, %v15290_v35 }
 0x1fa   : > { %8989 = vmatprep.mubr.f32.mxu0 %v15293_v32  ;;  %v15297_v32 = vld [vmem:[#allocation91_spill] sm:$0xff] }
 0x1fd   : > { %8990 = vmatmul.mubr.msk.f32.gmra.mrb[22].mxu0 %vm15296_vm11, %v15294_v62  ;;  %v15298_v62 = vrot.slane %v12364_v29, 1  ;;  %vm15299_vm11 = vcmp.lt.s32.totalorder %v11770_v51, 7 }
 0x1fe   : > { %8992 = vmatprep.mubr.f32.mxu0 %v12342_v42 }
 0x1ff   : > { %v12584_v42 = vsel %vm15299_vm11, %v15298_v62, %v1218_v6 }
 0x200   : > { %15300 = vst [vmem:[#allocation23_spill] sm:$0xff] %v12584_v42 }
 0x201   : > { %8993 = vmatmul.mubr.msk.f32.gmra.mrb[24].mxu0 %vm12353_vm12, %v12350_v60  ;;  %vm12590_vm12 = vcmp.lt.s32.totalorder %v543_v1, 15  ;;  %v3398_v1 = vld [vmem:[#allocation3 + $0x3a0] sm:$0xff] }
 0x202   : > { %8995 = vmatprep.mubr.f32.mxu0 %v12361_v43  ;;  %v15302_v43 = vmov 0 }
 0x203   : > { %v15303_v43 = vsel %vm12590_vm12, 4294967295, %v15302_v43 }
 0x204   : > { %15304 = vst [vmem:[#allocation26_spill] sm:$0xff] %v15303_v43  ;;  %v15308_v43 = vld [vmem:[#allocation15_spill] sm:$0xff] }
 0x205   : > { %8996 = vmatmul.mubr.msk.f32.gmra.mrb[26].mxu0 %vm12370_vm14, %v12376_v17  ;;  %vm15306_vm14 = vmmov %vm15299_vm11  ;;  %v3397_v17 = vld [vmem:[#allocation3 + $0x398] sm:$0xff] }
 0x206   : > { %8998 = vmatprep.mubr.f32.mxu0 %v15297_v32  ;;  %v12597_v61 = vsel %vm15306_vm14, %v1218_v6, %v15305_v54  ;;  %v3396_v32 = vld [vmem:[#allocation3 + $0x390] sm:$0xff] }
 0x207   : > { %15307 = vst [vmem:[#allocation6_spill] sm:$0xff] %v12597_v61  ;;  %v10272_v62 = vpack.c.bf16 %v3397_v17, %v3396_v32  ;;  %v3400_v54 = vld [vmem:[#allocation3 + $0x3b0] sm:$0xff]  ;;  %v3402_v17 = vld [vmem:[#allocation3 + $0x3c0] sm:$0xff]  ;;  %v15310_v32 = vld [vmem:[#allocation17_spill] sm:$0xff] }
 0x209   : > { %8999 = vmatmul.mubr.msk.f32.gmra.mrb[28].mxu0 %vm12387_vm15, %v12395_v37 }
 0x20a   : > { %9001 = vmatprep.mubr.f32.mxu0 %v12584_v42  ;;  %v3399_v42 = vld [vmem:[#allocation3 + $0x3a8] sm:$0xff] }
 0x20b   : > { %v10276_v6 = vpack.c.bf16 %v3399_v42, %v3398_v1  ;;  %v3404_v42 = vld [vmem:[#allocation3 + $0x3d0] sm:$0xff] }
 0x20d   : > { %9002 = vmatmul.mubr.msk.f32.gmra.mrb[30].mxu0 %vm12590_vm12, %v12597_v61 }
 0x20e   : > { %9036 = vmatprep.mubr.msk.f32.mxu0 %vm11819_vm1, %v11826_v58  ;;  %v10280_v58 = vpack.c.bf16 %v3401_v40, %v3400_v54  ;;  %v3406_v54 = vld [vmem:[#allocation3 + $0x3e0] sm:$0xff] }
 0x211   : > { %9037 = vmatmul.mubr.f32.vlgmr.msra.gmra.mrb[0].mxu0 %v11836_v5  ;;  %v3403_v5 = vld [vmem:[#allocation3 + $0x3c8] sm:$0xff] }
 0x212   : > { %10271 = vmatpush3.bf16.msra.mxu0 %v10268_v50  ;;  %9039 = vmatprep.mubr.msk.f32.mxu0 %vm11838_vm2, %v11846_v4  ;;  %v10284_v4 = vpack.c.bf16 %v3403_v5, %v3402_v17  ;;  %v3408_v17 = vld [vmem:[#allocation3 + $0x3f0] sm:$0xff] }
 0x213   : > { %10273 = vmatprep.subr.bf16.mxu0 %v10272_v62  ;;  %v15315_v5 = vld [vmem:[#allocation24_spill] sm:$0xff] }
 0x215   : > { %9040 = vmatmul.mubr.f32.gmra.mrb[2].mxu0 %v11855_v25  ;;  %v3405_v25 = vld [vmem:[#allocation3 + $0x3d8] sm:$0xff] }
 0x216   : > { %9042 = vmatprep.mubr.msk.f32.mxu0 %vm11859_vm3, %v15308_v43  ;;  %10275 = vmatpush3.bf16.msra.mxu0 %v10272_v62  ;;  %v10288_v40 = vpack.c.bf16 %v3405_v25, %v3404_v42  ;;  %v15313_v62 = vld [vmem:[#allocation21_spill] sm:$0xff]  ;;  %v3668_v42 = vld [vmem:[#allocation3 + $0x408] sm:$0xff] }
 0x217   : > { %10277 = vmatprep.subr.bf16.mxu0 %v10276_v6  ;;  %v15317_v25 = vld [vmem:[#allocation27_spill] sm:$0xff] }
 0x219   : > { %9043 = vmatmul.mubr.f32.gmra.mrb[4].mxu0 %v11874_v36  ;;  %v3407_v36 = vld [vmem:[#allocation3 + $0x3e8] sm:$0xff] }
 0x21a   : > { %9045 = vmatprep.mubr.msk.f32.mxu0 %vm11876_vm4, %v15310_v32  ;;  %10279 = vmatpush3.bf16.msra.mxu0 %v10276_v6  ;;  %v10292_v6 = vpack.c.bf16 %v3407_v36, %v3406_v54  ;;  %v3667_v32 = vld [vmem:[#allocation3 + $0x400] sm:$0xff]  ;;  %v15321_v36 = vld [vmem:[#allocation32_spill] sm:$0xff] }
 0x21b   : > { %10281 = vmatprep.subr.bf16.mxu0 %v10280_v58  ;;  %v15320_v54 = vld [vmem:[#allocation30_spill] sm:$0xff] }
 0x21d   : > { %9046 = vmatmul.mubr.f32.gmra.mrb[6].mxu0 %v15209_v12  ;;  %v3409_v12 = vld [vmem:[#allocation3 + $0x3f8] sm:$0xff] }
 0x21e   : > { %9048 = vmatprep.mubr.msk.f32.mxu0 %vm11895_vm5, %v15210_v41  ;;  %10283 = vmatpush3.bf16.msra.mxu0 %v10280_v58  ;;  %v10296_v58 = vpack.c.bf16 %v3409_v12, %v3408_v17  ;;  %v15325_v17 = vld [vmem:[#allocation34_spill] sm:$0xff]  ;;  %v15327_v12 = vld [vmem:[#allocation36_spill] sm:$0xff] }
 0x21f   : > { %10285 = vmatprep.subr.bf16.mxu0 %v10284_v4  ;;  %vm15326_vm14 = vnez %v15325_v17  ;;  %v15341_v17 = vld [vmem:[#allocation46_spill] sm:$0xff]  ;;  %v15454_v41 = vld [vmem:[#allocation40_spill] sm:$0xff] }
 0x221   : > { %9049 = vmatmul.mubr.f32.gmra.mrb[8].mxu0 %v15313_v62  ;;  %v15318_v62 = vld [vmem:[#allocation29_spill] sm:$0xff] }
 0x222   : > { %9051 = vmatprep.mubr.msk.f32.mxu0 %vm11916_vm6, %v15212_v0  ;;  %10287 = vmatpush3.bf16.msra.mxu0 %v10284_v4  ;;  %v15319_v0 = vld [vmem:[#allocation28_spill] sm:$0xff]  ;;  %v10300_v4 = vpack.c.bf16 %v3668_v42, %v3667_v32  ;;  %v15331_v32 = vld [vmem:[#allocation39_spill] sm:$0xff]  ;;  %v15332_v42 = vld [vmem:[#allocation41_spill] sm:$0xff] }
 0x223   : > { %10289 = vmatprep.subr.bf16.mxu0 %v10288_v40 }
 0x225   : > { %9052 = vmatmul.mubr.f32.gmra.mrb[10].mxu0 %v15315_v5 }
 0x226   : > { %9054 = vmatprep.mubr.msk.f32.mxu0 %vm11933_vm7, %v15214_v24  ;;  %10291 = vmatpush3.bf16.msra.mxu0 %v10288_v40  ;;  %v15323_v24 = vld [vmem:[#allocation33_spill] sm:$0xff]  ;;  %v15324_v40 = vld [vmem:[#allocation35_spill] sm:$0xff] }
 0x227   : > { %10293 = vmatprep.subr.bf16.mxu0 %v10292_v6 }
 0x229   : > { %9055 = vmatmul.mubr.f32.gmra.mrb[12].mxu0 %v15317_v25  ;;  %v15328_v25 = vld [vmem:[#allocation38_spill] sm:$0xff] }
 0x22a   : > { %9057 = vmatprep.mubr.msk.f32.mxu0 %vm11956_vm8, %v15318_v62  ;;  %10295 = vmatpush3.bf16.msra.mxu0 %v10292_v6  ;;  %v15329_v6 = vld [vmem:[#allocation37_spill] sm:$0xff]  ;;  %v15333_v62 = vld [vmem:[#allocation40_spill] sm:$0xff] }
 0x22b   : > { %10297 = vmatprep.subr.bf16.mxu0 %v10296_v58  ;;  %vm15330_vm11 = vnez %v15329_v6  ;;  %vm15334_vm8 = vnez %v15333_v62  ;;  %v15344_v6 = vld [vmem:[#allocation20_spill] sm:$0xff]  ;;  %v15345_v62 = vld [vmem:[#allocation18_spill] sm:$0xff] }
 0x22d   : > { %9058 = vmatmul.mubr.f32.gmra.mrb[14].mxu0 %v15320_v54  ;;  %v15336_v54 = vld [vmem:[#allocation44_spill] sm:$0xff] }
 0x22e   : > { %9060 = vmatprep.mubr.msk.f32.mxu0 %vm11975_vm9, %v15321_v36  ;;  %10299 = vmatpush3.bf16.msra.mxu0 %v10296_v58  ;;  %v15335_v58 = vld [vmem:[#allocation42_spill] sm:$0xff]  ;;  %v15337_v36 = vld [vmem:[#allocation43_spill] sm:$0xff] }
 0x22f   : > { %10301 = vmatprep.subr.bf16.mxu0 %v10300_v4  ;;  %vm15338_vm9 = vnez %v15337_v36 }
 0x231   : > { %9061 = vmatmul.mubr.f32.gmra.mrb[16].mxu0 %v15323_v24  ;;  %v306_v24 = vadd.s32 272, %v11770_v51 }
 0x232   : > { %9063 = vmatprep.mubr.msk.f32.mxu0 %vm15326_vm14, %v15324_v40  ;;  %v15339_v40 = vld [vmem:[#allocation45_spill] sm:$0xff]  ;;  %vm15342_vm14 = vnez %v15341_v17 }
 0x235   : > { %9064 = vmatmul.mubr.f32.gmra.mrb[18].mxu0 %v15327_v12  ;;  %v15340_v12 = vld [vmem:[#allocation47_spill] sm:$0xff] }
 0x236   : > { %9066 = vmatprep.mubr.msk.f32.mxu0 %vm15330_vm11, %v15328_v25  ;;  %v550_v25 = vand.u32 15, %v306_v24  ;;  %v3669_v24 = vld [vmem:[#allocation3 + $0x410] sm:$0xff] }
 0x238   : > { %vm12662_vm11 = vcmp.gt.s32.totalorder %v550_v25, 0  ;;  %v3671_v25 = vld [vmem:[#allocation3 + $0x420] sm:$0xff] }
 0x239   : > { %9067 = vmatmul.mubr.f32.gmra.mrb[20].mxu0 %v15331_v32  ;;  %v15343_v32 = vld [vmem:[#allocation48_spill] sm:$0xff] }
 0x23a   : > { %9069 = vmatprep.mubr.msk.f32.mxu0 %vm15334_vm8, %v15332_v42  ;;  %vm15346_vm8 = vnez %v15345_v62  ;;  %v15347_v42 = vmov 0  ;;  %v3674_v62 = vld [vmem:[#allocation3 + $0x438] sm:$0xff] }
 0x23b   : > { %v15348_v42 = vsel %vm12662_vm11, 4294967295, %v15347_v42 }
 0x23c   : > { %15349 = vst [vmem:[#allocation7_spill] sm:$0xff] %v15348_v42 }
 0x23d   : > { %9070 = vmatmul.mubr.f32.gmra.mrb[22].mxu0 %v15335_v58  ;;  %v15350_v58 = vld [vmem:[#allocation11_spill] sm:$0xff] }
 0x23e   : > { %9072 = vmatprep.mubr.msk.f32.mxu0 %vm15338_vm9, %v15336_v54  ;;  %v15351_v54 = vrot.slane %v12461_v26, 7  ;;  %vm15352_vm9 = vcmp.lt.s32.totalorder %v11770_v51, 1 }
 0x241   : > { %9073 = vmatmul.mubr.f32.gmra.mrb[24].mxu0 %v15339_v40  ;;  %v1404_v40 = vsel %vm15352_vm9, %v15351_v54, %v15350_v58 }
 0x242   : > { %9075 = vmatprep.mubr.msk.f32.mxu0 %vm15342_vm14, %v15340_v12  ;;  %v3670_v12 = vld [vmem:[#allocation3 + $0x418] sm:$0xff] }
 0x245   : > { %9076 = vmatmul.mubr.f32.gmra.mrb[26].mxu0 %v15343_v32  ;;  %v3672_v32 = vld [vmem:[#allocation3 + $0x428] sm:$0xff] }
 0x246   : > { %9078 = vmatprep.mubr.msk.f32.mxu0 %vm15346_vm8, %v15344_v6  ;;  %v10304_v6 = vpack.c.bf16 %v3670_v12, %v3669_v24  ;;  %v10308_v54 = vpack.c.bf16 %v3672_v32, %v3671_v25  ;;  %v3676_v24 = vld [vmem:[#allocation3 + $0x448] sm:$0xff]  ;;  %v3682_v12 = vld [vmem:[#allocation3 + $0x478] sm:$0xff]  ;;  %v15385_v25 = vld [vmem:[#allocation84_spill] sm:$0xff] }
 0x247   : > { %v15387_v32 = vld [vmem:[#allocation86_spill] sm:$0xff] }
 0x249   : > { %9079 = vmatmul.mubr.f32.gmra.mrb[28].mxu0 %v12486_v44  ;;  %v3673_v44 = vld [vmem:[#allocation3 + $0x430] sm:$0xff] }
 0x24a   : > { %9081 = vmatprep.mubr.msk.f32.mxu0 %vm12662_vm11, %v1404_v40  ;;  %v10312_v40 = vpack.c.bf16 %v3674_v62, %v3673_v44  ;;  %v3680_v62 = vld [vmem:[#allocation3 + $0x468] sm:$0xff] }
 0x24b   : > { %v15394_v44 = vld [vmem:[#allocation91_spill] sm:$0xff] }
 0x24d   : > { %9082 = vmatmul.mubr.f32.gmra.mrb[30].mxu0 %v15350_v58 }
 0x24e   : > { %9116 = vmatprep.mubr.f32.mxu0 %v11631_v38  ;;  %v3675_v38 = vld [vmem:[#allocation3 + $0x440] sm:$0xff] }
 0x251   : > { %9117 = vmatmul.mubr.f32.vlgmr.msra.gmra.mrb[0].mxu0 %v11637_v46  ;;  %v10316_v46 = vpack.c.bf16 %v3676_v24, %v3675_v38  ;;  %v15396_v38 = vld [vmem:[#allocation23_spill] sm:$0xff] }
 0x252   : > { %10303 = vmatpush3.bf16.msra.mxu0 %v10300_v4  ;;  %9119 = vmatprep.mubr.f32.mxu0 %v11642_v53  ;;  %v3677_v53 = vld [vmem:[#allocation3 + $0x450] sm:$0xff]  ;;  %v3678_v4 = vld [vmem:[#allocation3 + $0x458] sm:$0xff] }
 0x253   : > { %10305 = vmatprep.subr.bf16.mxu0 %v10304_v6 }
 0x255   : > { %9120 = vmatmul.mubr.f32.gmra.mrb[2].mxu0 %v11649_v59  ;;  %v10320_v59 = vpack.c.bf16 %v3678_v4, %v3677_v53  ;;  %v15400_v4 = vmov 0 }
 0x256   : > { %9122 = vmatprep.mubr.f32.mxu0 %v11654_v3  ;;  %10307 = vmatpush3.bf16.msra.mxu0 %v10304_v6  ;;  %v3679_v3 = vld [vmem:[#allocation3 + $0x460] sm:$0xff] }
 0x257   : > { %10309 = vmatprep.subr.bf16.mxu0 %v10308_v54  ;;  %v15380_v6 = vld [vmem:[#allocation74_spill] sm:$0xff] }
 0x259   : > { %9123 = vmatmul.mubr.f32.gmra.mrb[4].mxu0 %v11661_v9  ;;  %v10324_v9 = vpack.c.bf16 %v3680_v62, %v3679_v3  ;;  %v4553_v62 = vld [vmem:[%s14700_s3 + $0x90] sm:$0xff] }
 0x25a   : > { %9125 = vmatprep.mubr.f32.mxu0 %v11666_v16  ;;  %10311 = vmatpush3.bf16.msra.mxu0 %v10308_v54  ;;  %v3681_v16 = vld [vmem:[#allocation3 + $0x470] sm:$0xff]  ;;  %v15392_v54 = vld [vmem:[#allocation89_spill] sm:$0xff] }
 0x25b   : > { %10313 = vmatprep.subr.bf16.mxu0 %v10312_v40 }
 0x25d   : > { %9126 = vmatmul.mubr.f32.gmra.mrb[6].mxu0 %v11673_v23  ;;  %v10328_v23 = vpack.c.bf16 %v3682_v12, %v3681_v16  ;;  %v4555_v12 = vld [vmem:[%s14700_s3 + $0xa0] sm:$0xff] }
 0x25e   : > { %9128 = vmatprep.mubr.f32.mxu0 %v11678_v13  ;;  %10315 = vmatpush3.bf16.msra.mxu0 %v10312_v40  ;;  %v15353_v13 = vld [vmem:[#allocation8_spill] sm:$0xff] }
 0x25f   : > { %10317 = vmatprep.subr.bf16.mxu0 %v10316_v46 }
 0x261   : > { %9129 = vmatmul.mubr.f32.gmra.mrb[8].mxu0 %v11685_v15  ;;  %v15354_v15 = vld [vmem:[#allocation9_spill] sm:$0xff] }
 0x262   : > { %9131 = vmatprep.mubr.f32.mxu0 %v11690_v31  ;;  %10319 = vmatpush3.bf16.msra.mxu0 %v10316_v46  ;;  %v15355_v31 = vld [vmem:[#allocation10_spill] sm:$0xff] }
 0x263   : > { %10321 = vmatprep.subr.bf16.mxu0 %v10320_v59  ;;  %v15397_v46 = vld [vmem:[#allocation6_spill] sm:$0xff] }
 0x265   : > { %9132 = vmatmul.mubr.f32.gmra.mrb[10].mxu0 %v11697_v34  ;;  %v15356_v34 = vmov 0.0  }
 0x266   : > { %9134 = vmatprep.mubr.f32.mxu0 %v11702_v45  ;;  %10323 = vmatpush3.bf16.msra.mxu0 %v10320_v59  ;;  %v15357_v45 = vld [vmem:[#allocation54_spill] sm:$0xff]  ;;  %v4552_v59 = vld [vmem:[%s14700_s3 + $0x88] sm:$0xff] }
 0x267   : > { %10325 = vmatprep.subr.bf16.mxu0 %v10324_v9 }
 0x269   : > { %9135 = vmatmul.mubr.f32.gmra.mrb[12].mxu0 %v11709_v48  ;;  %v15358_v48 = vld [vmem:[#allocation55_spill] sm:$0xff] }
 0x26a   : > { %9137 = vmatprep.mubr.f32.mxu0 %v11714_v57  ;;  %10327 = vmatpush3.bf16.msra.mxu0 %v10324_v9  ;;  %v15359_v57 = vld [vmem:[#allocation56_spill] sm:$0xff]  ;;  %v4554_v9 = vld [vmem:[%s14700_s3 + $0x98] sm:$0xff] }
 0x26b   : > { %10329 = vmatprep.subr.bf16.mxu0 %v10328_v23  ;;  %vm15360_vm9 = vnez %v15359_v57  ;;  %v10336_v16 = vpack.c.bf16 %v4554_v9, %v4553_v62 }
 0x26d   : > { %9138 = vmatmul.mubr.f32.gmra.mrb[14].mxu0 %v11721_v63  ;;  %v15361_v63 = vld [vmem:[#allocation57_spill] sm:$0xff] }
 0x26e   : > { %9140 = vmatprep.mubr.f32.mxu0 %v11726_v7  ;;  %10331 = vmatpush3.bf16.msra.mxu0 %v10328_v23  ;;  %v15362_v7 = vld [vmem:[#allocation59_spill] sm:$0xff] }
 0x26f   : > { %v4556_v23 = vld [vmem:[%s14700_s3 + $0xa8] sm:$0xff] }
 0x271   : > { %9141 = vmatmul.mubr.f32.gmra.mrb[16].mxu0 %v11733_v11  ;;  %v15363_v11 = vld [vmem:[#allocation58_spill] sm:$0xff] }
 0x272   : > { %9143 = vmatprep.mubr.f32.mxu0 %v11738_v22  ;;  %vm15364_vm11 = vnez %v15363_v11  ;;  %v15365_v22 = vld [vmem:[#allocation60_spill] sm:$0xff] }
 0x275   : > { %9144 = vmatmul.mubr.f32.gmra.mrb[18].mxu0 %v11745_v28  ;;  %v15366_v28 = vld [vmem:[#allocation61_spill] sm:$0xff] }
 0x276   : > { %9146 = vmatprep.mubr.f32.mxu0 %v11750_v30  ;;  %vm15367_vm8 = vnez %v15366_v28  ;;  %v15368_v30 = vld [vmem:[#allocation63_spill] sm:$0xff] }
 0x279   : > { %9147 = vmatmul.mubr.f32.gmra.mrb[20].mxu0 %v11755_v27  ;;  %v15369_v27 = vld [vmem:[#allocation64_spill] sm:$0xff] }
 0x27a   : > { %9149 = vmatprep.mubr.f32.mxu0 %v11760_v33  ;;  %v15370_v33 = vld [vmem:[#allocation65_spill] sm:$0xff] }
 0x27b   : > { %vm15371_vm14 = vnez %v15370_v33 }
 0x27d   : > { %9150 = vmatmul.mubr.f32.gmra.mrb[22].mxu0 %v11765_v39  ;;  %v15372_v39 = vld [vmem:[#allocation66_spill] sm:$0xff] }
 0x27e   : > { %9152 = vmatprep.mubr.f32.mxu0 %v11768_v47  ;;  %v15373_v47 = vld [vmem:[#allocation67_spill] sm:$0xff] }
 0x281   : > { %9153 = vmatmul.mubr.f32.gmra.mrb[24].mxu0 %v15353_v13  ;;  %v10340_v13 = vpack.c.bf16 %v4556_v23, %v4555_v12 }
 0x282   : > { %9155 = vmatprep.mubr.f32.mxu0 %v15354_v15  ;;  %v4557_v15 = vld [vmem:[%s14700_s3 + $0xb0] sm:$0xff] }
 0x285   : > { %9156 = vmatmul.mubr.f32.gmra.mrb[26].mxu0 %v15355_v31  ;;  %v4558_v31 = vld [vmem:[%s14700_s3 + $0xb8] sm:$0xff] }
 0x286   : > { %9158 = vmatprep.mubr.f32.mxu0 %v12364_v29  ;;  %v15375_v29 = vld [vmem:[#allocation69_spill] sm:$0xff] }
 0x289   : > { %9159 = vmatmul.mubr.f32.gmra.mrb[28].mxu0 %v12461_v26  ;;  %v15376_v26 = vld [vmem:[#allocation70_spill] sm:$0xff] }
 0x28a   : > { %9161 = vmatprep.mubr.f32.mxu0 %v15356_v34 }
 0x28d   : > { %9162 = vmatmul.mubr.f32.gmra.mrb[30].mxu0 %v15356_v34 }
 0x28e   : > { %9196 = vmatprep.mubr.f32.mxu0 %v15357_v45  ;;  %v10344_v45 = vpack.c.bf16 %v4558_v31, %v4557_v15 }
 0x291   : > { %9197 = vmatmul.mubr.msk.f32.vlgmr.msra.gmra.mrb[0].mxu0 %vm15360_vm9, %v15358_v48  ;;  %vm15374_vm9 = vnez %v15373_v47  ;;  %v4559_v48 = vld [vmem:[%s14700_s3 + $0xc0] sm:$0xff] }
 0x292   : > { %9199 = vmatprep.mubr.f32.mxu0 %v15361_v63  ;;  %v4560_v63 = vld [vmem:[%s14700_s3 + $0xc8] sm:$0xff] }
 0x295   : > { %9200 = vmatmul.mubr.msk.f32.gmra.mrb[2].mxu0 %vm15364_vm11, %v15362_v7  ;;  %vm15377_vm11 = vnez %v15376_v26  ;;  %v10348_v7 = vpack.c.bf16 %v4560_v63, %v4559_v48 }
 0x296   : > { %9202 = vmatprep.mubr.f32.mxu0 %v15365_v22  ;;  %v4561_v22 = vld [vmem:[%s14700_s3 + $0xd0] sm:$0xff] }
 0x299   : > { %9203 = vmatmul.mubr.msk.f32.gmra.mrb[4].mxu0 %vm15367_vm8, %v15263_v56  ;;  %v15378_v56 = vld [vmem:[#allocation72_spill] sm:$0xff] }
 0x29a   : > { %9205 = vmatprep.mubr.f32.mxu0 %v15368_v30  ;;  %vm15379_vm8 = vnez %v15378_v56  ;;  %v4562_v30 = vld [vmem:[%s14700_s3 + $0xd8] sm:$0xff] }
 0x29d   : > { %9206 = vmatmul.mubr.msk.f32.gmra.mrb[6].mxu0 %vm15371_vm14, %v15369_v27  ;;  %v10352_v27 = vpack.c.bf16 %v4562_v30, %v4561_v22 }
 0x29e   : > { %9208 = vmatprep.mubr.f32.mxu0 %v15372_v39  ;;  %v4563_v39 = vld [vmem:[%s14700_s3 + $0xe0] sm:$0xff] }
 0x2a1   : > { %9209 = vmatmul.mubr.msk.f32.gmra.mrb[8].mxu0 %vm15374_vm9, %v12217_v10 }
 0x2a2   : > { %9211 = vmatprep.mubr.f32.mxu0 %v15273_v19  ;;  %v15382_v19 = vld [vmem:[#allocation80_spill] sm:$0xff] }
 0x2a5   : > { %9212 = vmatmul.mubr.msk.f32.gmra.mrb[10].mxu0 %vm15377_vm11, %v15375_v29  ;;  %v4564_v29 = vld [vmem:[%s14700_s3 + $0xe8] sm:$0xff] }
 0x2a6   : > { %9214 = vmatprep.mubr.f32.mxu0 %v15277_v20  ;;  %v15383_v20 = vld [vmem:[#allocation83_spill] sm:$0xff] }
 0x2a9   : > { %9215 = vmatmul.mubr.msk.f32.gmra.mrb[12].mxu0 %vm15379_vm8, %v15278_v21  ;;  %v15384_v21 = vld [vmem:[#allocation85_spill] sm:$0xff]  ;;  %vm15386_vm8 = vnez %v15385_v25 }
 0x2aa   : > { %9217 = vmatprep.mubr.f32.mxu0 %v15380_v6  ;;  %v10356_v6 = vpack.c.bf16 %v4564_v29, %v4563_v39 }
 0x2ad   : > { %9218 = vmatmul.mubr.msk.f32.gmra.mrb[14].mxu0 %vm15284_vm0, %v15282_v2  ;;  %v15388_v2 = vld [vmem:[#allocation87_spill] sm:$0xff] }
 0x2ae   : > { %9220 = vmatprep.mubr.f32.mxu0 %v15285_v18  ;;  %vm15389_vm0 = vnez %v15388_v2  ;;  %v15390_v18 = vld [vmem:[#allocation88_spill] sm:$0xff] }
 0x2b1   : > { %9221 = vmatmul.mubr.msk.f32.gmra.mrb[16].mxu0 %vm15288_vm10, %v15286_v49  ;;  %v15391_v49 = vld [vmem:[#allocation90_spill] sm:$0xff]  ;;  %vm15393_vm10 = vnez %v15392_v54 }
 0x2b2   : > { %9223 = vmatprep.mubr.f32.mxu0 %v15382_v19  ;;  %v4565_v19 = vld [vmem:[%s14700_s3 + $0xf0] sm:$0xff] }
 0x2b5   : > { %9224 = vmatmul.mubr.msk.f32.gmra.mrb[18].mxu0 %vm15292_vm13, %v15290_v35  ;;  %v307_v35 = vadd.s32 280, %v11770_v51 }
 0x2b6   : > { %9226 = vmatprep.mubr.f32.mxu0 %v15383_v20  ;;  %v4566_v20 = vld [vmem:[%s14700_s3 + $0xf8] sm:$0xff] }
 0x2b7   : > { %v557_v24 = vand.u32 15, %v307_v35 }
 0x2b9   : > { %9227 = vmatmul.mubr.msk.f32.gmra.mrb[20].mxu0 %vm15386_vm8, %v15384_v21  ;;  %v10360_v21 = vpack.c.bf16 %v4566_v20, %v4565_v19 }
 0x2ba   : > { %9229 = vmatprep.mubr.f32.mxu0 %v15387_v32  ;;  %v4535_v32 = vld [vmem:[%s14700_s3] sm:$0xff] }
 0x2bd   : > { %9230 = vmatmul.mubr.msk.f32.gmra.mrb[22].mxu0 %vm15389_vm0, %v12350_v60  ;;  %v15399_v60 = vld [vmem:[#allocation49_spill] sm:$0xff]  ;;  %vm12769_vm0 = vcmp.lt.s32.totalorder %v557_v24, 15 }
 0x2be   : > { %9232 = vmatprep.mubr.f32.mxu0 %v15390_v18  ;;  %v15401_v4 = vsel %vm12769_vm0, 4294967295, %v15400_v4  ;;  %v4536_v18 = vld [vmem:[%s14700_s3 + $0x8] sm:$0xff] }
 0x2bf   : > { %15402 = vst [vmem:[#allocation51_spill] sm:$0xff] %v15401_v4 }
 0x2c1   : > { %9233 = vmatmul.mubr.msk.f32.gmra.mrb[24].mxu0 %vm15393_vm10, %v15391_v49  ;;  %v12832_v49 = vpack.c.bf16 %v4536_v18, %v4535_v32 }
 0x2c2   : > { %9235 = vmatprep.mubr.f32.mxu0 %v15394_v44  ;;  %v12838_v44 = vld [vmem:[%s14699_s2] ss:$0 sm:$0xff] }
 0x2c5   : > { %9236 = vmatmul.mubr.msk.f32.gmra.mrb[26].mxu0 %vm12387_vm15, %v12395_v37  ;;  %v4551_v37 = vld [vmem:[%s14700_s3 + $0x80] sm:$0xff] }
 0x2c6   : > { %9238 = vmatprep.mubr.f32.mxu0 %v15396_v38  ;;  %v10332_v3 = vpack.c.bf16 %v4552_v59, %v4551_v37 }
 0x2c8   : > { %10333 = vmatprep.subr.bf16.mxu0 %v10332_v3  ;;  %10652 = vmatprep.subr.bf16.mxu1 %v10332_v3 }
 0x2c9   : > { %9239 = vmatmul.mubr.msk.f32.gmra.mrb[28].mxu0 %vm12590_vm12, %v15397_v46  ;;  %10660 = vmatpush3.bf16.msra.mxu1 %v10332_v3 }
 0x2ca   : > { %9241 = vmatprep.mubr.f32.mxu0 %v15399_v60  ;;  %10335 = vmatpush3.bf16.msra.mxu0 %v10332_v3 }
 0x2cb   : > { %10337 = vmatprep.subr.bf16.mxu0 %v10336_v16  ;;  %10653 = vmatprep.subr.bf16.mxu1 %v10336_v16 }
 0x2cd   : > { %9242 = vmatmul.mubr.msk.f32.gmra.mrb[30].mxu0 %vm12769_vm0, %v15399_v60  ;;  %10661 = vmatpush3.bf16.msra.mxu1 %v10336_v16 }
 0x2ce   : > { %9276 = vmatprep.mubr.f32.mxu0 %v15356_v34  ;;  %10339 = vmatpush3.bf16.msra.mxu0 %v10336_v16 }
 0x2cf   : > { %10341 = vmatprep.subr.bf16.mxu0 %v10340_v13  ;;  %10654 = vmatprep.subr.bf16.mxu1 %v10340_v13 }
 0x2d1   : > { %10662 = vmatpush3.bf16.msra.mxu1 %v10340_v13 }
 0x2d2   : > { %10343 = vmatpush3.bf16.msra.mxu0 %v10340_v13  ;;  %10655 = vmatprep.subr.bf16.mxu1 %v10344_v45 }
 0x2d3   : > { %10345 = vmatprep.subr.bf16.mxu0 %v10344_v45 }
 0x2d5   : > { %10663 = vmatpush3.bf16.msra.mxu1 %v10344_v45 }
 0x2d6   : > { %10347 = vmatpush3.bf16.msra.mxu0 %v10344_v45  ;;  %10656 = vmatprep.subr.bf16.mxu1 %v10348_v7 }
 0x2d7   : > { %10349 = vmatprep.subr.bf16.mxu0 %v10348_v7 }
 0x2d9   : > { %10664 = vmatpush3.bf16.msra.mxu1 %v10348_v7 }
 0x2da   : > { %10351 = vmatpush3.bf16.msra.mxu0 %v10348_v7  ;;  %10657 = vmatprep.subr.bf16.mxu1 %v10352_v27 }
 0x2db   : > { %10353 = vmatprep.subr.bf16.mxu0 %v10352_v27 }
 0x2dd   : > { %10665 = vmatpush3.bf16.msra.mxu1 %v10352_v27 }
 0x2de   : > { %10355 = vmatpush3.bf16.msra.mxu0 %v10352_v27  ;;  %10658 = vmatprep.subr.bf16.mxu1 %v10356_v6 }
 0x2df   : > { %10357 = vmatprep.subr.bf16.mxu0 %v10356_v6 }
 0x2e1   : > { %10666 = vmatpush3.bf16.msra.mxu1 %v10356_v6 }
 0x2e2   : > { %10359 = vmatpush3.bf16.msra.mxu0 %v10356_v6  ;;  %10659 = vmatprep.subr.bf16.mxu1 %v10360_v21 }
 0x2e3   : > { %10361 = vmatprep.subr.bf16.mxu0 %v10360_v21 }
 0x2e5   : > { %10667 = vmatpush3.bf16.msra.mxu1 %v10360_v21 }
 0x2e6   : > { %10363 = vmatpush3.bf16.msra.mxu0 %v10360_v21  ;;  %10365 = vmatprep.subr.bf16.mxu1 %v12832_v49 }
 0x2e9   : > { %9277 = vmatmul.mubr.f32.vlgmr.msra.gmra.mrb[32].mxu0 %v15356_v34 }
 0x364   : > { %v9198_v35 = vpop.f32.mrb[0].mxu0 }
 0x365   : > { %v12841_v38 = vadd.f32 %v9198_v35, %v12838_v44  ;;  %v3749_v24 = vpop.f32.mrb[1].mxu0 }
 0x366   : > { %v12844_v46 = vadd.f32 %v12838_v44, %v3749_v24 }
 0x367   : > { %v4018_v37 = vmul.f32 %v12841_v38, %v12841_v38 }
 0x368   : > { %v4017_v59 = vmul.f32 %v12844_v46, %v12844_v46  ;;  %v9201_v3 = vpop.f32.mrb[2].mxu0  ;;  %v3979_v9 = vadd.f32 %v12841_v38, %v12844_v46 }
 0x369   : > { %v3759_v62 = vpop.f32.mrb[3].mxu0  ;;  %v12853_v16 = vadd.f32 %v9201_v3, %v12838_v44 }
 0x36a   : > { %v12856_v12 = vadd.f32 %v12838_v44, %v3759_v62  ;;  %v4049_v23 = vadd.f32 %v4018_v37, %v4017_v59 }
 0x36b   : > { %v4020_v63 = vmul.f32 %v12853_v16, %v12853_v16 }
 0x36c   : > { %v3980_v13 = vadd.f32 %v3979_v9, %v12856_v12  ;;  %v4019_v15 = vmul.f32 %v12856_v12, %v12856_v12  ;;  %v9204_v31 = vpop.f32.mrb[4].mxu0 }
 0x36d   : > { %v12862_v45 = vadd.f32 %v9204_v31, %v12838_v44  ;;  %v3769_v48 = vpop.f32.mrb[5].mxu0 }
 0x36e   : > { %v4050_v7 = vadd.f32 %v4049_v23, %v4019_v15  ;;  %v12867_v22 = vadd.f32 %v12838_v44, %v3769_v48  ;;  %v3981_v30 = vadd.f32 %v3980_v13, %v12853_v16 }
 0x36f   : > { %v4022_v19 = vmul.f32 %v12862_v45, %v12862_v45 }
 0x370   : > { %v3982_v27 = vadd.f32 %v3981_v30, %v12867_v22  ;;  %v4021_v39 = vmul.f32 %v12867_v22, %v12867_v22  ;;  %v4051_v29 = vadd.f32 %v4050_v7, %v4020_v63  ;;  %v9207_v6 = vpop.f32.mrb[6].mxu0 }
 0x371   : > { %v3779_v20 = vpop.f32.mrb[7].mxu0  ;;  %v12876_v32 = vadd.f32 %v9207_v6, %v12838_v44 }
 0x372   : > { %v4052_v21 = vadd.f32 %v4051_v29, %v4021_v39  ;;  %v12879_v18 = vadd.f32 %v12838_v44, %v3779_v20  ;;  %v3983_v35 = vadd.f32 %v3982_v27, %v12862_v45 }
 0x373   : > { %v4024_v23 = vmul.f32 %v12876_v32, %v12876_v32 }
 0x374   : > { %v3984_v24 = vadd.f32 %v3983_v35, %v12879_v18  ;;  %v4023_v37 = vmul.f32 %v12879_v18, %v12879_v18  ;;  %v4053_v59 = vadd.f32 %v4052_v21, %v4022_v19  ;;  %v9210_v3 = vpop.f32.mrb[8].mxu0 }
 0x375   : > { %v12886_v62 = vadd.f32 %v9210_v3, %v12838_v44  ;;  %v3789_v9 = vpop.f32.mrb[9].mxu0 }
 0x376   : > { %v4054_v13 = vadd.f32 %v4053_v59, %v4023_v37  ;;  %v12891_v15 = vadd.f32 %v12838_v44, %v3789_v9  ;;  %v3985_v31 = vadd.f32 %v3984_v24, %v12876_v32 }
 0x377   : > { %v4026_v27 = vmul.f32 %v12886_v62, %v12886_v62 }
 0x378   : > { %v3986_v48 = vadd.f32 %v3985_v31, %v12891_v15  ;;  %v4025_v63 = vmul.f32 %v12891_v15, %v12891_v15  ;;  %v4055_v7 = vadd.f32 %v4054_v13, %v4024_v23  ;;  %v9213_v30 = vpop.f32.mrb[10].mxu0 }
 0x379   : > { %v3799_v39 = vpop.f32.mrb[11].mxu0  ;;  %v12900_v6 = vadd.f32 %v9213_v30, %v12838_v44 }
 0x37a   : > { %v4056_v29 = vadd.f32 %v4055_v7, %v4025_v63  ;;  %v12903_v19 = vadd.f32 %v12838_v44, %v3799_v39  ;;  %v3987_v20 = vadd.f32 %v3986_v48, %v12886_v62 }
 0x37b   : > { %v4028_v9 = vmul.f32 %v12900_v6, %v12900_v6 }
 0x37c   : > { %v3988_v21 = vadd.f32 %v3987_v20, %v12903_v19  ;;  %v4027_v35 = vmul.f32 %v12903_v19, %v12903_v19  ;;  %v4057_v24 = vadd.f32 %v4056_v29, %v4026_v27  ;;  %v9216_v37 = vpop.f32.mrb[12].mxu0 }
 0x37d   : > { %v12910_v59 = vadd.f32 %v9216_v37, %v12838_v44  ;;  %v3809_v3 = vpop.f32.mrb[13].mxu0 }
 0x37e   : > { %v4058_v23 = vadd.f32 %v4057_v24, %v4027_v35  ;;  %v12915_v13 = vadd.f32 %v12838_v44, %v3809_v3  ;;  %v3989_v31 = vadd.f32 %v3988_v21, %v12900_v6 }
 0x37f   : > { %v4030_v27 = vmul.f32 %v12910_v59, %v12910_v59 }
 0x380   : > { %v3990_v48 = vadd.f32 %v3989_v31, %v12915_v13  ;;  %v4029_v63 = vmul.f32 %v12915_v13, %v12915_v13  ;;  %v4059_v7 = vadd.f32 %v4058_v23, %v4028_v9  ;;  %v9219_v30 = vpop.f32.mrb[14].mxu0 }
 0x381   : > { %v3819_v39 = vpop.f32.mrb[15].mxu0  ;;  %v12924_v20 = vadd.f32 %v9219_v30, %v12838_v44 }
 0x382   : > { %v4060_v29 = vadd.f32 %v4059_v7, %v4029_v63  ;;  %v12927_v35 = vadd.f32 %v12838_v44, %v3819_v39  ;;  %v3991_v21 = vadd.f32 %v3990_v48, %v12910_v59 }
 0x383   : > { %v4032_v63 = vmul.f32 %v12924_v20, %v12924_v20 }
 0x384   : > { %v3992_v24 = vadd.f32 %v3991_v21, %v12927_v35  ;;  %v4031_v37 = vmul.f32 %v12927_v35, %v12927_v35  ;;  %v4061_v3 = vadd.f32 %v4060_v29, %v4030_v27  ;;  %v9222_v9 = vpop.f32.mrb[16].mxu0 }
 0x385   : > { %v12934_v23 = vadd.f32 %v9222_v9, %v12838_v44  ;;  %v3829_v31 = vpop.f32.mrb[17].mxu0 }
 0x386   : > { %v4062_v7 = vadd.f32 %v4061_v3, %v4031_v37  ;;  %v12939_v30 = vadd.f32 %v12838_v44, %v3829_v31  ;;  %v3993_v48 = vadd.f32 %v3992_v24, %v12924_v20 }
 0x387   : > { %v4034_v9 = vmul.f32 %v12934_v23, %v12934_v23 }
 0x388   : > { %v3994_v39 = vadd.f32 %v3993_v48, %v12939_v30  ;;  %v4033_v21 = vmul.f32 %v12939_v30, %v12939_v30  ;;  %v4063_v27 = vadd.f32 %v4062_v7, %v4032_v63  ;;  %v9225_v29 = vpop.f32.mrb[18].mxu0 }
 0x389   : > { %v3839_v4 = vpop.f32.mrb[19].mxu0  ;;  %v12948_v42 = vadd.f32 %v9225_v29, %v12838_v44 }
 0x38a   : > { %v4064_v34 = vadd.f32 %v4063_v27, %v4033_v21  ;;  %v12951_v37 = vadd.f32 %v12838_v44, %v3839_v4  ;;  %v3995_v24 = vadd.f32 %v3994_v39, %v12934_v23 }
 0x38b   : > { %v4036_v21 = vmul.f32 %v12948_v42, %v12948_v42 }
 0x38c   : > { %v3996_v3 = vadd.f32 %v3995_v24, %v12951_v37  ;;  %v4035_v31 = vmul.f32 %v12951_v37, %v12951_v37  ;;  %v4065_v63 = vadd.f32 %v4064_v34, %v4034_v9  ;;  %v9228_v7 = vpop.f32.mrb[20].mxu0 }
 0x38d   : > { %v12958_v48 = vadd.f32 %v9228_v7, %v12838_v44  ;;  %v3849_v53 = vpop.f32.mrb[21].mxu0 }
 0x38e   : > { %v4066_v27 = vadd.f32 %v4065_v63, %v4035_v31  ;;  %v12963_v4 = vadd.f32 %v12838_v44, %v3849_v53  ;;  %v3997_v39 = vadd.f32 %v3996_v3, %v12948_v42 }
 0x38f   : > { %v4038_v7 = vmul.f32 %v12958_v48, %v12958_v48 }
 0x390   : > { %v3998_v29 = vadd.f32 %v3997_v39, %v12963_v4  ;;  %v4037_v24 = vmul.f32 %v12963_v4, %v12963_v4  ;;  %v4067_v34 = vadd.f32 %v4066_v27, %v4036_v21  ;;  %v9231_v9 = vpop.f32.mrb[22].mxu0 }
 0x391   : > { %v3859_v40 = vpop.f32.mrb[23].mxu0  ;;  %v12972_v2 = vadd.f32 %v9231_v9, %v12838_v44 }
 0x392   : > { %v4068_v54 = vadd.f32 %v4067_v34, %v4037_v24  ;;  %v12975_v53 = vadd.f32 %v12838_v44, %v3859_v40  ;;  %v3999_v3 = vadd.f32 %v3998_v29, %v12958_v48 }
 0x393   : > { %v4040_v24 = vmul.f32 %v12972_v2, %v12972_v2 }
 0x394   : > { %v4000_v31 = vadd.f32 %v3999_v3, %v12975_v53  ;;  %v4039_v63 = vmul.f32 %v12975_v53, %v12975_v53  ;;  %v4069_v21 = vadd.f32 %v4068_v54, %v4038_v7  ;;  %v9234_v27 = vpop.f32.mrb[24].mxu0 }
 0x395   : > { %v12982_v39 = vadd.f32 %v9234_v27, %v12838_v44  ;;  %v3869_v25 = vpop.f32.mrb[25].mxu0 }
 0x396   : > { %v4070_v34 = vadd.f32 %v4069_v21, %v4039_v63  ;;  %v12987_v40 = vadd.f32 %v12838_v44, %v3869_v25  ;;  %v4001_v29 = vadd.f32 %v4000_v31, %v12972_v2 }
 0x397   : > { %v4042_v27 = vmul.f32 %v12982_v39, %v12982_v39 }
 0x398   : > { %v4002_v9 = vadd.f32 %v4001_v29, %v12987_v40  ;;  %v4041_v3 = vmul.f32 %v12987_v40, %v12987_v40  ;;  %v4071_v54 = vadd.f32 %v4070_v34, %v4040_v24  ;;  %v9237_v7 = vpop.f32.mrb[26].mxu0 }
 0x399   : > { %v3879_v14 = vpop.f32.mrb[27].mxu0  ;;  %v12996_v8 = vadd.f32 %v9237_v7, %v12838_v44 }
 0x39a   : > { %v4072_v10 = vadd.f32 %v4071_v54, %v4041_v3  ;;  %v12999_v25 = vadd.f32 %v12838_v44, %v3879_v14  ;;  %v4003_v31 = vadd.f32 %v4002_v9, %v12982_v39 }
 0x39b   : > { %v4044_v3 = vmul.f32 %v12996_v8, %v12996_v8 }
 0x39c   : > { %v4004_v63 = vadd.f32 %v4003_v31, %v12999_v25  ;;  %v4043_v21 = vmul.f32 %v12999_v25, %v12999_v25  ;;  %v4073_v24 = vadd.f32 %v4072_v10, %v4042_v27  ;;  %v9240_v34 = vpop.f32.mrb[28].mxu0 }
 0x39d   : > { %v13006_v29 = vadd.f32 %v9240_v34, %v12838_v44  ;;  %v3889_v56 = vpop.f32.mrb[29].mxu0 }
 0x39e   : > { %v4074_v54 = vadd.f32 %v4073_v24, %v4043_v21  ;;  %v13011_v14 = vadd.f32 %v12838_v44, %v3889_v56  ;;  %v4005_v9 = vadd.f32 %v4004_v63, %v12996_v8 }
 0x39f   : > { %v4046_v34 = vmul.f32 %v13006_v29, %v13006_v29 }
 0x3a0   : > { %v4006_v7 = vadd.f32 %v4005_v9, %v13011_v14  ;;  %v4045_v31 = vmul.f32 %v13011_v14, %v13011_v14  ;;  %v4075_v10 = vadd.f32 %v4074_v54, %v4044_v3  ;;  %v9243_v27 = vpop.f32.mrb[30].mxu0 }
 0x3a1   : > { %v3899_v26 = vpop.f32.mrb[31].mxu0  ;;  %v13020_v33 = vadd.f32 %v9243_v27, %v12838_v44 }
 0x3a2   : > { %v4076_v47 = vadd.f32 %v4075_v10, %v4045_v31  ;;  %v3977_v56 = vadd.f32 %v12838_v44, %v3899_v26  ;;  %v4007_v21 = vadd.f32 %v4006_v7, %v13006_v29 }
 0x3a3   : > { %v4048_v28 = vmul.f32 %v13020_v33, %v13020_v33 }
 0x3a4   : > { %v4008_v63 = vadd.f32 %v4007_v21, %v3977_v56  ;;  %v4047_v24 = vmul.f32 %v3977_v56, %v3977_v56  ;;  %v4077_v9 = vadd.f32 %v4076_v47, %v4046_v34 }
 0x3a6   : > { %v4009_v3 = vadd.f32 %v4008_v63, %v13020_v33  ;;  %v4078_v54 = vadd.f32 %v4077_v9, %v4047_v24 }
 0x3a8   : > { %v4010_v11 = vrot.slane %v4009_v3, 4  ;;  %v4079_v57 = vadd.f32 %v4078_v54, %v4048_v28 }
 0x3aa   : > { %v4011_v60 = vadd.f32 %v4010_v11, %v4009_v3  ;;  %v4080_v31 = vrot.slane %v4079_v57, 4 }
 0x3ac   : > { %v4012_v10 = vrot.slane %v4011_v60, 2  ;;  %v4081_v27 = vadd.f32 %v4080_v31, %v4079_v57 }
 0x3ae   : > { %v4013_v17 = vadd.f32 %v4012_v10, %v4011_v60  ;;  %v4082_v36 = vrot.slane %v4081_v27, 2 }
 0x3b0   : > { %v4014_v26 = vrot.slane %v4013_v17, 1  ;;  %v4083_v44 = vadd.f32 %v4082_v36, %v4081_v27 }
 0x3b2   : > { %v4015_v7 = vadd.f32 %v4014_v26, %v4013_v17  ;;  %v4084_v21 = vrot.slane %v4083_v44, 1 }
 0x3b4   : > { %v13027_v5 = vmul.f32 0.00390625, %v4015_v7  ;;  %v4085_v47 = vadd.f32 %v4084_v21, %v4083_v44 }
 0x3b6   : > { %v4086_v34 = vmul.f32 0.00390625, %v4085_v47  ;;  %v4087_v63 = vmul.f32 %v13027_v5, %v13027_v5  ;;  %v4119_v24 = vsub.f32 %v3977_v56, %v13027_v5  ;;  %v4099_v11 = vsub.f32 %v12903_v19, %v13027_v5 }
 0x3b7   : > { %v4100_v57 = vsub.f32 %v12900_v6, %v13027_v5  ;;  %v4101_v17 = vsub.f32 %v12915_v13, %v13027_v5  ;;  %v4102_v36 = vsub.f32 %v12910_v59, %v13027_v5  ;;  %v4103_v9 = vsub.f32 %v12927_v35, %v13027_v5 }
 0x3b8   : > { %v4088_v28 = vsub.f32 %v4086_v34, %v4087_v63  ;;  %v4104_v56 = vsub.f32 %v12924_v20, %v13027_v5  ;;  %v4105_v3 = vsub.f32 %v12939_v30, %v13027_v5  ;;  %v4106_v19 = vsub.f32 %v12934_v23, %v13027_v5 }
 0x3b9   : > { %v4107_v6 = vsub.f32 %v12951_v37, %v13027_v5  ;;  %v4108_v13 = vsub.f32 %v12948_v42, %v13027_v5  ;;  %v4109_v59 = vsub.f32 %v12963_v4, %v13027_v5  ;;  %v4110_v35 = vsub.f32 %v12958_v48, %v13027_v5 }
 0x3ba   : > { %v4121_v60 = vadd.f32 1e-05, %v4088_v28  ;;  %v4111_v20 = vsub.f32 %v12975_v53, %v13027_v5  ;;  %v4112_v30 = vsub.f32 %v12972_v2, %v13027_v5  ;;  %v4113_v23 = vsub.f32 %v12987_v40, %v13027_v5 }
 0x3bb   : > { %v4114_v37 = vsub.f32 %v12982_v39, %v13027_v5  ;;  %v4115_v42 = vsub.f32 %v12999_v25, %v13027_v5  ;;  %v4116_v4 = vsub.f32 %v12996_v8, %v13027_v5  ;;  %v4117_v48 = vsub.f32 %v13011_v14, %v13027_v5 }
 0x3bc   : > { %11268 = vrsqrt.f32 %v4121_v60  ;;  %v4118_v53 = vsub.f32 %v13006_v29, %v13027_v5  ;;  %v4120_v2 = vsub.f32 %v13020_v33, %v13027_v5  ;;  %v4089_v40 = vsub.f32 %v12844_v46, %v13027_v5 }
 0x3bd   : > { %v4090_v39 = vsub.f32 %v12841_v38, %v13027_v5  ;;  %v4091_v25 = vsub.f32 %v12856_v12, %v13027_v5  ;;  %v4092_v8 = vsub.f32 %v12853_v16, %v13027_v5  ;;  %v4093_v14 = vsub.f32 %v12867_v22, %v13027_v5 }
 0x3be   : > { %v4094_v29 = vsub.f32 %v12862_v45, %v13027_v5  ;;  %v4095_v33 = vsub.f32 %v12879_v18, %v13027_v5  ;;  %v4096_v46 = vsub.f32 %v12876_v32, %v13027_v5  ;;  %v4097_v38 = vsub.f32 %v12891_v15, %v13027_v5 }
 0x3bf   : > { %v4098_v12 = vsub.f32 %v12886_v62, %v13027_v5 }
 0x3c6   : > { %v11269_v54 = vpop.eup %11268 }
 0x3c7   : > { %v13094_v16 = vmul.f32 %v11269_v54, %v4119_v24  ;;  %v4123_v31 = vmul.f32 %v11269_v54, %v4089_v40  ;;  %v4124_v22 = vmul.f32 %v11269_v54, %v4090_v39  ;;  %v4125_v10 = vmul.f32 %v11269_v54, %v4091_v25 }
 0x3c8   : > { %v13096_v27 = vmul.f32 %v11269_v54, %v4092_v8  ;;  %v13098_v45 = vmul.f32 %v11269_v54, %v4093_v14  ;;  %v13100_v26 = vmul.f32 %v11269_v54, %v4094_v29  ;;  %v13102_v18 = vmul.f32 %v11269_v54, %v4095_v33 }
 0x3c9   : > { %v13104_v32 = vmul.f32 %v11269_v54, %v4096_v46  ;;  %v13106_v44 = vmul.f32 %v11269_v54, %v4097_v38  ;;  %v13108_v15 = vmul.f32 %v11269_v54, %v4098_v12  ;;  %v13110_v5 = vmul.f32 %v11269_v54, %v4099_v11 }
 0x3ca   : > { %v13112_v62 = vmul.f32 %v11269_v54, %v4100_v57  ;;  %v13114_v7 = vmul.f32 %v11269_v54, %v4101_v17  ;;  %v13116_v21 = vmul.f32 %v11269_v54, %v4102_v36  ;;  %v4137_v47 = vmul.f32 %v11269_v54, %v4103_v9 }
 0x3cb   : > { %v4138_v34 = vmul.f32 %v11269_v54, %v4104_v56  ;;  %v4139_v63 = vmul.f32 %v11269_v54, %v4105_v3  ;;  %v4140_v24 = vmul.f32 %v11269_v54, %v4106_v19  ;;  %v13118_v28 = vmul.f32 %v11269_v54, %v4107_v6  ;;  %v4537_v3 = vld [vmem:[%s14700_s3 + $0x10] sm:$0xff] }
 0x3cc   : > { %v13120_v60 = vmul.f32 %v11269_v54, %v4108_v13  ;;  %v13122_v40 = vmul.f32 %v11269_v54, %v4109_v59  ;;  %v13124_v39 = vmul.f32 %v11269_v54, %v4110_v35  ;;  %v13126_v11 = vmul.f32 %v11269_v54, %v4111_v20  ;;  %v4538_v59 = vld [vmem:[%s14700_s3 + $0x18] sm:$0xff]  ;;  %v4539_v35 = vld [vmem:[%s14700_s3 + $0x20] sm:$0xff]  ;;  %v4540_v20 = vld [vmem:[%s14700_s3 + $0x28] sm:$0xff] }
 0x3cd   : > { %v13128_v57 = vmul.f32 %v11269_v54, %v4112_v30  ;;  %v13130_v17 = vmul.f32 %v11269_v54, %v4113_v23  ;;  %v13132_v36 = vmul.f32 %v11269_v54, %v4114_v37  ;;  %v13134_v9 = vmul.f32 %v11269_v54, %v4115_v42 }
 0x3ce   : > { %v13136_v56 = vmul.f32 %v11269_v54, %v4116_v4  ;;  %v13141_v19 = vmul.f32 %v11269_v54, %v4117_v48  ;;  %v13143_v6 = vmul.f32 %v11269_v54, %v4118_v53  ;;  %v13145_v13 = vmul.f32 %v11269_v54, %v4120_v2 }
 0x3cf   : > { %vm4155_vm0 = vcmp.ge.f32.partialorder %v4123_v31, 0.0  ;;  %v4187_v30 = vmul.f32 0.2, %v4123_v31  ;;  %vm4169_vm12 = vcmp.ge.f32.partialorder %v4137_v47, 0.0  ;;  %v4201_v23 = vmul.f32 0.2, %v4137_v47 }
 0x3d0   : > { %15403 = vst [vmem:[#allocation53_spill] sm:$0xff] %v13145_v13  ;;  %vm4156_vm15 = vcmp.ge.f32.partialorder %v4124_v22, 0.0  ;;  %v4188_v37 = vmul.f32 0.2, %v4124_v22  ;;  %vm4170_vm10 = vcmp.ge.f32.partialorder %v4138_v34, 0.0  ;;  %vm4157_vm8 = vcmp.ge.f32.partialorder %v4125_v10, 0.0 }
 0x3d1   : > { %v13156_v42 = vsel %vm4155_vm0, %v4123_v31, %v4187_v30  ;;  %v13158_v4 = vsel %vm4169_vm12, %v4137_v47, %v4201_v23  ;;  %v4202_v48 = vmul.f32 0.2, %v4138_v34  ;;  %v4189_v2 = vmul.f32 0.2, %v4125_v10  ;;  %v4542_v47 = vld [vmem:[%s14700_s3 + $0x38] sm:$0xff]  ;;  %v4543_v23 = vld [vmem:[%s14700_s3 + $0x40] sm:$0xff] }
 0x3d2   : > { %15404 = vst [vmem:[#allocation62_spill] sm:$0xff] %v13156_v42  ;;  %9279 = vmatprep.mubr.f32.mxu0 %v13156_v42  ;;  %9300 = vmatprep.mubr.f32.mxu1 %v13158_v4  ;;  %v13162_v53 = vsel %vm4156_vm15, %v4124_v22, %v4188_v37  ;;  %v10368_v25 = vpack.c.bf16 %v4538_v59, %v4537_v3  ;;  %vm4171_vm13 = vcmp.ge.f32.partialorder %v4139_v63, 0.0  ;;  %v4203_v29 = vmul.f32 0.2, %v4139_v63  ;;  %v4544_v37 = vld [vmem:[%s14700_s3 + $0x48] sm:$0xff] }
 0x3d3   : > { %15405 = vst [vmem:[#allocation68_spill] sm:$0xff] %v13162_v53  ;;  %v10372_v8 = vpack.c.bf16 %v4540_v20, %v4539_v35  ;;  %9280 = vmatmul.mubr.f32.gmra.mrb[34].mxu0 %v13162_v53  ;;  %v13165_v14 = vsel %vm4170_vm10, %v4138_v34, %v4202_v48  ;;  %vm4158_vm12 = vcmp.ge.f32.partialorder %v13096_v27, 0.0  ;;  %v13169_v54 = vsel %vm4157_vm8, %v4125_v10, %v4189_v2  ;;  %v4541_v10 = vld [vmem:[%s14700_s3 + $0x30] sm:$0xff]  ;;  %v5291_v13 = vld [vmem:[%s14700_s3 + $0x188] sm:$0xff] }
 0x3d4   : > { %9301 = vmatmul.mubr.f32.vlgmr.msra.gmra.mrb[0].mxu1 %v13165_v14  ;;  %15406 = vst [vmem:[#allocation71_spill] sm:$0xff] %v13169_v54  ;;  %v4190_v33 = vmul.f32 0.2, %v13096_v27  ;;  %vm4172_vm0 = vcmp.ge.f32.partialorder %v4140_v24, 0.0  ;;  %v4204_v46 = vmul.f32 0.2, %v4140_v24  ;;  %9282 = vmatprep.mubr.f32.mxu0 %v13169_v54  ;;  %v13174_v38 = vsel %vm4171_vm13, %v4139_v63, %v4203_v29 }
 0x3d5   : > { %10367 = vmatpush3.bf16.msra.mxu1 %v12832_v49  ;;  %vm4159_vm15 = vcmp.ge.f32.partialorder %v13098_v45, 0.0  ;;  %v4191_v12 = vmul.f32 0.2, %v13098_v45  ;;  %vm4173_vm10 = vcmp.ge.f32.partialorder %v13118_v28, 0.0  ;;  %9303 = vmatprep.mubr.f32.mxu1 %v13174_v38  ;;  %v4205_v49 = vmul.f32 0.2, %v13118_v28 }
 0x3d6   : > { %10369 = vmatprep.subr.bf16.mxu1 %v10368_v25  ;;  %v13181_v31 = vsel %vm4158_vm12, %v13096_v27, %v4190_v33  ;;  %v13183_v22 = vsel %vm4172_vm0, %v4140_v24, %v4204_v46  ;;  %vm4160_vm8 = vcmp.ge.f32.partialorder %v13100_v26, 0.0  ;;  %v4192_v27 = vmul.f32 0.2, %v13100_v26 }
 0x3d7   : > { %9283 = vmatmul.mubr.f32.gmra.mrb[36].mxu0 %v13181_v31  ;;  %v13195_v34 = vsel %vm4159_vm15, %v13098_v45, %v4191_v12  ;;  %vm4174_vm13 = vcmp.ge.f32.partialorder %v13120_v60, 0.0  ;;  %v4206_v63 = vmul.f32 0.2, %v13120_v60  ;;  %v13205_v24 = vsel %vm4173_vm10, %v13118_v28, %v4205_v49 }
 0x3d8   : > { %9304 = vmatmul.mubr.f32.gmra.mrb[2].mxu1 %v13183_v22  ;;  %9285 = vmatprep.mubr.f32.mxu0 %v13195_v34  ;;  %vm4161_vm12 = vcmp.ge.f32.partialorder %v13102_v18, 0.0  ;;  %v4193_v45 = vmul.f32 0.2, %v13102_v18  ;;  %vm4175_vm0 = vcmp.ge.f32.partialorder %v13122_v40, 0.0  ;;  %v4207_v3 = vmul.f32 0.2, %v13122_v40 }
 0x3d9   : > { %10371 = vmatpush3.bf16.msra.mxu1 %v10368_v25  ;;  %9306 = vmatprep.mubr.f32.mxu1 %v13205_v24  ;;  %v10376_v59 = vpack.c.bf16 %v4542_v47, %v4541_v10  ;;  %v13215_v35 = vsel %vm4160_vm8, %v13100_v26, %v4192_v27  ;;  %v13218_v28 = vsel %vm4174_vm13, %v13120_v60, %v4206_v63  ;;  %v4194_v20 = vmul.f32 0.2, %v13104_v32  ;;  %v4547_v27 = vld [vmem:[%s14700_s3 + $0x60] sm:$0xff] }
 0x3da   : > { %10373 = vmatprep.subr.bf16.mxu1 %v10372_v8  ;;  %v4208_v30 = vmul.f32 0.2, %v13124_v39  ;;  %v13230_v26 = vsel %vm4161_vm12, %v13102_v18, %v4193_v45  ;;  %vm4162_vm15 = vcmp.ge.f32.partialorder %v13104_v32, 0.0  ;;  %vm4176_vm10 = vcmp.ge.f32.partialorder %v13124_v39, 0.0 }
 0x3db   : > { %9286 = vmatmul.mubr.f32.gmra.mrb[38].mxu0 %v13215_v35  ;;  %v4195_v60 = vmul.f32 0.2, %v13106_v44  ;;  %v13240_v48 = vsel %vm4175_vm0, %v13122_v40, %v4207_v3  ;;  %vm4163_vm8 = vcmp.ge.f32.partialorder %v13106_v44, 0.0  ;;  %v4209_v18 = vmul.f32 0.2, %v13126_v11 }
 0x3dc   : > { %9307 = vmatmul.mubr.f32.gmra.mrb[4].mxu1 %v13218_v28  ;;  %9288 = vmatprep.mubr.f32.mxu0 %v13230_v26  ;;  %vm4177_vm13 = vcmp.ge.f32.partialorder %v13126_v11, 0.0  ;;  %v10380_v2 = vpack.c.bf16 %v4544_v37, %v4543_v23  ;;  %v13247_v25 = vsel %vm4162_vm15, %v13104_v32, %v4194_v20  ;;  %v13250_v29 = vsel %vm4176_vm10, %v13124_v39, %v4208_v30  ;;  %v4545_v32 = vld [vmem:[%s14700_s3 + $0x50] sm:$0xff]  ;;  %v4546_v39 = vld [vmem:[%s14700_s3 + $0x58] sm:$0xff] }
 0x3dd   : > { %10375 = vmatpush3.bf16.msra.mxu1 %v10372_v8  ;;  %9309 = vmatprep.mubr.f32.mxu1 %v13240_v48  ;;  %v4196_v40 = vmul.f32 0.2, %v13108_v15  ;;  %v4210_v33 = vmul.f32 0.2, %v13128_v57  ;;  %v13256_v8 = vsel %vm4163_vm8, %v13106_v44, %v4195_v60  ;;  %vm4164_vm12 = vcmp.ge.f32.partialorder %v13108_v15, 0.0  ;;  %v4550_v60 = vld [vmem:[%s14700_s3 + $0x78] sm:$0xff] }
 0x3de   : > { %10377 = vmatprep.subr.bf16.mxu1 %v10376_v59  ;;  %vm4178_vm0 = vcmp.ge.f32.partialorder %v13128_v57, 0.0  ;;  %v4197_v46 = vmul.f32 0.2, %v13110_v5  ;;  %v13272_v44 = vsel %vm4177_vm13, %v13126_v11, %v4209_v18  ;;  %vm4165_vm15 = vcmp.ge.f32.partialorder %v13110_v5, 0.0 }
 0x3df   : > { %9289 = vmatmul.mubr.f32.gmra.mrb[40].mxu0 %v13247_v25  ;;  %v4211_v12 = vmul.f32 0.2, %v13130_v17  ;;  %vm4179_vm10 = vcmp.ge.f32.partialorder %v13130_v17, 0.0  ;;  %v13279_v49 = vsel %vm4164_vm12, %v13108_v15, %v4196_v40  ;;  %v13282_v10 = vsel %vm4178_vm0, %v13128_v57, %v4210_v33  ;;  %v4548_v57 = vld [vmem:[%s14700_s3 + $0x68] sm:$0xff]  ;;  %v5017_v33 = vld [vmem:[%s14700_s3 + $0x100] sm:$0xff] }
 0x3e0   : > { %9310 = vmatmul.mubr.f32.gmra.mrb[6].mxu1 %v13250_v29  ;;  %9291 = vmatprep.mubr.f32.mxu0 %v13256_v8  ;;  %v10384_v47 = vpack.c.bf16 %v4546_v39, %v4545_v32  ;;  %v4198_v11 = vmul.f32 0.2, %v13112_v62  ;;  %v13290_v63 = vsel %vm4165_vm15, %v13110_v5, %v4197_v46  ;;  %vm4166_vm8 = vcmp.ge.f32.partialorder %v13112_v62, 0.0  ;;  %v5018_v46 = vld [vmem:[%s14700_s3 + $0x108] sm:$0xff]  ;;  %v5019_v39 = vld [vmem:[%s14700_s3 + $0x110] sm:$0xff] }
 0x3e1   : > { %10379 = vmatpush3.bf16.msra.mxu1 %v10376_v59  ;;  %9312 = vmatprep.mubr.f32.mxu1 %v13272_v44  ;;  %v4212_v15 = vmul.f32 0.2, %v13132_v36  ;;  %v4199_v45 = vmul.f32 0.2, %v13114_v7  ;;  %v13301_v3 = vsel %vm4179_vm10, %v13130_v17, %v4211_v12  ;;  %vm4180_vm13 = vcmp.ge.f32.partialorder %v13132_v36, 0.0  ;;  %v5020_v12 = vld [vmem:[%s14700_s3 + $0x118] sm:$0xff] }
 0x3e2   : > { %10381 = vmatprep.subr.bf16.mxu1 %v10380_v2  ;;  %vm4167_vm12 = vcmp.ge.f32.partialorder %v13114_v7, 0.0  ;;  %v4213_v5 = vmul.f32 0.2, %v13134_v9  ;;  %vm4181_vm0 = vcmp.ge.f32.partialorder %v13134_v9, 0.0  ;;  %v13309_v59 = vsel %vm4166_vm8, %v13112_v62, %v4198_v11  ;;  %v4549_v62 = vld [vmem:[%s14700_s3 + $0x70] sm:$0xff] }
 0x3e3   : > { %9292 = vmatmul.mubr.f32.gmra.mrb[42].mxu0 %v13279_v49  ;;  %v10388_v20 = vpack.c.bf16 %v4548_v57, %v4547_v27  ;;  %v4200_v30 = vmul.f32 0.2, %v13116_v21  ;;  %v13314_v17 = vsel %vm4180_vm13, %v13132_v36, %v4212_v15  ;;  %v13317_v23 = vsel %vm4167_vm12, %v13114_v7, %v4199_v45  ;;  %v5021_v27 = vld [vmem:[%s14700_s3 + $0x120] sm:$0xff]  ;;  %v5022_v15 = vld [vmem:[%s14700_s3 + $0x128] sm:$0xff] }
 0x3e4   : > { %9313 = vmatmul.mubr.f32.gmra.mrb[8].mxu1 %v13282_v10  ;;  %9294 = vmatprep.mubr.f32.mxu0 %v13290_v63  ;;  %vm4168_vm15 = vcmp.ge.f32.partialorder %v13116_v21, 0.0  ;;  %v4214_v37 = vmul.f32 0.2, %v13136_v56  ;;  %v13330_v36 = vsel %vm4181_vm0, %v13134_v9, %v4213_v5  ;;  %vm4182_vm10 = vcmp.ge.f32.partialorder %v13136_v56, 0.0  ;;  %v15412_v5 = vld [vmem:[#allocation13_spill] sm:$0xff] }
 0x3e5   : > { %10383 = vmatpush3.bf16.msra.mxu1 %v10380_v2  ;;  %9315 = vmatprep.mubr.f32.mxu1 %v13301_v3  ;;  %v4215_v7 = vmul.f32 0.2, %v13141_v19  ;;  %vm4183_vm8 = vcmp.ge.f32.partialorder %v13141_v19, 0.0  ;;  %v13337_v18 = vsel %vm4168_vm15, %v13116_v21, %v4200_v30  ;;  %v10392_v2 = vpack.c.bf16 %v4550_v60, %v4549_v62  ;;  %v5023_v62 = vld [vmem:[%s14700_s3 + $0x130] sm:$0xff]  ;;  %v5024_v60 = vld [vmem:[%s14700_s3 + $0x138] sm:$0xff] }
 0x3e6   : > { %10385 = vmatprep.subr.bf16.mxu1 %v10384_v47  ;;  %v13341_v40 = vsel %vm4182_vm10, %v13136_v56, %v4214_v37  ;;  %v4216_v9 = vmul.f32 0.2, %v13143_v6  ;;  %vm4184_vm13 = vcmp.ge.f32.partialorder %v13143_v6, 0.0  ;;  %v10396_v56 = vpack.c.bf16 %v5018_v46, %v5017_v33 }
 0x3e7   : > { %9295 = vmatmul.mubr.f32.gmra.mrb[44].mxu0 %v13309_v59  ;;  %v13352_v21 = vsel %vm4183_vm8, %v13141_v19, %v4215_v7  ;;  %v4429_v19 = vrot.slane %v13156_v42, 7  ;;  %v4430_v11 = vrot.slane %v13162_v53, 7  ;;  %vm15411_vm0 = vcmp.lt.s32.totalorder %v11770_v51, 1 }
 0x3e8   : > { %9316 = vmatmul.mubr.f32.gmra.mrb[10].mxu1 %v13314_v17  ;;  %9297 = vmatprep.mubr.f32.mxu0 %v13317_v23  ;;  %15407 = vst [vmem:[#allocation73_spill] sm:$0xff] %v13352_v21  ;;  %v13357_v32 = vsel %vm4184_vm13, %v13143_v6, %v4216_v9  ;;  %v10400_v6 = vpack.c.bf16 %v5020_v12, %v5019_v39  ;;  %v4431_v57 = vrot.slane %v13169_v54, 7  ;;  %vm15413_vm15 = vnez %v15412_v5  ;;  %vm15414_vm10 = vmmov %vm15411_vm0  ;;  %v5026_v39 = vld [vmem:[%s14700_s3 + $0x148] sm:$0xff]  ;;  %v5570_v5 = vld [vmem:[%s14700_s3 + $0x238] sm:$0xff] }
 0x3e9   : > { %10387 = vmatpush3.bf16.msra.mxu1 %v10384_v47  ;;  %9318 = vmatprep.mubr.f32.mxu1 %v13330_v36  ;;  %15408 = vst [vmem:[#allocation75_spill] sm:$0xff] %v13357_v32  ;;  %v15409_v47 = vld [vmem:[#allocation12_spill] sm:$0xff]  ;;  %v13381_v45 = vsel %vm15411_vm0, %v15350_v58, %v4429_v19  ;;  %v13389_v30 = vsel %vm15414_vm10, %v4429_v19, %v4430_v11  ;;  %v4432_v37 = vrot.slane %v13181_v31, 7  ;;  %vm15415_vm8 = vmmov %vm15411_vm0  ;;  %v4434_v46 = vrot.slane %v13215_v35, 7 }
 0x3ea   : > { %10389 = vmatprep.subr.bf16.mxu1 %v10388_v20  ;;  %vm15410_vm12 = vnez %v15409_v47  ;;  %v13401_v7 = vsel %vm15415_vm8, %v4430_v11, %v4431_v57  ;;  %v10408_v9 = vpack.c.bf16 %v5024_v60, %v5023_v62  ;;  %vm15416_vm13 = vmmov %vm15411_vm0  ;;  %v4435_v19 = vrot.slane %v13230_v26, 7 }
 0x3eb   : > { %9298 = vmatmul.mubr.f32.gmra.mrb[46].mxu0 %v13337_v18  ;;  %v13409_v33 = vsel %vm15416_vm13, %v4431_v57, %v4432_v37  ;;  %v4436_v11 = vrot.slane %v13247_v25, 7  ;;  %vm15418_vm10 = vmmov %vm15411_vm0  ;;  %v4438_v60 = vrot.slane %v13279_v49, 7  ;;  %v4445_v43 = vrot.slane %v13174_v38, 7 }
 0x3ec   : > { %9319 = vmatmul.mubr.f32.gmra.mrb[12].mxu1 %v13341_v40  ;;  %v13441_v57 = vsel %vm15418_vm10, %v4434_v46, %v4435_v19  ;;  %vm15419_vm8 = vmmov %vm15411_vm0 }
 0x3ed   : > { %10391 = vmatpush3.bf16.msra.mxu1 %v10388_v20  ;;  %9321 = vmatprep.mubr.f32.mxu1 %v13352_v21  ;;  %v10404_v20 = vpack.c.bf16 %v5022_v15, %v5021_v27  ;;  %v5027_v27 = vld [vmem:[%s14700_s3 + $0x150] sm:$0xff]  ;;  %v5028_v15 = vld [vmem:[%s14700_s3 + $0x158] sm:$0xff]  ;;  %v13449_v62 = vsel %vm15419_vm8, %v4435_v19, %v4436_v11  ;;  %vm15420_vm13 = vmmov %vm15411_vm0 }
 0x3ee   : > { %10393 = vmatprep.subr.bf16.mxu1 %v10392_v2  ;;  %vm15422_vm10 = vmmov %vm15411_vm0 }
 0x3ef   : > { %vm15424_vm8 = vmmov %vm15411_vm0 }
 0x3f0   : > { %9322 = vmatmul.mubr.f32.gmra.mrb[14].mxu1 %v13357_v32 }
 0x3f1   : > { %10395 = vmatpush3.bf16.msra.mxu1 %v10392_v2  ;;  %9356 = vmatprep.mubr.msk.f32.mxu1 %vm15410_vm12, %v15350_v58  ;;  %v4433_v2 = vrot.slane %v13195_v34, 7  ;;  %vm15417_vm12 = vmmov %vm15411_vm0 }
 0x3f2   : > { %10397 = vmatprep.subr.bf16.mxu1 %v10396_v56 }
 0x3f3   : > { %v13421_v12 = vsel %vm15417_vm12, %v4432_v37, %v4433_v2  ;;  %v10416_v37 = vpack.c.bf16 %v5028_v15, %v5027_v27  ;;  %vm15421_vm12 = vmmov %vm15411_vm0  ;;  %v4440_v27 = vrot.slane %v13309_v59, 7  ;;  %v5032_v15 = vld [vmem:[%s14700_s3 + $0x178] sm:$0xff] }
 0x3f4   : > { %9357 = vmatmul.mubr.f32.vlgmr.msra.gmra.mrb[16].mxu1 %v15350_v58  ;;  %v4442_v58 = vrot.slane %v13337_v18, 7 }
 0x3f5   : > { %10399 = vmatpush3.bf16.msra.mxu1 %v10396_v56  ;;  %9359 = vmatprep.mubr.msk.f32.mxu1 %vm15413_vm15, %v13381_v45  ;;  %v5025_v56 = vld [vmem:[%s14700_s3 + $0x140] sm:$0xff] }
 0x3f6   : > { %10401 = vmatprep.subr.bf16.mxu1 %v10400_v6  ;;  %v10412_v47 = vpack.c.bf16 %v5026_v39, %v5025_v56  ;;  %v4439_v56 = vrot.slane %v13290_v63, 7 }
 0x3f8   : > { %9360 = vmatmul.mubr.f32.gmra.mrb[18].mxu1 %v13389_v30 }
 0x3f9   : > { %9362 = vmatprep.mubr.msk.f32.mxu1 %vm11819_vm1, %v13401_v7  ;;  %10403 = vmatpush3.bf16.msra.mxu1 %v10400_v6  ;;  %v13429_v6 = vsel %vm15411_vm0, %v4433_v2, %v4434_v46  ;;  %v5029_v2 = vld [vmem:[%s14700_s3 + $0x160] sm:$0xff]  ;;  %v5030_v46 = vld [vmem:[%s14700_s3 + $0x168] sm:$0xff] }
 0x3fa   : > { %10405 = vmatprep.subr.bf16.mxu1 %v10404_v20  ;;  %v10420_v39 = vpack.c.bf16 %v5030_v46, %v5029_v2  ;;  %v4441_v2 = vrot.slane %v13317_v23, 7  ;;  %v13489_v46 = vsel %vm15422_vm10, %v4439_v56, %v4440_v27  ;;  %vm15430_vm10 = vmmov %vm15411_vm0 }
 0x3fb   : > { %15423 = vst [vmem:[#allocation77_spill] sm:$0xff] %v13489_v46 }
 0x3fc   : > { %9363 = vmatmul.mubr.f32.gmra.mrb[20].mxu1 %v13409_v33 }
 0x3fd   : > { %9365 = vmatprep.mubr.msk.f32.mxu1 %vm11838_vm2, %v13421_v12  ;;  %10407 = vmatpush3.bf16.msra.mxu1 %v10404_v20  ;;  %v4437_v20 = vrot.slane %v13256_v8, 7 }
 0x3fe   : > { %10409 = vmatprep.subr.bf16.mxu1 %v10408_v9 }
 0x3ff   : > { %v13469_v19 = vsel %vm15421_vm12, %v4437_v20, %v4438_v60  ;;  %vm15428_vm12 = vmmov %vm15411_vm0 }
 0x400   : > { %9366 = vmatmul.mubr.f32.gmra.mrb[22].mxu1 %v13429_v6 }
 0x401   : > { %9368 = vmatprep.mubr.msk.f32.mxu1 %vm11859_vm3, %v13441_v57  ;;  %10411 = vmatpush3.bf16.msra.mxu1 %v10408_v9  ;;  %v13461_v9 = vsel %vm15420_vm13, %v4436_v11, %v4437_v20  ;;  %v5031_v11 = vld [vmem:[%s14700_s3 + $0x170] sm:$0xff]  ;;  %vm15426_vm13 = vmmov %vm15411_vm0 }
 0x402   : > { %10413 = vmatprep.subr.bf16.mxu1 %v10412_v47  ;;  %v10424_v20 = vpack.c.bf16 %v5032_v15, %v5031_v11  ;;  %v4443_v11 = vrot.slane %v13158_v4, 7  ;;  %v13511_v15 = vsel %vm15426_vm13, %v4441_v2, %v4442_v58  ;;  %vm15433_vm13 = vmmov %vm15411_vm0 }
 0x403   : > { %15427 = vst [vmem:[#allocation81_spill] sm:$0xff] %v13511_v15 }
 0x404   : > { %9369 = vmatmul.mubr.f32.gmra.mrb[24].mxu1 %v13449_v62 }
 0x405   : > { %9371 = vmatprep.mubr.msk.f32.mxu1 %vm11876_vm4, %v13461_v9  ;;  %10415 = vmatpush3.bf16.msra.mxu1 %v10412_v47  ;;  %v13481_v47 = vsel %vm15411_vm0, %v4438_v60, %v4439_v56  ;;  %v5290_v60 = vld [vmem:[%s14700_s3 + $0x180] sm:$0xff] }
 0x406   : > { %10417 = vmatprep.subr.bf16.mxu1 %v10416_v37  ;;  %v13507_v56 = vpack.c.bf16 %v5291_v13, %v5290_v60  ;;  %v4448_v60 = vrot.slane %v13218_v28, 7 }
 0x408   : > { %9372 = vmatmul.mubr.f32.gmra.mrb[26].mxu1 %v13469_v19 }
 0x409   : > { %9374 = vmatprep.mubr.msk.f32.mxu1 %vm11895_vm5, %v13481_v47  ;;  %10419 = vmatpush3.bf16.msra.mxu1 %v10416_v37  ;;  %v13501_v37 = vsel %vm15424_vm8, %v4440_v27, %v4441_v2  ;;  %v13517_v27 = vsel %vm15428_vm12, %v4442_v58, %v4443_v11  ;;  %v4447_v2 = vrot.slane %v13205_v24, 7  ;;  %vm15432_vm8 = vnez %v15319_v0  ;;  %vm15435_vm12 = vmmov %vm15411_vm0 }
 0x40a   : > { %10421 = vmatprep.subr.bf16.mxu1 %v10420_v39  ;;  %15425 = vst [vmem:[#allocation79_spill] sm:$0xff] %v13501_v37 }
 0x40b   : > { %v13554_v0 = vsel %vm15430_vm10, %v4447_v2, %v4448_v60 }
 0x40c   : > { %9375 = vmatmul.mubr.f32.gmra.mrb[28].mxu1 %v13489_v46  ;;  %v4444_v46 = vrot.slane %v13165_v14, 7  ;;  %15439 = vst [vmem:[#allocation21_spill] sm:$0xff] %v13554_v0 }
 0x40d   : > { %9377 = vmatprep.mubr.msk.f32.mxu1 %vm11916_vm6, %v13501_v37  ;;  %10423 = vmatpush3.bf16.msra.mxu1 %v10420_v39  ;;  %v4446_v39 = vrot.slane %v13183_v22, 7 }
 0x40e   : > { %10425 = vmatprep.subr.bf16.mxu1 %v10424_v20  ;;  %v13526_v13 = vsel %vm15411_vm0, %v4443_v11, %v4444_v46  ;;  %v13532_v58 = vsel %vm15430_vm10, %v4444_v46, %v4445_v43  ;;  %v4449_v46 = vrot.slane %v13240_v48, 7 }
 0x40f   : > { %15429 = vst [vmem:[#allocation15_spill] sm:$0xff] %v13526_v13  ;;  %15431 = vst [vmem:[#allocation14_spill] sm:$0xff] %v13532_v58  ;;  %v13546_v11 = vsel %vm15435_vm12, %v4446_v39, %v4447_v2  ;;  %v4452_v2 = vrot.slane %v13282_v10, 7 }
 0x410   : > { %9378 = vmatmul.mubr.f32.gmra.mrb[30].mxu1 %v13511_v15  ;;  %15436 = vst [vmem:[#allocation16_spill] sm:$0xff] %v13546_v11 }
 0x411   : > { %9380 = vmatprep.mubr.msk.f32.mxu1 %vm11933_vm7, %v13517_v27  ;;  %10427 = vmatpush3.bf16.msra.mxu1 %v10424_v20  ;;  %v13540_v20 = vsel %vm15433_vm13, %v4445_v43, %v4446_v39  ;;  %v4450_v43 = vrot.slane %v13250_v29, 7  ;;  %vm15440_vm13 = vmmov %vm15430_vm10  ;;  %v4451_v39 = vrot.slane %v13272_v44, 7 }
 0x412   : > { %10429 = vmatprep.subr.bf16.mxu1 %v13507_v56  ;;  %15434 = vst [vmem:[#allocation17_spill] sm:$0xff] %v13540_v20 }
 0x414   : > { %9381 = vmatmul.mubr.f32.gmra.mrb[0].mxu1 %v13526_v13  ;;  %v15437_v13 = vld [vmem:[#allocation31_spill] sm:$0xff] }
 0x415   : > { %9383 = vmatprep.mubr.msk.f32.mxu1 %vm15432_vm8, %v13532_v58  ;;  %vm15438_vm0 = vnez %v15437_v13  ;;  %v15442_v58 = vld [vmem:[#allocation34_spill] sm:$0xff] }
 0x416   : > { %vm15443_vm12 = vnez %v15442_v58 }
 0x418   : > { %9384 = vmatmul.mubr.f32.gmra.mrb[2].mxu1 %v13540_v20  ;;  %v13560_v20 = vsel %vm15440_vm13, %v4448_v60, %v4449_v46  ;;  %v4453_v60 = vrot.slane %v13301_v3, 7 }
 0x419   : > { %9386 = vmatprep.mubr.msk.f32.mxu1 %vm15438_vm0, %v13546_v11  ;;  %15441 = vst [vmem:[#allocation24_spill] sm:$0xff] %v13560_v20  ;;  %vm15444_vm0 = vmmov %vm15430_vm10  ;;  %v15448_v11 = vld [vmem:[#allocation37_spill] sm:$0xff] }
 0x41a   : > { %v13568_v13 = vsel %vm15444_vm0, %v4449_v46, %v4450_v43  ;;  %vm15446_vm10 = vmmov %vm15444_vm0  ;;  %vm15449_vm13 = vnez %v15448_v11  ;;  %v4454_v46 = vrot.slane %v13314_v17, 7 }
 0x41b   : > { %15445 = vst [vmem:[#allocation27_spill] sm:$0xff] %v13568_v13 }
 0x41c   : > { %9387 = vmatmul.mubr.f32.gmra.mrb[4].mxu1 %v13554_v0  ;;  %v13574_v0 = vsel %vm15446_vm10, %v4450_v43, %v4451_v39  ;;  %v4455_v43 = vrot.slane %v13330_v36, 7  ;;  %vm15455_vm10 = vnez %v15454_v41  ;;  %v4321_v41 = vrot.slane %v13156_v42, 1 }
 0x41d   : > { %9389 = vmatprep.mubr.msk.f32.mxu1 %vm15443_vm12, %v13560_v20  ;;  %15447 = vst [vmem:[#allocation29_spill] sm:$0xff] %v13574_v0  ;;  %vm15450_vm12 = vmmov %vm15444_vm0  ;;  %v13591_v20 = vpop.f32.mrb[32].mxu0 }
 0x41e   : > { %v13582_v58 = vsel %vm15450_vm12, %v4451_v39, %v4452_v2  ;;  %15453 = vst [vmem:[#allocation33_spill] sm:$0xff] %v13591_v20  ;;  %v13596_v11 = vpop.f32.mrb[33].mxu0  ;;  %vm15457_vm12 = vmmov %vm15444_vm0  ;;  %v4457_v20 = vrot.slane %v13352_v21, 7 }
 0x41f   : > { %15451 = vst [vmem:[#allocation30_spill] sm:$0xff] %v13582_v58  ;;  %15456 = vst [vmem:[#allocation35_spill] sm:$0xff] %v13596_v11  ;;  %v13600_v39 = vsel %vm15457_vm12, %v4453_v60, %v4454_v46 }
 0x420   : > { %9390 = vmatmul.mubr.f32.gmra.mrb[6].mxu1 %v13568_v13  ;;  %v13588_v13 = vsel %vm15444_vm0, %v4452_v2, %v4453_v60  ;;  %15458 = vst [vmem:[#allocation36_spill] sm:$0xff] %v13600_v39  ;;  %v13606_v2 = vsel %vm15444_vm0, %v4454_v46, %v4455_v43  ;;  %v14973_v60 = vrot.slane %v13357_v32, 7  ;;  %vm15464_vm12 = vmmov %vm15444_vm0  ;;  %v15466_v46 = vld [vmem:[#allocation46_spill] sm:$0xff] }
 0x421   : > { %9392 = vmatprep.mubr.msk.f32.mxu1 %vm15449_vm13, %v13574_v0  ;;  %15452 = vst [vmem:[#allocation32_spill] sm:$0xff] %v13588_v13  ;;  %15459 = vst [vmem:[#allocation38_spill] sm:$0xff] %v13606_v2  ;;  %v15460_v0 = vld [vmem:[#allocation43_spill] sm:$0xff] }
 0x422   : > { %vm15461_vm13 = vnez %v15460_v0  ;;  %v5294_v0 = vld [vmem:[%s14700_s3 + $0x1a0] sm:$0xff] }
 0x424   : > { %9393 = vmatmul.mubr.f32.gmra.mrb[8].mxu1 %v13582_v58  ;;  %v4456_v58 = vrot.slane %v13341_v40, 7 }
 0x425   : > { %9395 = vmatprep.mubr.msk.f32.mxu1 %vm15455_vm10, %v13588_v13  ;;  %vm15462_vm10 = vmmov %vm15444_vm0  ;;  %vm15467_vm0 = vnez %v15466_v46  ;;  %v4322_v46 = vrot.slane %v13162_v53, 1  ;;  %v4325_v53 = vrot.slane %v13195_v34, 1 }
 0x426   : > { %v13614_v11 = vsel %vm15462_vm10, %v4455_v43, %v4456_v58 }
 0x427   : > { %15463 = vst [vmem:[#allocation39_spill] sm:$0xff] %v13614_v11 }
 0x428   : > { %9396 = vmatmul.mubr.f32.gmra.mrb[10].mxu1 %v13600_v39  ;;  %v13620_v39 = vsel %vm15464_vm12, %v4456_v58, %v4457_v20  ;;  %v5293_v58 = vld [vmem:[%s14700_s3 + $0x198] sm:$0xff] }
 0x429   : > { %9398 = vmatprep.mubr.msk.f32.mxu1 %vm15461_vm13, %v13606_v2  ;;  %15465 = vst [vmem:[#allocation41_spill] sm:$0xff] %v13620_v39  ;;  %vm15468_vm13 = vmmov %vm15462_vm10  ;;  %vm15471_vm10 = vcmp.lt.s32.totalorder %v11770_v51, 7  ;;  %v5295_v2 = vld [vmem:[%s14700_s3 + $0x1a8] sm:$0xff] }
 0x42a   : > { %v13630_v43 = vsel %vm15468_vm13, %v4457_v20, %v14973_v60  ;;  %v4323_v60 = vrot.slane %v13169_v54, 1  ;;  %vm15474_vm12 = vmmov %vm15471_vm10 }
 0x42b   : > { %15469 = vst [vmem:[#allocation42_spill] sm:$0xff] %v13630_v43 }
 0x42c   : > { %9399 = vmatmul.mubr.f32.gmra.mrb[12].mxu1 %v13614_v11  ;;  %v5292_v11 = vld [vmem:[%s14700_s3 + $0x190] sm:$0xff]  ;;  %v13662_v54 = vsel %vm15471_vm10, %v4322_v46, %v4323_v60 }
 0x42d   : > { %9401 = vmatprep.mubr.msk.f32.mxu1 %vm15467_vm0, %v13620_v39  ;;  %v15470_v39 = vld [vmem:[#allocation49_spill] sm:$0xff]  ;;  %v10432_v42 = vpack.c.bf16 %v5293_v58, %v5292_v11  ;;  %v13655_v11 = vsel %vm15474_vm12, %v4321_v41, %v4322_v46  ;;  %v4324_v58 = vrot.slane %v13181_v31, 1  ;;  %15476 = vst [vmem:[#allocation45_spill] sm:$0xff] %v13662_v54  ;;  %vm15479_vm12 = vmmov %vm15471_vm10 }
 0x42e   : > { %v4388_v20 = vsel %vm15471_vm10, %v15470_v39, %v4321_v41  ;;  %15475 = vst [vmem:[#allocation44_spill] sm:$0xff] %v13655_v11  ;;  %v5297_v41 = vld [vmem:[%s14700_s3 + $0x1b8] sm:$0xff] }
 0x430   : > { %9402 = vmatmul.mubr.f32.gmra.mrb[14].mxu1 %v13630_v43  ;;  %v15472_v43 = vld [vmem:[#allocation50_spill] sm:$0xff] }
 0x431   : > { %9436 = vmatprep.mubr.f32.mxu1 %v15470_v39  ;;  %vm15473_vm13 = vnez %v15472_v43  ;;  %v10436_v39 = vpack.c.bf16 %v5295_v2, %v5294_v0  ;;  %v5296_v43 = vld [vmem:[%s14700_s3 + $0x1b0] sm:$0xff]  ;;  %v13676_v0 = vsel %vm15479_vm12, %v4323_v60, %v4324_v58  ;;  %v4326_v2 = vrot.slane %v13215_v35, 1  ;;  %v5299_v60 = vld [vmem:[%s14700_s3 + $0x1c8] sm:$0xff] }
 0x432   : > { %15480 = vst [vmem:[#allocation47_spill] sm:$0xff] %v13676_v0  ;;  %v10440_v46 = vpack.c.bf16 %v5297_v41, %v5296_v43 }
 0x434   : > { %9437 = vmatmul.mubr.msk.f32.vlgmr.msra.gmra.mrb[16].mxu1 %vm15473_vm13, %v4388_v20  ;;  %v13682_v20 = vsel %vm15471_vm10, %v4324_v58, %v4325_v53  ;;  %v4328_v58 = vrot.slane %v13247_v25, 1 }
 0x435   : > { %10431 = vmatpush3.bf16.msra.mxu1 %v13507_v56  ;;  %9439 = vmatprep.mubr.f32.mxu1 %v13655_v11  ;;  %v15477_v56 = vld [vmem:[#allocation52_spill] sm:$0xff]  ;;  %15481 = vst [vmem:[#allocation48_spill] sm:$0xff] %v13682_v20  ;;  %v4327_v11 = vrot.slane %v13230_v26, 1 }
 0x436   : > { %10433 = vmatprep.subr.bf16.mxu1 %v10432_v42  ;;  %vm15478_vm13 = vnez %v15477_v56  ;;  %v5298_v56 = vld [vmem:[%s14700_s3 + $0x1c0] sm:$0xff] }
 0x437   : > { %v10444_v43 = vpack.c.bf16 %v5299_v60, %v5298_v56  ;;  %v13702_v41 = vsel %vm15471_vm10, %v4326_v2, %v4327_v11  ;;  %v4330_v56 = vrot.slane %v13279_v49, 1 }
 0x438   : > { %9440 = vmatmul.mubr.msk.f32.gmra.mrb[18].mxu1 %vm15478_vm13, %v13662_v54  ;;  %v15482_v54 = vld [vmem:[#allocation56_spill] sm:$0xff]  ;;  %vm15484_vm13 = vmmov %vm15471_vm10  ;;  %15486 = vst [vmem:[#allocation8_spill] sm:$0xff] %v13702_v41 }
 0x439   : > { %9442 = vmatprep.mubr.f32.mxu1 %v13676_v0  ;;  %10435 = vmatpush3.bf16.msra.mxu1 %v10432_v42  ;;  %vm15483_vm12 = vnez %v15482_v54  ;;  %v13696_v42 = vsel %vm15484_vm13, %v4325_v53, %v4326_v2  ;;  %v4329_v0 = vrot.slane %v13256_v8, 1  ;;  %v5300_v54 = vld [vmem:[%s14700_s3 + $0x1d0] sm:$0xff]  ;;  %v5301_v53 = vld [vmem:[%s14700_s3 + $0x1d8] sm:$0xff] }
 0x43a   : > { %10437 = vmatprep.subr.bf16.mxu1 %v10436_v39  ;;  %15485 = vst [vmem:[#allocation20_spill] sm:$0xff] %v13696_v42  ;;  %v10448_v2 = vpack.c.bf16 %v5301_v53, %v5300_v54 }
 0x43b   : > { %v13722_v60 = vsel %vm15471_vm10, %v4328_v58, %v4329_v0 }
 0x43c   : > { %9443 = vmatmul.mubr.msk.f32.gmra.mrb[20].mxu1 %vm15483_vm12, %v13682_v20  ;;  %v15487_v20 = vld [vmem:[#allocation58_spill] sm:$0xff]  ;;  %vm15489_vm12 = vmmov %vm15471_vm10  ;;  %15491 = vst [vmem:[#allocation10_spill] sm:$0xff] %v13722_v60 }
 0x43d   : > { %9445 = vmatprep.mubr.f32.mxu1 %v13696_v42  ;;  %10439 = vmatpush3.bf16.msra.mxu1 %v10436_v39  ;;  %vm15488_vm13 = vnez %v15487_v20  ;;  %v13716_v39 = vsel %vm15489_vm12, %v4327_v11, %v4328_v58  ;;  %v4331_v42 = vrot.slane %v13290_v63, 1  ;;  %v5302_v20 = vld [vmem:[%s14700_s3 + $0x1e0] sm:$0xff]  ;;  %v5303_v11 = vld [vmem:[%s14700_s3 + $0x1e8] sm:$0xff] }
 0x43e   : > { %10441 = vmatprep.subr.bf16.mxu1 %v10440_v46  ;;  %15490 = vst [vmem:[#allocation9_spill] sm:$0xff] %v13716_v39  ;;  %v10452_v58 = vpack.c.bf16 %v5303_v11, %v5302_v20 }
 0x43f   : > { %v13742_v53 = vsel %vm15471_vm10, %v4330_v56, %v4331_v42 }
 0x440   : > { %9446 = vmatmul.mubr.msk.f32.gmra.mrb[22].mxu1 %vm15488_vm13, %v13702_v41  ;;  %v15492_v41 = vld [vmem:[#allocation61_spill] sm:$0xff]  ;;  %vm15494_vm13 = vmmov %vm15471_vm10  ;;  %15496 = vst [vmem:[#allocation55_spill] sm:$0xff] %v13742_v53 }
 0x441   : > { %9448 = vmatprep.mubr.f32.mxu1 %v13716_v39  ;;  %10443 = vmatpush3.bf16.msra.mxu1 %v10440_v46  ;;  %vm15493_vm12 = vnez %v15492_v41  ;;  %v13736_v54 = vsel %vm15494_vm13, %v4329_v0, %v4330_v56  ;;  %v4332_v46 = vrot.slane %v13309_v59, 1  ;;  %v4333_v39 = vrot.slane %v13317_v23, 1  ;;  %v5304_v41 = vld [vmem:[%s14700_s3 + $0x1f0] sm:$0xff]  ;;  %v5305_v0 = vld [vmem:[%s14700_s3 + $0x1f8] sm:$0xff]  ;;  %vm15498_vm13 = vmmov %vm15471_vm10 }
 0x442   : > { %10445 = vmatprep.subr.bf16.mxu1 %v10444_v43  ;;  %15495 = vst [vmem:[#allocation54_spill] sm:$0xff] %v13736_v54  ;;  %v10456_v56 = vpack.c.bf16 %v5305_v0, %v5304_v41 }
 0x443   : > { %v13756_v20 = vsel %vm15498_vm13, %v4331_v42, %v4332_v46  ;;  %v13762_v11 = vsel %vm15471_vm10, %v4332_v46, %v4333_v39  ;;  %v5564_v42 = vld [vmem:[%s14700_s3 + $0x208] sm:$0xff]  ;;  %vm15502_vm13 = vmmov %vm15471_vm10 }
 0x444   : > { %9449 = vmatmul.mubr.msk.f32.gmra.mrb[24].mxu1 %vm15493_vm12, %v13722_v60  ;;  %15499 = vst [vmem:[#allocation57_spill] sm:$0xff] %v13756_v20  ;;  %15500 = vst [vmem:[#allocation59_spill] sm:$0xff] %v13762_v11  ;;  %v5563_v60 = vld [vmem:[%s14700_s3 + $0x200] sm:$0xff] }
 0x445   : > { %9451 = vmatprep.mubr.f32.mxu1 %v13736_v54  ;;  %10447 = vmatpush3.bf16.msra.mxu1 %v10444_v43  ;;  %v4334_v43 = vrot.slane %v13337_v18, 1  ;;  %v4335_v54 = vrot.slane %v13158_v4, 1  ;;  %v10460_v46 = vpack.c.bf16 %v5564_v42, %v5563_v60  ;;  %v4340_v42 = vrot.slane %v13218_v28, 1 }
 0x446   : > { %10449 = vmatprep.subr.bf16.mxu1 %v10448_v2 }
 0x447   : > { %v13776_v41 = vsel %vm15502_vm13, %v4333_v39, %v4334_v43  ;;  %v13782_v0 = vsel %vm15471_vm10, %v4334_v43, %v4335_v54  ;;  %vm15506_vm13 = vmmov %vm15471_vm10  ;;  %v15510_v43 = vld [vmem:[#allocation72_spill] sm:$0xff] }
 0x448   : > { %9452 = vmatmul.mubr.msk.f32.gmra.mrb[26].mxu1 %vm15371_vm14, %v13742_v53  ;;  %15503 = vst [vmem:[#allocation60_spill] sm:$0xff] %v13776_v41  ;;  %15504 = vst [vmem:[#allocation63_spill] sm:$0xff] %v13782_v0  ;;  %v15533_v53 = vld [vmem:[#allocation84_spill] sm:$0xff] }
 0x449   : > { %9454 = vmatprep.mubr.f32.mxu1 %v13756_v20  ;;  %10451 = vmatpush3.bf16.msra.mxu1 %v10448_v2  ;;  %v4336_v2 = vrot.slane %v13165_v14, 1  ;;  %v4337_v20 = vrot.slane %v13174_v38, 1 }
 0x44a   : > { %10453 = vmatprep.subr.bf16.mxu1 %v10452_v58 }
 0x44b   : > { %v13790_v39 = vsel %vm15506_vm13, %v4335_v54, %v4336_v2 }
 0x44c   : > { %9455 = vmatmul.mubr.msk.f32.gmra.mrb[28].mxu1 %vm15374_vm9, %v13762_v11  ;;  %15507 = vst [vmem:[#allocation64_spill] sm:$0xff] %v13790_v39  ;;  %v4338_v11 = vrot.slane %v13183_v22, 1  ;;  %vm15508_vm9 = vmmov %vm15471_vm10  ;;  %vm15511_vm10 = vnez %v15510_v43 }
 0x44d   : > { %9457 = vmatprep.mubr.f32.mxu1 %v13776_v41  ;;  %10455 = vmatpush3.bf16.msra.mxu1 %v10452_v58  ;;  %v13796_v60 = vsel %vm15508_vm9, %v4336_v2, %v4337_v20  ;;  %v4339_v58 = vrot.slane %v13205_v24, 1  ;;  %vm15514_vm13 = vmmov %vm15508_vm9  ;;  %v4341_v2 = vrot.slane %v13240_v48, 1 }
 0x44e   : > { %10457 = vmatprep.subr.bf16.mxu1 %v10456_v56  ;;  %15509 = vst [vmem:[#allocation66_spill] sm:$0xff] %v13796_v60 }
 0x450   : > { %9458 = vmatmul.mubr.msk.f32.gmra.mrb[30].mxu1 %vm15377_vm11, %v13782_v0  ;;  %vm15512_vm11 = vmmov %vm15508_vm9 }
 0x451   : > { %9460 = vmatprep.mubr.f32.mxu1 %v13790_v39  ;;  %10459 = vmatpush3.bf16.msra.mxu1 %v10456_v56  ;;  %v13804_v54 = vsel %vm15512_vm11, %v4337_v20, %v4338_v11  ;;  %v13810_v56 = vsel %vm15514_vm13, %v4338_v11, %v4339_v58  ;;  %v15516_v39 = vld [vmem:[#allocation76_spill] sm:$0xff]  ;;  %v4342_v20 = vrot.slane %v13250_v29, 1  ;;  %v4343_v11 = vrot.slane %v13272_v44, 1 }
 0x452   : > { %10461 = vmatprep.subr.bf16.mxu1 %v10460_v46  ;;  %15513 = vst [vmem:[#allocation69_spill] sm:$0xff] %v13804_v54  ;;  %15515 = vst [vmem:[#allocation74_spill] sm:$0xff] %v13810_v56  ;;  %vm15517_vm9 = vnez %v15516_v39 }
 0x454   : > { %9461 = vmatmul.mubr.msk.f32.gmra.mrb[0].mxu1 %vm15511_vm10, %v13796_v60  ;;  %vm15518_vm10 = vmmov %vm15512_vm11  ;;  %v15522_v60 = vld [vmem:[#allocation78_spill] sm:$0xff] }
 0x455   : > { %9463 = vmatprep.mubr.f32.mxu1 %v13804_v54  ;;  %v13818_v43 = vsel %vm15518_vm10, %v4339_v58, %v4340_v42  ;;  %vm15520_vm11 = vmmov %vm15518_vm10  ;;  %vm15523_vm13 = vnez %v15522_v60  ;;  %v4344_v58 = vrot.slane %v13282_v10, 1 }
 0x456   : > { %15519 = vst [vmem:[#allocation80_spill] sm:$0xff] %v13818_v43  ;;  %v13824_v54 = vsel %vm15520_vm11, %v4340_v42, %v4341_v2  ;;  %v4345_v42 = vrot.slane %v13301_v3, 1 }
 0x457   : > { %15521 = vst [vmem:[#allocation83_spill] sm:$0xff] %v13824_v54 }
 0x458   : > { %9464 = vmatmul.mubr.msk.f32.gmra.mrb[2].mxu1 %vm15517_vm9, %v13810_v56  ;;  %vm15524_vm9 = vmmov %vm15518_vm10  ;;  %v15528_v56 = vld [vmem:[#allocation82_spill] sm:$0xff] }
 0x459   : > { %9466 = vmatprep.mubr.f32.mxu1 %v13818_v43  ;;  %v13832_v39 = vsel %vm15524_vm9, %v4341_v2, %v4342_v20  ;;  %vm15526_vm10 = vmmov %vm15524_vm9  ;;  %vm15529_vm11 = vnez %v15528_v56  ;;  %v4346_v2 = vrot.slane %v13314_v17, 1  ;;  %v4348_v56 = vrot.slane %v13341_v40, 1 }
 0x45a   : > { %15525 = vst [vmem:[#allocation85_spill] sm:$0xff] %v13832_v39  ;;  %v13838_v43 = vsel %vm15526_vm10, %v4342_v20, %v4343_v11  ;;  %v4347_v20 = vrot.slane %v13330_v36, 1  ;;  %vm15534_vm10 = vnez %v15533_v53  ;;  %v15537_v53 = vld [vmem:[#allocation87_spill] sm:$0xff] }
 0x45b   : > { %15527 = vst [vmem:[#allocation86_spill] sm:$0xff] %v13838_v43 }
 0x45c   : > { %9467 = vmatmul.mubr.msk.f32.gmra.mrb[4].mxu1 %vm15523_vm13, %v13824_v54  ;;  %vm15530_vm13 = vmmov %vm15524_vm9  ;;  %v4217_v54 = vmul.f32 0.2, %v13094_v16 }
 0x45d   : > { %9469 = vmatprep.mubr.f32.mxu1 %v13832_v39  ;;  %v13846_v60 = vsel %vm15530_vm13, %v4343_v11, %v4344_v58  ;;  %v13852_v39 = vsel %vm15524_vm9, %v4344_v58, %v4345_v42  ;;  %vm4185_vm13 = vcmp.ge.f32.partialorder %v13094_v16, 0.0  ;;  %v13868_v58 = vsel %vm15524_vm9, %v4346_v2, %v4347_v20 }
 0x45e   : > { %15531 = vst [vmem:[#allocation88_spill] sm:$0xff] %v13846_v60  ;;  %15532 = vst [vmem:[#allocation90_spill] sm:$0xff] %v13852_v39 }
 0x460   : > { %9470 = vmatmul.mubr.msk.f32.gmra.mrb[6].mxu1 %vm15529_vm11, %v13838_v43  ;;  %vm15535_vm11 = vmmov %vm15524_vm9  ;;  %v13872_v43 = vsel %vm4185_vm13, %v13094_v16, %v4217_v54  ;;  %v15542_v16 = vld [vmem:[#allocation89_spill] sm:$0xff] }
 0x461   : > { %9472 = vmatprep.mubr.f32.mxu1 %v13846_v60  ;;  %v13861_v11 = vsel %vm15535_vm11, %v4345_v42, %v4346_v2  ;;  %v4349_v60 = vrot.slane %v13352_v21, 1  ;;  %vm15539_vm11 = vmmov %vm15524_vm9  ;;  %vm15543_vm13 = vnez %v15542_v16  ;;  %v5566_v16 = vld [vmem:[%s14700_s3 + $0x218] sm:$0xff] }
 0x462   : > { %15536 = vst [vmem:[#allocation91_spill] sm:$0xff] %v13861_v11  ;;  %v13879_v42 = vsel %vm15539_vm11, %v4347_v20, %v4348_v56  ;;  %vm15546_vm11 = vmmov %vm15524_vm9 }
 0x463   : > { %15540 = vst [vmem:[#allocation23_spill] sm:$0xff] %v13879_v42  ;;  %v13885_v2 = vsel %vm15524_vm9, %v4348_v56, %v4349_v60  ;;  %v5565_v56 = vld [vmem:[%s14700_s3 + $0x210] sm:$0xff] }
 0x464   : > { %9473 = vmatmul.mubr.msk.f32.gmra.mrb[8].mxu1 %vm15534_vm10, %v13852_v39  ;;  %vm15538_vm10 = vnez %v15537_v53  ;;  %v4350_v39 = vrot.slane %v13357_v32, 1  ;;  %15541 = vst [vmem:[#allocation6_spill] sm:$0xff] %v13885_v2 }
 0x465   : > { %9475 = vmatprep.mubr.f32.mxu1 %v13861_v11  ;;  %v15030_v11 = vrot.slane %v13872_v43, 1 }
 0x467   : > { %v13900_v20 = vsel %vm15546_vm11, %v4350_v39, %v15030_v11  ;;  %v5568_v11 = vld [vmem:[%s14700_s3 + $0x228] sm:$0xff] }
 0x468   : > { %9476 = vmatmul.mubr.msk.f32.gmra.mrb[10].mxu1 %vm15538_vm10, %v13868_v58  ;;  %vm15544_vm10 = vmmov %vm15524_vm9  ;;  %15547 = vst [vmem:[#allocation13_spill] sm:$0xff] %v13900_v20 }
 0x469   : > { %9478 = vmatprep.mubr.f32.mxu1 %v13879_v42  ;;  %v13893_v54 = vsel %vm15544_vm10, %v4349_v60, %v4350_v39  ;;  %v10464_v60 = vpack.c.bf16 %v5566_v16, %v5565_v56  ;;  %v5567_v39 = vld [vmem:[%s14700_s3 + $0x220] sm:$0xff]  ;;  %v5573_v56 = vld [vmem:[%s14700_s3 + $0x250] sm:$0xff] }
 0x46a   : > { %15545 = vst [vmem:[#allocation12_spill] sm:$0xff] %v13893_v54 }
 0x46c   : > { %9479 = vmatmul.mubr.msk.f32.gmra.mrb[12].mxu1 %vm15543_vm13, %v13885_v2  ;;  %v15548_v2 = vld [vmem:[#allocation92_spill] sm:$0xff] }
 0x46d   : > { %9481 = vmatprep.mubr.f32.mxu1 %v13893_v54  ;;  %vm15549_vm10 = vnez %v15548_v2  ;;  %v10468_v2 = vpack.c.bf16 %v5568_v11, %v5567_v39  ;;  %v5572_v11 = vld [vmem:[%s14700_s3 + $0x248] sm:$0xff] }
 0x470   : > { %9482 = vmatmul.mubr.msk.f32.gmra.mrb[14].mxu1 %vm15549_vm10, %v13900_v20 }
 0x471   : > { %9516 = vmatprep.mubr.msk.f32.mxu1 %vm15413_vm15, %v13381_v45  ;;  %v5569_v45 = vld [vmem:[%s14700_s3 + $0x230] sm:$0xff] }
 0x474   : > { %9517 = vmatmul.mubr.f32.vlgmr.msra.gmra.mrb[16].mxu1 %v13389_v30  ;;  %v10472_v30 = vpack.c.bf16 %v5570_v5, %v5569_v45  ;;  %v5576_v45 = vld [vmem:[%s14700_s3 + $0x268] sm:$0xff] }
 0x475   : > { %10463 = vmatpush3.bf16.msra.mxu1 %v10460_v46  ;;  %9519 = vmatprep.mubr.msk.f32.mxu1 %vm11819_vm1, %v13401_v7  ;;  %v5571_v46 = vld [vmem:[%s14700_s3 + $0x240] sm:$0xff]  ;;  %v15558_v5 = vld [vmem:[#allocation31_spill] sm:$0xff] }
 0x476   : > { %10465 = vmatprep.subr.bf16.mxu1 %v10464_v60  ;;  %v10476_v16 = vpack.c.bf16 %v5572_v11, %v5571_v46  ;;  %v5578_v11 = vld [vmem:[%s14700_s3 + $0x278] sm:$0xff]  ;;  %vm15559_vm15 = vnez %v15558_v5 }
 0x477   : > { %v15571_v5 = vld [vmem:[#allocation53_spill] sm:$0xff] }
 0x478   : > { %9520 = vmatmul.mubr.f32.gmra.mrb[18].mxu1 %v13409_v33 }
 0x479   : > { %9522 = vmatprep.mubr.msk.f32.mxu1 %vm11838_vm2, %v13421_v12  ;;  %10467 = vmatpush3.bf16.msra.mxu1 %v10464_v60  ;;  %v5574_v60 = vld [vmem:[%s14700_s3 + $0x258] sm:$0xff] }
 0x47a   : > { %10469 = vmatprep.subr.bf16.mxu1 %v10468_v2  ;;  %v10480_v39 = vpack.c.bf16 %v5574_v60, %v5573_v56  ;;  %v15551_v56 = vld [vmem:[#allocation77_spill] sm:$0xff] }
 0x47c   : > { %9523 = vmatmul.mubr.f32.gmra.mrb[20].mxu1 %v13429_v6 }
 0x47d   : > { %9525 = vmatprep.mubr.msk.f32.mxu1 %vm11859_vm3, %v13441_v57  ;;  %10471 = vmatpush3.bf16.msra.mxu1 %v10468_v2  ;;  %v5575_v2 = vld [vmem:[%s14700_s3 + $0x260] sm:$0xff] }
 0x47e   : > { %10473 = vmatprep.subr.bf16.mxu1 %v10472_v30  ;;  %v10484_v46 = vpack.c.bf16 %v5576_v45, %v5575_v2  ;;  %v5837_v2 = vld [vmem:[%s14700_s3 + $0x288] sm:$0xff]  ;;  %v15561_v45 = vld [vmem:[#allocation24_spill] sm:$0xff] }
 0x480   : > { %9526 = vmatmul.mubr.f32.gmra.mrb[22].mxu1 %v13449_v62 }
 0x481   : > { %9528 = vmatprep.mubr.msk.f32.mxu1 %vm11876_vm4, %v13461_v9  ;;  %10475 = vmatpush3.bf16.msra.mxu1 %v10472_v30  ;;  %v5577_v30 = vld [vmem:[%s14700_s3 + $0x270] sm:$0xff] }
 0x482   : > { %10477 = vmatprep.subr.bf16.mxu1 %v10476_v16  ;;  %v10488_v60 = vpack.c.bf16 %v5578_v11, %v5577_v30  ;;  %v15554_v30 = vld [vmem:[#allocation14_spill] sm:$0xff]  ;;  %v15572_v11 = vld [vmem:[#allocation36_spill] sm:$0xff] }
 0x484   : > { %9529 = vmatmul.mubr.f32.gmra.mrb[24].mxu1 %v13469_v19 }
 0x485   : > { %9531 = vmatprep.mubr.msk.f32.mxu1 %vm11895_vm5, %v13481_v47  ;;  %10479 = vmatpush3.bf16.msra.mxu1 %v10476_v16  ;;  %v5836_v16 = vld [vmem:[%s14700_s3 + $0x280] sm:$0xff] }
 0x486   : > { %10481 = vmatprep.subr.bf16.mxu1 %v10480_v39  ;;  %v10492_v1 = vpack.c.bf16 %v5837_v2, %v5836_v16  ;;  %v15564_v16 = vld [vmem:[#allocation27_spill] sm:$0xff]  ;;  %v15565_v2 = vld [vmem:[#allocation29_spill] sm:$0xff] }
 0x488   : > { %9532 = vmatmul.mubr.f32.gmra.mrb[26].mxu1 %v15551_v56  ;;  %v15557_v56 = vld [vmem:[#allocation16_spill] sm:$0xff] }
 0x489   : > { %9534 = vmatprep.mubr.msk.f32.mxu1 %vm11916_vm6, %v13501_v37  ;;  %10483 = vmatpush3.bf16.msra.mxu1 %v10480_v39  ;;  %v15553_v39 = vld [vmem:[#allocation15_spill] sm:$0xff]  ;;  %v15556_v37 = vld [vmem:[#allocation17_spill] sm:$0xff] }
 0x48a   : > { %10485 = vmatprep.subr.bf16.mxu1 %v10484_v46 }
 0x48c   : > { %9535 = vmatmul.mubr.f32.gmra.mrb[28].mxu1 %v13511_v15  ;;  %v15560_v15 = vld [vmem:[#allocation21_spill] sm:$0xff] }
 0x48d   : > { %9537 = vmatprep.mubr.msk.f32.mxu1 %vm11933_vm7, %v13517_v27  ;;  %10487 = vmatpush3.bf16.msra.mxu1 %v10484_v46  ;;  %v15562_v46 = vld [vmem:[#allocation34_spill] sm:$0xff] }
 0x48e   : > { %10489 = vmatprep.subr.bf16.mxu1 %v10488_v60  ;;  %vm15563_vm9 = vnez %v15562_v46  ;;  %v15573_v46 = vld [vmem:[#allocation38_spill] sm:$0xff] }
 0x490   : > { %9538 = vmatmul.mubr.f32.gmra.mrb[30].mxu1 %v15553_v39  ;;  %v15566_v39 = vld [vmem:[#allocation37_spill] sm:$0xff] }
 0x491   : > { %9540 = vmatprep.mubr.msk.f32.mxu1 %vm15432_vm8, %v15554_v30  ;;  %10491 = vmatpush3.bf16.msra.mxu1 %v10488_v60  ;;  %vm15567_vm11 = vnez %v15566_v39  ;;  %v15568_v60 = vld [vmem:[#allocation30_spill] sm:$0xff] }
 0x492   : > { %10493 = vmatprep.subr.bf16.mxu1 %v10492_v1 }
 0x494   : > { %9541 = vmatmul.mubr.f32.gmra.mrb[0].mxu1 %v15556_v37  ;;  %v15569_v37 = vld [vmem:[#allocation40_spill] sm:$0xff] }
 0x495   : > { %9543 = vmatprep.mubr.msk.f32.mxu1 %vm15559_vm15, %v15557_v56  ;;  %vm15570_vm8 = vnez %v15569_v37  ;;  %v4218_v56 = vmul.f32 0.2, %v15571_v5  ;;  %vm4186_vm15 = vcmp.ge.f32.partialorder %v15571_v5, 0.0 }
 0x497   : > { %v14017_v37 = vsel %vm4186_vm15, %v15571_v5, %v4218_v56  ;;  %v15587_v5 = vld [vmem:[#allocation18_spill] sm:$0xff] }
 0x498   : > { %9544 = vmatmul.mubr.f32.gmra.mrb[2].mxu1 %v15560_v15  ;;  %vm15588_vm15 = vnez %v15587_v5  ;;  %v15593_v5 = vld [vmem:[#allocation62_spill] sm:$0xff] }
 0x499   : > { %9546 = vmatprep.mubr.msk.f32.mxu1 %vm15563_vm9, %v15561_v45  ;;  %v15574_v45 = vld [vmem:[#allocation43_spill] sm:$0xff] }
 0x49a   : > { %vm15575_vm9 = vnez %v15574_v45  ;;  %v15038_v45 = vrot.slane %v14017_v37, 7 }
 0x49c   : > { %9547 = vmatmul.mubr.f32.gmra.mrb[4].mxu1 %v15564_v16 }
 0x49d   : > { %9549 = vmatprep.mubr.msk.f32.mxu1 %vm15567_vm11, %v15565_v2  ;;  %v15578_v2 = vld [vmem:[#allocation39_spill] sm:$0xff] }
 0x4a0   : > { %9550 = vmatmul.mubr.f32.gmra.mrb[6].mxu1 %v15568_v60  ;;  %v4459_v60 = vrot.slane %v13872_v43, 7 }
 0x4a1   : > { %9552 = vmatprep.mubr.msk.f32.mxu1 %vm15570_vm8, %v13588_v13  ;;  %v15579_v13 = vld [vmem:[#allocation41_spill] sm:$0xff] }
 0x4a4   : > { %9553 = vmatmul.mubr.f32.gmra.mrb[8].mxu1 %v15572_v11 }
 0x4a5   : > { %9555 = vmatprep.mubr.msk.f32.mxu1 %vm15575_vm9, %v15573_v46  ;;  %vm15585_vm9 = vcmp.lt.s32.totalorder %v11770_v51, 1 }
 0x4a6   : > { %v14010_v16 = vpop.f32.mrb[34].mxu0 }
 0x4a7   : > { %15576 = vst [vmem:[#allocation50_spill] sm:$0xff] %v14010_v16  ;;  %v14012_v39 = vpop.f32.mrb[35].mxu0  ;;  %v15583_v16 = vld [vmem:[#allocation42_spill] sm:$0xff] }
 0x4a8   : > { %15577 = vst [vmem:[#allocation53_spill] sm:$0xff] %v14012_v39  ;;  %9556 = vmatmul.mubr.f32.gmra.mrb[10].mxu1 %v15578_v2  ;;  %v15584_v39 = vrot.slane %v13357_v32, 7 }
 0x4a9   : > { %9558 = vmatprep.mubr.msk.f32.mxu1 %vm15467_vm0, %v15579_v13  ;;  %vm15591_vm0 = vmmov %vm15585_vm9  ;;  %v15597_v13 = vld [vmem:[#allocation71_spill] sm:$0xff] }
 0x4aa   : > { %v14022_v11 = vpop.f32.mrb[36].mxu0  ;;  %v14032_v2 = vsel %vm15585_vm9, %v15584_v39, %v4459_v60  ;;  %v5839_v39 = vld [vmem:[%s14700_s3 + $0x298] sm:$0xff] }
 0x4ab   : > { %15581 = vst [vmem:[#allocation38_spill] sm:$0xff] %v14022_v11  ;;  %v14024_v30 = vpop.f32.mrb[37].mxu0  ;;  %15586 = vst [vmem:[#allocation94_spill] sm:$0xff] %v14032_v2  ;;  %v5838_v11 = vld [vmem:[%s14700_s3 + $0x290] sm:$0xff] }
 0x4ac   : > { %15582 = vst [vmem:[#allocation93_spill] sm:$0xff] %v14024_v30  ;;  %9559 = vmatmul.mubr.f32.gmra.mrb[12].mxu1 %v15583_v16  ;;  %v14045_v30 = vsel %vm15591_vm0, %v4459_v60, %v15038_v45  ;;  %v5840_v60 = vld [vmem:[%s14700_s3 + $0x2a0] sm:$0xff]  ;;  %v5841_v45 = vld [vmem:[%s14700_s3 + $0x2a8] sm:$0xff]  ;;  %v15596_v16 = vld [vmem:[#allocation68_spill] sm:$0xff] }
 0x4ad   : > { %9561 = vmatprep.mubr.msk.f32.mxu1 %vm15588_vm15, %v14032_v2  ;;  %15592 = vst [vmem:[#allocation97_spill] sm:$0xff] %v14045_v30 }
 0x4ae   : > { %v14037_v56 = vpop.f32.mrb[38].mxu0 }
 0x4af   : > { %15589 = vst [vmem:[#allocation95_spill] sm:$0xff] %v14037_v56  ;;  %v14039_v15 = vpop.f32.mrb[39].mxu0 }
 0x4b0   : > { %15590 = vst [vmem:[#allocation96_spill] sm:$0xff] %v14039_v15  ;;  %9562 = vmatmul.mubr.f32.gmra.mrb[14].mxu1 %v14045_v30  ;;  %v10496_v15 = vpack.c.bf16 %v5839_v39, %v5838_v11  ;;  %v5842_v39 = vld [vmem:[%s14700_s3 + $0x2b0] sm:$0xff] }
 0x4b1   : > { %9596 = vmatprep.mubr.f32.mxu1 %v15593_v5  ;;  %v10500_v5 = vpack.c.bf16 %v5841_v45, %v5840_v60  ;;  %v5844_v60 = vld [vmem:[%s14700_s3 + $0x2c0] sm:$0xff] }
 0x4b2   : > { %v14055_v56 = vpop.f32.mrb[40].mxu0 }
 0x4b3   : > { %15594 = vst [vmem:[#allocation62_spill] sm:$0xff] %v14055_v56  ;;  %v14057_v2 = vpop.f32.mrb[41].mxu0 }
 0x4b4   : > { %15595 = vst [vmem:[#allocation98_spill] sm:$0xff] %v14057_v2  ;;  %9597 = vmatmul.mubr.f32.vlgmr.msra.gmra.mrb[16].mxu1 %v15596_v16  ;;  %v5843_v2 = vld [vmem:[%s14700_s3 + $0x2b8] sm:$0xff] }
 0x4b5   : > { %10495 = vmatpush3.bf16.msra.mxu1 %v10492_v1  ;;  %9599 = vmatprep.mubr.f32.mxu1 %v15597_v13  ;;  %v10504_v16 = vpack.c.bf16 %v5843_v2, %v5842_v39  ;;  %v5846_v39 = vld [vmem:[%s14700_s3 + $0x2d0] sm:$0xff] }
 0x4b6   : > { %v14067_v30 = vpop.f32.mrb[42].mxu0  ;;  %10497 = vmatprep.subr.bf16.mxu1 %v10496_v15 }
 0x4b7   : > { %15598 = vst [vmem:[#allocation68_spill] sm:$0xff] %v14067_v30  ;;  %v14069_v11 = vpop.f32.mrb[43].mxu0  ;;  %v15608_v30 = vld [vmem:[#allocation47_spill] sm:$0xff] }
 0x4b8   : > { %15599 = vst [vmem:[#allocation71_spill] sm:$0xff] %v14069_v11  ;;  %9600 = vmatmul.mubr.f32.gmra.mrb[18].mxu1 %v13181_v31  ;;  %v5845_v11 = vld [vmem:[%s14700_s3 + $0x2c8] sm:$0xff] }
 0x4b9   : > { %9602 = vmatprep.mubr.f32.mxu1 %v13195_v34  ;;  %10499 = vmatpush3.bf16.msra.mxu1 %v10496_v15 }
 0x4ba   : > { %v14079_v1 = vpop.f32.mrb[44].mxu0  ;;  %10501 = vmatprep.subr.bf16.mxu1 %v10500_v5 }
 0x4bb   : > { %15600 = vst [vmem:[#allocation99_spill] sm:$0xff] %v14079_v1  ;;  %v14081_v45 = vpop.f32.mrb[45].mxu0  ;;  %v10508_v1 = vpack.c.bf16 %v5845_v11, %v5844_v60  ;;  %v5848_v11 = vld [vmem:[%s14700_s3 + $0x2e0] sm:$0xff]  ;;  %v5849_v60 = vld [vmem:[%s14700_s3 + $0x2e8] sm:$0xff] }
 0x4bc   : > { %15601 = vst [vmem:[#allocation100_spill] sm:$0xff] %v14081_v45  ;;  %9603 = vmatmul.mubr.f32.gmra.mrb[20].mxu1 %v13215_v35  ;;  %v5847_v45 = vld [vmem:[%s14700_s3 + $0x2d8] sm:$0xff] }
 0x4bd   : > { %9605 = vmatprep.mubr.f32.mxu1 %v13230_v26  ;;  %10503 = vmatpush3.bf16.msra.mxu1 %v10500_v5  ;;  %v10512_v5 = vpack.c.bf16 %v5847_v45, %v5846_v39  ;;  %v5851_v45 = vld [vmem:[%s14700_s3 + $0x2f8] sm:$0xff] }
 0x4be   : > { %v14091_v15 = vpop.f32.mrb[46].mxu0  ;;  %10505 = vmatprep.subr.bf16.mxu1 %v10504_v16 }
 0x4bf   : > { %15602 = vst [vmem:[#allocation101_spill] sm:$0xff] %v14091_v15  ;;  %v14093_v2 = vpop.f32.mrb[47].mxu0  ;;  %v15606_v15 = vld [vmem:[#allocation52_spill] sm:$0xff] }
 0x4c0   : > { %15603 = vst [vmem:[#allocation102_spill] sm:$0xff] %v14093_v2  ;;  %9606 = vmatmul.mubr.f32.gmra.mrb[22].mxu1 %v13247_v25  ;;  %v10516_v2 = vpack.c.bf16 %v5849_v60, %v5848_v11  ;;  %v6110_v11 = vld [vmem:[%s14700_s3 + $0x308] sm:$0xff]  ;;  %vm15607_vm0 = vnez %v15606_v15 }
 0x4c1   : > { %9608 = vmatprep.mubr.f32.mxu1 %v13256_v8  ;;  %10507 = vmatpush3.bf16.msra.mxu1 %v10504_v16  ;;  %v5850_v16 = vld [vmem:[%s14700_s3 + $0x2f0] sm:$0xff] }
 0x4c2   : > { %10509 = vmatprep.subr.bf16.mxu1 %v10508_v1  ;;  %v10520_v39 = vpack.c.bf16 %v5851_v45, %v5850_v16  ;;  %v15604_v16 = vld [vmem:[#allocation44_spill] sm:$0xff] }
 0x4c4   : > { %9609 = vmatmul.mubr.f32.gmra.mrb[24].mxu1 %v13279_v49 }
 0x4c5   : > { %9611 = vmatprep.mubr.f32.mxu1 %v13290_v63  ;;  %10511 = vmatpush3.bf16.msra.mxu1 %v10508_v1  ;;  %v6109_v1 = vld [vmem:[%s14700_s3 + $0x300] sm:$0xff] }
 0x4c6   : > { %10513 = vmatprep.subr.bf16.mxu1 %v10512_v5  ;;  %v10524_v60 = vpack.c.bf16 %v6110_v11, %v6109_v1  ;;  %v6114_v1 = vld [vmem:[%s14700_s3 + $0x328] sm:$0xff]  ;;  %v15605_v11 = vld [vmem:[#allocation45_spill] sm:$0xff] }
 0x4c8   : > { %9612 = vmatmul.mubr.f32.gmra.mrb[26].mxu1 %v13309_v59 }
 0x4c9   : > { %9614 = vmatprep.mubr.f32.mxu1 %v13317_v23  ;;  %10515 = vmatpush3.bf16.msra.mxu1 %v10512_v5  ;;  %v6112_v5 = vld [vmem:[%s14700_s3 + $0x318] sm:$0xff] }
 0x4ca   : > { %10517 = vmatprep.subr.bf16.mxu1 %v10516_v2 }
 0x4cc   : > { %9615 = vmatmul.mubr.f32.gmra.mrb[28].mxu1 %v13337_v18 }
 0x4cd   : > { %9617 = vmatprep.mubr.f32.mxu1 %v13158_v4  ;;  %10519 = vmatpush3.bf16.msra.mxu1 %v10516_v2  ;;  %v6111_v2 = vld [vmem:[%s14700_s3 + $0x310] sm:$0xff] }
 0x4ce   : > { %10521 = vmatprep.subr.bf16.mxu1 %v10520_v39  ;;  %v10528_v45 = vpack.c.bf16 %v6112_v5, %v6111_v2  ;;  %v6115_v2 = vld [vmem:[%s14700_s3 + $0x330] sm:$0xff]  ;;  %v6116_v5 = vld [vmem:[%s14700_s3 + $0x338] sm:$0xff] }
 0x4cf   : > { %v10536_v15 = vpack.c.bf16 %v6116_v5, %v6115_v2  ;;  %v6120_v2 = vld [vmem:[%s14700_s3 + $0x358] sm:$0xff]  ;;  %v15617_v5 = vld [vmem:[#allocation10_spill] sm:$0xff] }
 0x4d0   : > { %9618 = vmatmul.mubr.f32.gmra.mrb[30].mxu1 %v13165_v14 }
 0x4d1   : > { %9620 = vmatprep.mubr.f32.mxu1 %v13174_v38  ;;  %10523 = vmatpush3.bf16.msra.mxu1 %v10520_v39  ;;  %v6113_v39 = vld [vmem:[%s14700_s3 + $0x320] sm:$0xff] }
 0x4d2   : > { %10525 = vmatprep.subr.bf16.mxu1 %v10524_v60  ;;  %v10532_v56 = vpack.c.bf16 %v6114_v1, %v6113_v39  ;;  %v6118_v39 = vld [vmem:[%s14700_s3 + $0x348] sm:$0xff]  ;;  %v15613_v1 = vld [vmem:[#allocation8_spill] sm:$0xff] }
 0x4d4   : > { %9621 = vmatmul.mubr.f32.gmra.mrb[0].mxu1 %v13183_v22 }
 0x4d5   : > { %9623 = vmatprep.mubr.f32.mxu1 %v13205_v24 }
 0x4d8   : > { %9624 = vmatmul.mubr.f32.gmra.mrb[2].mxu1 %v13218_v28 }
 0x4d9   : > { %9626 = vmatprep.mubr.f32.mxu1 %v13240_v48 }
 0x4dc   : > { %9627 = vmatmul.mubr.f32.gmra.mrb[4].mxu1 %v13250_v29 }
 0x4dd   : > { %9629 = vmatprep.mubr.f32.mxu1 %v13272_v44 }
 0x4e0   : > { %9630 = vmatmul.mubr.f32.gmra.mrb[6].mxu1 %v13282_v10 }
 0x4e1   : > { %9632 = vmatprep.mubr.f32.mxu1 %v13301_v3 }
 0x4e4   : > { %9633 = vmatmul.mubr.f32.gmra.mrb[8].mxu1 %v13314_v17 }
 0x4e5   : > { %9635 = vmatprep.mubr.f32.mxu1 %v13330_v36 }
 0x4e8   : > { %9636 = vmatmul.mubr.f32.gmra.mrb[10].mxu1 %v13341_v40 }
 0x4e9   : > { %9638 = vmatprep.mubr.f32.mxu1 %v13352_v21  ;;  %v15612_v21 = vld [vmem:[#allocation20_spill] sm:$0xff] }
 0x4ec   : > { %9639 = vmatmul.mubr.f32.gmra.mrb[12].mxu1 %v13357_v32  ;;  %v15610_v32 = vld [vmem:[#allocation56_spill] sm:$0xff] }
 0x4ed   : > { %9641 = vmatprep.mubr.f32.mxu1 %v13872_v43  ;;  %vm15611_vm9 = vnez %v15610_v32  ;;  %v15624_v32 = vld [vmem:[#allocation67_spill] sm:$0xff] }
 0x4f0   : > { %9642 = vmatmul.mubr.f32.gmra.mrb[14].mxu1 %v14017_v37 }
 0x4f1   : > { %9676 = vmatprep.mubr.f32.mxu1 %v15604_v16  ;;  %v15609_v16 = vld [vmem:[#allocation48_spill] sm:$0xff] }
 0x4f4   : > { %9677 = vmatmul.mubr.msk.f32.vlgmr.msra.gmra.mrb[16].mxu1 %vm15607_vm0, %v15605_v11  ;;  %v15614_v11 = vld [vmem:[#allocation58_spill] sm:$0xff] }
 0x4f5   : > { %10527 = vmatpush3.bf16.msra.mxu1 %v10524_v60  ;;  %9679 = vmatprep.mubr.f32.mxu1 %v15608_v30  ;;  %v6117_v60 = vld [vmem:[%s14700_s3 + $0x340] sm:$0xff]  ;;  %vm15615_vm0 = vnez %v15614_v11  ;;  %v15616_v30 = vld [vmem:[#allocation9_spill] sm:$0xff]  ;;  %v15628_v11 = vld [vmem:[#allocation64_spill] sm:$0xff] }
 0x4f6   : > { %10529 = vmatprep.subr.bf16.mxu1 %v10528_v45 }
 0x4f8   : > { %9680 = vmatmul.mubr.msk.f32.gmra.mrb[18].mxu1 %vm15611_vm9, %v15609_v16  ;;  %v15619_v16 = vld [vmem:[#allocation54_spill] sm:$0xff] }
 0x4f9   : > { %9682 = vmatprep.mubr.f32.mxu1 %v15612_v21  ;;  %10531 = vmatpush3.bf16.msra.mxu1 %v10528_v45  ;;  %v10540_v21 = vpack.c.bf16 %v6118_v39, %v6117_v60  ;;  %v6119_v45 = vld [vmem:[%s14700_s3 + $0x350] sm:$0xff]  ;;  %v6122_v60 = vld [vmem:[%s14700_s3 + $0x368] sm:$0xff] }
 0x4fa   : > { %10533 = vmatprep.subr.bf16.mxu1 %v10532_v56  ;;  %v15620_v39 = vld [vmem:[#allocation55_spill] sm:$0xff] }
 0x4fc   : > { %9683 = vmatmul.mubr.msk.f32.gmra.mrb[20].mxu1 %vm15615_vm0, %v15613_v1  ;;  %v15622_v1 = vld [vmem:[#allocation57_spill] sm:$0xff] }
 0x4fd   : > { %9685 = vmatprep.mubr.f32.mxu1 %v15616_v30  ;;  %10535 = vmatpush3.bf16.msra.mxu1 %v10532_v56  ;;  %v10544_v30 = vpack.c.bf16 %v6120_v2, %v6119_v45  ;;  %v6121_v56 = vld [vmem:[%s14700_s3 + $0x360] sm:$0xff]  ;;  %v6124_v45 = vld [vmem:[%s14700_s3 + $0x378] sm:$0xff]  ;;  %v15623_v2 = vld [vmem:[#allocation59_spill] sm:$0xff] }
 0x4fe   : > { %10537 = vmatprep.subr.bf16.mxu1 %v10536_v15 }
 0x500   : > { %9686 = vmatmul.mubr.msk.f32.gmra.mrb[22].mxu1 %vm15493_vm12, %v15617_v5  ;;  %vm15625_vm12 = vnez %v15624_v32  ;;  %v15630_v32 = vld [vmem:[#allocation72_spill] sm:$0xff] }
 0x501   : > { %9688 = vmatprep.mubr.f32.mxu1 %v15619_v16  ;;  %10539 = vmatpush3.bf16.msra.mxu1 %v10536_v15  ;;  %v10548_v16 = vpack.c.bf16 %v6122_v60, %v6121_v56  ;;  %v6123_v15 = vld [vmem:[%s14700_s3 + $0x370] sm:$0xff]  ;;  %v6383_v56 = vld [vmem:[%s14700_s3 + $0x388] sm:$0xff]  ;;  %v15626_v60 = vld [vmem:[#allocation70_spill] sm:$0xff] }
 0x502   : > { %10541 = vmatprep.subr.bf16.mxu1 %v10540_v21 }
 0x504   : > { %9689 = vmatmul.mubr.msk.f32.gmra.mrb[24].mxu1 %vm15371_vm14, %v15620_v39  ;;  %vm15627_vm14 = vnez %v15626_v60  ;;  %v15636_v39 = vld [vmem:[#allocation80_spill] sm:$0xff]  ;;  %v15637_v60 = vld [vmem:[#allocation83_spill] sm:$0xff] }
 0x505   : > { %9691 = vmatprep.mubr.f32.mxu1 %v15622_v1  ;;  %10543 = vmatpush3.bf16.msra.mxu1 %v10540_v21  ;;  %v10552_v1 = vpack.c.bf16 %v6124_v45, %v6123_v15  ;;  %v6382_v21 = vld [vmem:[%s14700_s3 + $0x380] sm:$0xff]  ;;  %v15632_v15 = vld [vmem:[#allocation69_spill] sm:$0xff] }
 0x506   : > { %10545 = vmatprep.subr.bf16.mxu1 %v10544_v30  ;;  %v15633_v45 = vld [vmem:[#allocation74_spill] sm:$0xff] }
 0x508   : > { %9692 = vmatmul.mubr.msk.f32.gmra.mrb[26].mxu1 %vm15625_vm12, %v15623_v2  ;;  %vm15631_vm12 = vnez %v15630_v32  ;;  %v15634_v2 = vld [vmem:[#allocation76_spill] sm:$0xff] }
 0x509   : > { %9694 = vmatprep.mubr.f32.mxu1 %v13776_v41  ;;  %10547 = vmatpush3.bf16.msra.mxu1 %v10544_v30  ;;  %v10556_v41 = vpack.c.bf16 %v6383_v56, %v6382_v21  ;;  %v15629_v30 = vld [vmem:[#allocation66_spill] sm:$0xff]  ;;  %vm15635_vm0 = vnez %v15634_v2  ;;  %v15644_v32 = vld [vmem:[#allocation88_spill] sm:$0xff]  ;;  %v15648_v2 = vld [vmem:[#allocation91_spill] sm:$0xff] }
 0x50a   : > { %10549 = vmatprep.subr.bf16.mxu1 %v10548_v16  ;;  %v15641_v21 = vld [vmem:[#allocation86_spill] sm:$0xff] }
 0x50b   : > { %v15642_v56 = vld [vmem:[#allocation82_spill] sm:$0xff] }
 0x50c   : > { %9695 = vmatmul.mubr.msk.f32.gmra.mrb[28].mxu1 %vm15627_vm14, %v13782_v0  ;;  %v15638_v0 = vld [vmem:[#allocation78_spill] sm:$0xff]  ;;  %vm15643_vm9 = vnez %v15642_v56  ;;  %v4352_v56 = vrot.slane %v14017_v37, 1 }
 0x50d   : > { %9697 = vmatprep.mubr.f32.mxu1 %v15628_v11  ;;  %10551 = vmatpush3.bf16.msra.mxu1 %v10548_v16  ;;  %vm15639_vm14 = vnez %v15638_v0  ;;  %v15640_v16 = vld [vmem:[#allocation85_spill] sm:$0xff]  ;;  %v15650_v0 = vld [vmem:[#allocation6_spill] sm:$0xff] }
 0x50e   : > { %10553 = vmatprep.subr.bf16.mxu1 %v10552_v1 }
 0x510   : > { %9698 = vmatmul.mubr.msk.f32.gmra.mrb[30].mxu1 %vm15631_vm12, %v15629_v30 }
 0x511   : > { %9700 = vmatprep.mubr.f32.mxu1 %v15632_v15  ;;  %10555 = vmatpush3.bf16.msra.mxu1 %v10552_v1  ;;  %v15645_v1 = vld [vmem:[#allocation90_spill] sm:$0xff]  ;;  %v15646_v15 = vld [vmem:[#allocation84_spill] sm:$0xff] }
 0x512   : > { %10557 = vmatprep.subr.bf16.mxu1 %v10556_v41  ;;  %vm15647_vm12 = vnez %v15646_v15 }
 0x514   : > { %9701 = vmatmul.mubr.msk.f32.gmra.mrb[0].mxu1 %vm15635_vm0, %v15633_v45  ;;  %vm15649_vm0 = vnez %v15537_v53 }
 0x515   : > { %9703 = vmatprep.mubr.f32.mxu1 %v15636_v39 }
 0x518   : > { %9704 = vmatmul.mubr.msk.f32.gmra.mrb[2].mxu1 %vm15639_vm14, %v15637_v60 }
 0x519   : > { %9706 = vmatprep.mubr.f32.mxu1 %v15640_v16 }
 0x51c   : > { %9707 = vmatmul.mubr.msk.f32.gmra.mrb[4].mxu1 %vm15643_vm9, %v15641_v21 }
 0x51d   : > { %9709 = vmatprep.mubr.f32.mxu1 %v15644_v32  ;;  %v6385_v32 = vld [vmem:[%s14700_s3 + $0x398] sm:$0xff] }
 0x520   : > { %9710 = vmatmul.mubr.msk.f32.gmra.mrb[6].mxu1 %vm15647_vm12, %v15645_v1  ;;  %vm15654_vm12 = vcmp.lt.s32.totalorder %v11770_v51, 7 }
 0x521   : > { %9712 = vmatprep.mubr.f32.mxu1 %v15648_v2  ;;  %v15653_v2 = vrot.slane %v13872_v43, 1 }
 0x523   : > { %v14257_v53 = vsel %vm15654_vm12, %v15653_v2, %v4352_v56 }
 0x524   : > { %9713 = vmatmul.mubr.msk.f32.gmra.mrb[8].mxu1 %vm15649_vm0, %v13868_v58  ;;  %vm15656_vm0 = vmmov %vm15654_vm12 }
 0x525   : > { %9715 = vmatprep.mubr.f32.mxu1 %v13879_v42  ;;  %v15655_v42 = vld [vmem:[#allocation49_spill] sm:$0xff] }
 0x526   : > { %v14263_v16 = vsel %vm15656_vm0, %v4352_v56, %v15655_v42  ;;  %v6386_v56 = vld [vmem:[%s14700_s3 + $0x3a0] sm:$0xff]  ;;  %v6387_v42 = vld [vmem:[%s14700_s3 + $0x3a8] sm:$0xff] }
 0x528   : > { %9716 = vmatmul.mubr.msk.f32.gmra.mrb[10].mxu1 %vm15543_vm13, %v15650_v0 }
 0x529   : > { %9718 = vmatprep.mubr.f32.mxu1 %v13893_v54  ;;  %v6384_v54 = vld [vmem:[%s14700_s3 + $0x390] sm:$0xff] }
 0x52a   : > { %v10560_v2 = vpack.c.bf16 %v6385_v32, %v6384_v54  ;;  %v6389_v32 = vld [vmem:[%s14700_s3 + $0x3b8] sm:$0xff] }
 0x52b   : > { %v10568_v55 = vpack.c.bf16 %v6389_v32, %v6388_v52  ;;  %v6655_v32 = vld [vmem:[%s14700_s3 + $0x400] sm:$0xff] }
 0x52c   : > { %9719 = vmatmul.mubr.msk.f32.gmra.mrb[12].mxu1 %vm15549_vm10, %v13900_v20  ;;  %v15657_v20 = vld [vmem:[#allocation26_spill] sm:$0xff] }
 0x52d   : > { %9721 = vmatprep.mubr.f32.mxu1 %v14257_v53  ;;  %vm15658_vm10 = vnez %v15657_v20  ;;  %v10564_v20 = vpack.c.bf16 %v6387_v42, %v6386_v56  ;;  %v15661_v42 = vld [vmem:[#allocation79_spill] sm:$0xff] }
 0x52e   : > { %v15684_v56 = vld [vmem:[#allocation43_spill] sm:$0xff] }
 0x530   : > { %9722 = vmatmul.mubr.msk.f32.gmra.mrb[14].mxu1 %vm15658_vm10, %v14263_v16 }
 0x531   : > { %9756 = vmatprep.mubr.msk.f32.mxu1 %vm11819_vm1, %v13401_v7  ;;  %v6390_v7 = vld [vmem:[%s14700_s3 + $0x3c0] sm:$0xff] }
 0x534   : > { %9757 = vmatmul.mubr.f32.vlgmr.msra.gmra.mrb[16].mxu1 %v13409_v33  ;;  %v6391_v33 = vld [vmem:[%s14700_s3 + $0x3c8] sm:$0xff] }
 0x535   : > { %10559 = vmatpush3.bf16.msra.mxu1 %v10556_v41  ;;  %9759 = vmatprep.mubr.msk.f32.mxu1 %vm11838_vm2, %v13421_v12  ;;  %v10572_v61 = vpack.c.bf16 %v6391_v33, %v6390_v7  ;;  %v6392_v12 = vld [vmem:[%s14700_s3 + $0x3d0] sm:$0xff]  ;;  %v15660_v41 = vld [vmem:[#allocation77_spill] sm:$0xff]  ;;  %v15665_v7 = vld [vmem:[#allocation15_spill] sm:$0xff] }
 0x536   : > { %10561 = vmatprep.subr.bf16.mxu1 %v10560_v2  ;;  %v15666_v33 = vld [vmem:[#allocation14_spill] sm:$0xff] }
 0x538   : > { %9760 = vmatmul.mubr.f32.gmra.mrb[18].mxu1 %v13429_v6  ;;  %v6393_v6 = vld [vmem:[%s14700_s3 + $0x3d8] sm:$0xff] }
 0x539   : > { %9762 = vmatprep.mubr.msk.f32.mxu1 %vm11859_vm3, %v13441_v57  ;;  %10563 = vmatpush3.bf16.msra.mxu1 %v10560_v2  ;;  %v10576_v50 = vpack.c.bf16 %v6393_v6, %v6392_v12  ;;  %v15663_v2 = vld [vmem:[#allocation81_spill] sm:$0xff]  ;;  %v15670_v6 = vld [vmem:[#allocation16_spill] sm:$0xff]  ;;  %v15671_v57 = vld [vmem:[#allocation31_spill] sm:$0xff] }
 0x53a   : > { %10565 = vmatprep.subr.bf16.mxu1 %v10564_v20  ;;  %v15669_v12 = vld [vmem:[#allocation17_spill] sm:$0xff]  ;;  %vm15672_vm2 = vnez %v15671_v57  ;;  %v15695_v57 = vrot.slane %v14017_v37, 7 }
 0x53c   : > { %9763 = vmatmul.mubr.f32.gmra.mrb[20].mxu1 %v13449_v62  ;;  %v6394_v62 = vld [vmem:[%s14700_s3 + $0x3e0] sm:$0xff] }
 0x53d   : > { %9765 = vmatprep.mubr.msk.f32.mxu1 %vm11876_vm4, %v13461_v9  ;;  %10567 = vmatpush3.bf16.msra.mxu1 %v10564_v20  ;;  %v6395_v9 = vld [vmem:[%s14700_s3 + $0x3e8] sm:$0xff]  ;;  %v6397_v20 = vld [vmem:[%s14700_s3 + $0x3f8] sm:$0xff]  ;;  %vm15685_vm4 = vnez %v15684_v56 }
 0x53e   : > { %10569 = vmatprep.subr.bf16.mxu1 %v10568_v55  ;;  %v7000_v56 = vld [vmem:[%s14702_s5 + $0x8] sm:$0xff] }
 0x540   : > { %9766 = vmatmul.mubr.f32.gmra.mrb[22].mxu1 %v13469_v19  ;;  %v10580_v19 = vpack.c.bf16 %v6395_v9, %v6394_v62  ;;  %v15674_v62 = vld [vmem:[#allocation24_spill] sm:$0xff]  ;;  %v15675_v9 = vld [vmem:[#allocation34_spill] sm:$0xff] }
 0x541   : > { %9768 = vmatprep.mubr.msk.f32.mxu1 %vm11895_vm5, %v13481_v47  ;;  %10571 = vmatpush3.bf16.msra.mxu1 %v10568_v55  ;;  %v6396_v47 = vld [vmem:[%s14700_s3 + $0x3f0] sm:$0xff]  ;;  %v6656_v55 = vld [vmem:[%s14700_s3 + $0x408] sm:$0xff]  ;;  %vm15676_vm3 = vnez %v15675_v9  ;;  %v6658_v9 = vld [vmem:[%s14700_s3 + $0x418] sm:$0xff] }
 0x542   : > { %10573 = vmatprep.subr.bf16.mxu1 %v10572_v61  ;;  %v10584_v52 = vpack.c.bf16 %v6397_v20, %v6396_v47  ;;  %v15681_v47 = vld [vmem:[#allocation32_spill] sm:$0xff]  ;;  %v6668_v20 = vld [vmem:[%s14700_s3 + $0x468] sm:$0xff] }
 0x544   : > { %9769 = vmatmul.mubr.f32.gmra.mrb[24].mxu1 %v15660_v41  ;;  %v15677_v41 = vld [vmem:[#allocation27_spill] sm:$0xff] }
 0x545   : > { %9771 = vmatprep.mubr.msk.f32.mxu1 %vm11916_vm6, %v15661_v42  ;;  %10575 = vmatpush3.bf16.msra.mxu1 %v10572_v61  ;;  %v15667_v61 = vld [vmem:[#allocation28_spill] sm:$0xff]  ;;  %v15678_v42 = vld [vmem:[#allocation29_spill] sm:$0xff]  ;;  %vm15696_vm6 = vcmp.lt.s32.totalorder %v11770_v51, 1  ;;  %v6659_v51 = vld [vmem:[%s14700_s3 + $0x420] sm:$0xff] }
 0x546   : > { %10577 = vmatprep.subr.bf16.mxu1 %v10576_v50  ;;  %vm15668_vm1 = vnez %v15667_v61  ;;  %v15711_v61 = vld [vmem:[#allocation61_spill] sm:$0xff] }
 0x548   : > { %9772 = vmatmul.mubr.f32.gmra.mrb[26].mxu1 %v15663_v2  ;;  %v15683_v2 = vld [vmem:[#allocation36_spill] sm:$0xff] }
 0x549   : > { %9774 = vmatprep.mubr.msk.f32.mxu1 %vm11933_vm7, %v13517_v27  ;;  %10579 = vmatpush3.bf16.msra.mxu1 %v10576_v50  ;;  %v10588_v27 = vpack.c.bf16 %v6656_v55, %v6655_v32  ;;  %v15673_v50 = vld [vmem:[#allocation21_spill] sm:$0xff]  ;;  %v15688_v55 = vld [vmem:[#allocation46_spill] sm:$0xff] }
 0x54a   : > { %10581 = vmatprep.subr.bf16.mxu1 %v10580_v19  ;;  %v15687_v32 = vld [vmem:[#allocation41_spill] sm:$0xff]  ;;  %vm15689_vm5 = vnez %v15688_v55 }
 0x54c   : > { %9775 = vmatmul.mubr.f32.gmra.mrb[28].mxu1 %v15665_v7  ;;  %v15690_v7 = vld [vmem:[#allocation42_spill] sm:$0xff] }
 0x54d   : > { %9777 = vmatprep.mubr.msk.f32.mxu1 %vm15668_vm1, %v15666_v33  ;;  %10583 = vmatpush3.bf16.msra.mxu1 %v10580_v19  ;;  %v15680_v19 = vld [vmem:[#allocation30_spill] sm:$0xff] }
 0x54e   : > { %10585 = vmatprep.subr.bf16.mxu1 %v10584_v52  ;;  %v15691_v33 = vld [vmem:[#allocation94_spill] sm:$0xff] }
 0x550   : > { %9778 = vmatmul.mubr.f32.gmra.mrb[30].mxu1 %v15669_v12  ;;  %v15693_v12 = vld [vmem:[#allocation97_spill] sm:$0xff] }
 0x551   : > { %9780 = vmatprep.mubr.msk.f32.mxu1 %vm15672_vm2, %v15670_v6  ;;  %10587 = vmatpush3.bf16.msra.mxu1 %v10584_v52  ;;  %v15686_v52 = vld [vmem:[#allocation39_spill] sm:$0xff] }
 0x552   : > { %10589 = vmatprep.subr.bf16.mxu1 %v10588_v27  ;;  %v15694_v6 = vld [vmem:[#allocation11_spill] sm:$0xff] }
 0x554   : > { %9781 = vmatmul.mubr.f32.gmra.mrb[0].mxu1 %v15673_v50  ;;  %v15697_v50 = vld [vmem:[#allocation7_spill] sm:$0xff] }
 0x555   : > { %9783 = vmatprep.mubr.msk.f32.mxu1 %vm15676_vm3, %v15674_v62  ;;  %vm15698_vm7 = vnez %v15697_v50  ;;  %v6657_v62 = vld [vmem:[%s14700_s3 + $0x410] sm:$0xff]  ;;  %v15714_v50 = vld [vmem:[#allocation55_spill] sm:$0xff] }
 0x558   : > { %9784 = vmatmul.mubr.f32.gmra.mrb[2].mxu1 %v15677_v41  ;;  %v10592_v41 = vpack.c.bf16 %v6658_v9, %v6657_v62  ;;  %v15715_v62 = vld [vmem:[#allocation65_spill] sm:$0xff] }
 0x559   : > { %9786 = vmatprep.mubr.msk.f32.mxu1 %vm15567_vm11, %v15678_v42  ;;  %v6660_v42 = vld [vmem:[%s14700_s3 + $0x428] sm:$0xff]  ;;  %vm15712_vm11 = vnez %v15711_v61  ;;  %v15717_v9 = vld [vmem:[#allocation57_spill] sm:$0xff] }
 0x55a   : > { %v10596_v54 = vpack.c.bf16 %v6660_v42, %v6659_v51  ;;  %v7012_v51 = vld [vmem:[%s14702_s5 + $0x68] sm:$0xff]  ;;  %v6994_v61 = vld [vmem:[%s11407_s18 + $0xd8] sm:$0xff] }
 0x55b   : > { %v15718_v42 = vld [vmem:[#allocation59_spill] sm:$0xff] }
 0x55c   : > { %9787 = vmatmul.mubr.f32.gmra.mrb[4].mxu1 %v15680_v19  ;;  %v6662_v19 = vld [vmem:[%s14700_s3 + $0x438] sm:$0xff] }
 0x55d   : > { %9789 = vmatprep.mubr.msk.f32.mxu1 %vm15570_vm8, %v15681_v47  ;;  %v6666_v47 = vld [vmem:[%s14700_s3 + $0x458] sm:$0xff] }
 0x560   : > { %9790 = vmatmul.mubr.f32.gmra.mrb[6].mxu1 %v15683_v2  ;;  %v6670_v2 = vld [vmem:[%s14700_s3 + $0x478] sm:$0xff] }
 0x561   : > { %9792 = vmatprep.mubr.msk.f32.mxu1 %vm15685_vm4, %v15573_v46  ;;  %v4464_v46 = vsel %vm15696_vm6, %v15695_v57, %v15694_v6  ;;  %v7009_v57 = vld [vmem:[%s14702_s5 + $0x50] sm:$0xff]  ;;  %vm15734_vm4 = vnez %v15646_v15  ;;  %v15754_v15 = vld [vmem:[#allocation95_spill] sm:$0xff] }
 0x564   : > { %9793 = vmatmul.mubr.f32.gmra.mrb[8].mxu1 %v15686_v52  ;;  %v15708_v52 = vld [vmem:[#allocation58_spill] sm:$0xff] }
 0x565   : > { %9795 = vmatprep.mubr.msk.f32.mxu1 %vm15689_vm5, %v15687_v32  ;;  %vm15709_vm12 = vnez %v15708_v52  ;;  %v15710_v32 = vld [vmem:[#allocation9_spill] sm:$0xff]  ;;  %v6989_v52 = vld [vmem:[%s11407_s18 + $0xb0] sm:$0xff] }
 0x568   : > { %9796 = vmatmul.mubr.f32.gmra.mrb[10].mxu1 %v15690_v7  ;;  %v7007_v7 = vld [vmem:[%s14702_s5 + $0x40] sm:$0xff] }
 0x569   : > { %9798 = vmatprep.mubr.msk.f32.mxu1 %vm15588_vm15, %v15691_v33  ;;  %v7008_v33 = vld [vmem:[%s14702_s5 + $0x48] sm:$0xff]  ;;  %vm15716_vm15 = vnez %v15715_v62  ;;  %v15748_v62 = vld [vmem:[#allocation33_spill] sm:$0xff] }
 0x56c   : > { %9799 = vmatmul.mubr.f32.gmra.mrb[12].mxu1 %v15693_v12  ;;  %v15713_v12 = vld [vmem:[#allocation54_spill] sm:$0xff] }
 0x56d   : > { %9801 = vmatprep.mubr.msk.f32.mxu1 %vm15698_vm7, %v4464_v46  ;;  %v7010_v46 = vld [vmem:[%s14702_s5 + $0x58] sm:$0xff] }
 0x570   : > { %9802 = vmatmul.mubr.f32.gmra.mrb[14].mxu1 %v15694_v6  ;;  %v10636_v6 = vpack.c.bf16 %v7008_v33, %v7007_v7  ;;  %v6992_v7 = vld [vmem:[%s11407_s18 + $0xc8] sm:$0xff]  ;;  %v6993_v33 = vld [vmem:[%s11407_s18 + $0xd0] sm:$0xff] }
 0x571   : > { %9836 = vmatprep.mubr.f32.mxu1 %v15597_v13  ;;  %v6661_v13 = vld [vmem:[%s14700_s3 + $0x430] sm:$0xff] }
 0x574   : > { %9837 = vmatmul.mubr.f32.vlgmr.msra.gmra.mrb[16].mxu1 %v13181_v31  ;;  %v10600_v31 = vpack.c.bf16 %v6662_v19, %v6661_v13  ;;  %v15721_v13 = vld [vmem:[#allocation60_spill] sm:$0xff] }
 0x575   : > { %10591 = vmatpush3.bf16.msra.mxu1 %v10588_v27  ;;  %9839 = vmatprep.mubr.f32.mxu1 %v13195_v34  ;;  %v6663_v34 = vld [vmem:[%s14700_s3 + $0x440] sm:$0xff]  ;;  %v6664_v27 = vld [vmem:[%s14700_s3 + $0x448] sm:$0xff] }
 0x576   : > { %10593 = vmatprep.subr.bf16.mxu1 %v10592_v41 }
 0x578   : > { %9840 = vmatmul.mubr.f32.gmra.mrb[18].mxu1 %v13215_v35  ;;  %v10604_v35 = vpack.c.bf16 %v6664_v27, %v6663_v34  ;;  %v7014_v34 = vld [vmem:[%s14702_s5 + $0x78] sm:$0xff]  ;;  %v15722_v27 = vld [vmem:[#allocation63_spill] sm:$0xff] }
 0x579   : > { %9842 = vmatprep.mubr.f32.mxu1 %v13230_v26  ;;  %10595 = vmatpush3.bf16.msra.mxu1 %v10592_v41  ;;  %v6665_v26 = vld [vmem:[%s14700_s3 + $0x450] sm:$0xff]  ;;  %v7011_v41 = vld [vmem:[%s14702_s5 + $0x60] sm:$0xff] }
 0x57a   : > { %10597 = vmatprep.subr.bf16.mxu1 %v10596_v54  ;;  %v10644_v19 = vpack.c.bf16 %v7012_v51, %v7011_v41 }
 0x57c   : > { %9843 = vmatmul.mubr.f32.gmra.mrb[20].mxu1 %v13247_v25  ;;  %v10608_v25 = vpack.c.bf16 %v6666_v47, %v6665_v26  ;;  %v15725_v47 = vld [vmem:[#allocation72_spill] sm:$0xff] }
 0x57d   : > { %9845 = vmatprep.mubr.f32.mxu1 %v13256_v8  ;;  %10599 = vmatpush3.bf16.msra.mxu1 %v10596_v54  ;;  %v6667_v8 = vld [vmem:[%s14700_s3 + $0x460] sm:$0xff]  ;;  %v15719_v54 = vld [vmem:[#allocation67_spill] sm:$0xff]  ;;  %vm15726_vm2 = vnez %v15725_v47 }
 0x57e   : > { %10601 = vmatprep.subr.bf16.mxu1 %v10600_v31  ;;  %vm15720_vm0 = vnez %v15719_v54 }
 0x580   : > { %9846 = vmatmul.mubr.f32.gmra.mrb[22].mxu1 %v13279_v49  ;;  %v10612_v49 = vpack.c.bf16 %v6668_v20, %v6667_v8  ;;  %v15728_v8 = vld [vmem:[#allocation76_spill] sm:$0xff]  ;;  %v15731_v20 = vld [vmem:[#allocation85_spill] sm:$0xff] }
 0x581   : > { %9848 = vmatprep.mubr.f32.mxu1 %v13290_v63  ;;  %10603 = vmatpush3.bf16.msra.mxu1 %v10600_v31  ;;  %v6669_v63 = vld [vmem:[%s14700_s3 + $0x470] sm:$0xff]  ;;  %vm15729_vm3 = vnez %v15728_v8 }
 0x582   : > { %10605 = vmatprep.subr.bf16.mxu1 %v10604_v35  ;;  %v7013_v31 = vld [vmem:[%s14702_s5 + $0x70] sm:$0xff] }
 0x583   : > { %v10648_v26 = vpack.c.bf16 %v7014_v34, %v7013_v31 }
 0x584   : > { %9849 = vmatmul.mubr.f32.gmra.mrb[24].mxu1 %v13309_v59  ;;  %v10616_v59 = vpack.c.bf16 %v6670_v2, %v6669_v63  ;;  %v15741_v2 = vld [vmem:[#allocation13_spill] sm:$0xff] }
 0x585   : > { %9851 = vmatprep.mubr.f32.mxu1 %v13317_v23  ;;  %10607 = vmatpush3.bf16.msra.mxu1 %v10604_v35  ;;  %v6999_v23 = vld [vmem:[%s14702_s5] sm:$0xff] }
 0x586   : > { %10609 = vmatprep.subr.bf16.mxu1 %v10608_v25  ;;  %v15723_v35 = vld [vmem:[#allocation70_spill] sm:$0xff] }
 0x587   : > { %vm15724_vm1 = vnez %v15723_v35 }
 0x588   : > { %9852 = vmatmul.mubr.f32.gmra.mrb[26].mxu1 %v13337_v18  ;;  %v10620_v18 = vpack.c.bf16 %v7000_v56, %v6999_v23  ;;  %v6968_v23 = vld [vmem:[%s11407_s18 + $0x8] sm:$0xff]  ;;  %v6969_v56 = vld [vmem:[%s11407_s18 + $0x10] sm:$0xff] }
 0x589   : > { %9854 = vmatprep.mubr.f32.mxu1 %v13158_v4  ;;  %10611 = vmatpush3.bf16.msra.mxu1 %v10608_v25  ;;  %v15699_v4 = vld [vmem:[#allocation73_spill] sm:$0xff] }
 0x58a   : > { %10613 = vmatprep.subr.bf16.mxu1 %v10612_v49  ;;  %v15727_v25 = vld [vmem:[#allocation69_spill] sm:$0xff] }
 0x58c   : > { %9855 = vmatmul.mubr.f32.gmra.mrb[28].mxu1 %v13165_v14  ;;  %v15700_v14 = vld [vmem:[#allocation75_spill] sm:$0xff] }
 0x58d   : > { %9857 = vmatprep.mubr.f32.mxu1 %v13174_v38  ;;  %10615 = vmatpush3.bf16.msra.mxu1 %v10612_v49  ;;  %v15701_v38 = vmov 0.0   ;;  %v15733_v49 = vld [vmem:[#allocation88_spill] sm:$0xff] }
 0x58e   : > { %10617 = vmatprep.subr.bf16.mxu1 %v10616_v59 }
 0x590   : > { %9858 = vmatmul.mubr.f32.gmra.mrb[30].mxu1 %v13183_v22  ;;  %v7001_v22 = vld [vmem:[%s14702_s5 + $0x10] sm:$0xff] }
 0x591   : > { %9860 = vmatprep.mubr.f32.mxu1 %v13205_v24  ;;  %10619 = vmatpush3.bf16.msra.mxu1 %v10616_v59  ;;  %v7002_v24 = vld [vmem:[%s14702_s5 + $0x18] sm:$0xff]  ;;  %v15742_v59 = vld [vmem:[#allocation92_spill] sm:$0xff] }
 0x592   : > { %10621 = vmatprep.subr.bf16.mxu1 %v10620_v18 }
 0x594   : > { %9861 = vmatmul.mubr.f32.gmra.mrb[0].mxu1 %v13218_v28  ;;  %v15702_v28 = vld [vmem:[#allocation47_spill] sm:$0xff] }
 0x595   : > { %9863 = vmatprep.mubr.f32.mxu1 %v13240_v48  ;;  %v10624_v48 = vpack.c.bf16 %v7002_v24, %v7001_v22  ;;  %v6976_v22 = vld [vmem:[%s11407_s18 + $0x48] sm:$0xff]  ;;  %v6977_v24 = vld [vmem:[%s11407_s18 + $0x50] sm:$0xff] }
 0x598   : > { %9864 = vmatmul.mubr.f32.gmra.mrb[2].mxu1 %v13250_v29  ;;  %v7003_v29 = vld [vmem:[%s14702_s5 + $0x20] sm:$0xff] }
 0x599   : > { %9866 = vmatprep.mubr.f32.mxu1 %v13272_v44  ;;  %v7004_v44 = vld [vmem:[%s14702_s5 + $0x28] sm:$0xff] }
 0x59c   : > { %9867 = vmatmul.mubr.f32.gmra.mrb[4].mxu1 %v13282_v10  ;;  %v15703_v10 = vld [vmem:[#allocation48_spill] sm:$0xff] }
 0x59d   : > { %9869 = vmatprep.mubr.f32.mxu1 %v13301_v3  ;;  %v15704_v3 = vld [vmem:[#allocation56_spill] sm:$0xff] }
 0x59e   : > { %vm15705_vm8 = vnez %v15704_v3  ;;  %v6983_v3 = vld [vmem:[%s11407_s18 + $0x80] sm:$0xff] }
 0x5a0   : > { %9870 = vmatmul.mubr.f32.gmra.mrb[6].mxu1 %v13314_v17  ;;  %v15706_v17 = vld [vmem:[#allocation20_spill] sm:$0xff] }
 0x5a1   : > { %9872 = vmatprep.mubr.f32.mxu1 %v13330_v36  ;;  %v10628_v36 = vpack.c.bf16 %v7004_v44, %v7003_v29  ;;  %v6980_v29 = vld [vmem:[%s11407_s18 + $0x68] sm:$0xff]  ;;  %v6981_v44 = vld [vmem:[%s11407_s18 + $0x70] sm:$0xff] }
 0x5a4   : > { %9873 = vmatmul.mubr.f32.gmra.mrb[8].mxu1 %v13341_v40  ;;  %v7005_v40 = vld [vmem:[%s14702_s5 + $0x30] sm:$0xff] }
 0x5a5   : > { %9875 = vmatprep.mubr.f32.mxu1 %v15699_v4  ;;  %v6973_v4 = vld [vmem:[%s11407_s18 + $0x30] sm:$0xff] }
 0x5a8   : > { %9876 = vmatmul.mubr.f32.gmra.mrb[10].mxu1 %v15700_v14  ;;  %v6974_v14 = vld [vmem:[%s11407_s18 + $0x38] sm:$0xff] }
 0x5a9   : > { %9878 = vmatprep.mubr.f32.mxu1 %v13872_v43  ;;  %v15707_v43 = vld [vmem:[#allocation8_spill] sm:$0xff] }
 0x5ac   : > { %9879 = vmatmul.mubr.f32.gmra.mrb[12].mxu1 %v14017_v37  ;;  %v7006_v37 = vld [vmem:[%s14702_s5 + $0x38] sm:$0xff] }
 0x5ad   : > { %9881 = vmatprep.mubr.f32.mxu1 %v15701_v38  ;;  %v10632_v55 = vpack.c.bf16 %v7006_v37, %v7005_v40  ;;  %v6986_v40 = vld [vmem:[%s11407_s18 + $0x98] sm:$0xff]  ;;  %v6987_v37 = vld [vmem:[%s11407_s18 + $0xa0] sm:$0xff] }
 0x5b0   : > { %9882 = vmatmul.mubr.f32.gmra.mrb[14].mxu1 %v15701_v38  ;;  %v6975_v38 = vld [vmem:[%s11407_s18 + $0x40] sm:$0xff] }
 0x5b1   : > { %9916 = vmatprep.mubr.f32.mxu1 %v15702_v28  ;;  %v6978_v28 = vld [vmem:[%s11407_s18 + $0x58] sm:$0xff] }
 0x5b4   : > { %9917 = vmatmul.mubr.msk.f32.vlgmr.msra.gmra.mrb[16].mxu1 %vm15705_vm8, %v15703_v10  ;;  %v6982_v10 = vld [vmem:[%s11407_s18 + $0x78] sm:$0xff] }
 0x5b5   : > { %10623 = vmatpush3.bf16.msra.mxu1 %v10620_v18  ;;  %9919 = vmatprep.mubr.f32.mxu1 %v15706_v17  ;;  %v6971_v18 = vld [vmem:[%s11407_s18 + $0x20] sm:$0xff]  ;;  %v6984_v17 = vld [vmem:[%s11407_s18 + $0x88] sm:$0xff] }
 0x5b6   : > { %10625 = vmatprep.subr.bf16.mxu1 %v10624_v48 }
 0x5b8   : > { %9920 = vmatmul.mubr.msk.f32.gmra.mrb[18].mxu1 %vm15709_vm12, %v15707_v43  ;;  %v6988_v43 = vld [vmem:[%s11407_s18 + $0xa8] sm:$0xff] }
 0x5b9   : > { %9922 = vmatprep.mubr.f32.mxu1 %v15710_v32  ;;  %10627 = vmatpush3.bf16.msra.mxu1 %v10624_v48  ;;  %v6979_v48 = vld [vmem:[%s11407_s18 + $0x60] sm:$0xff]  ;;  %v6990_v32 = vld [vmem:[%s11407_s18 + $0xb8] sm:$0xff] }
 0x5ba   : > { %10629 = vmatprep.subr.bf16.mxu1 %v10628_v36 }
 0x5bc   : > { %9923 = vmatmul.mubr.msk.f32.gmra.mrb[20].mxu1 %vm15712_vm11, %v15617_v5  ;;  %v10640_v5 = vpack.c.bf16 %v7010_v46, %v7009_v57  ;;  %v6997_v57 = vld [vmem:[%s11407_s18 + $0xf0] sm:$0xff]  ;;  %v6998_v46 = vld [vmem:[%s11407_s18 + $0xf8] sm:$0xff] }
 0x5bd   : > { %9925 = vmatprep.mubr.f32.mxu1 %v15713_v12  ;;  %10631 = vmatpush3.bf16.msra.mxu1 %v10628_v36  ;;  %v6985_v36 = vld [vmem:[%s11407_s18 + $0x90] sm:$0xff]  ;;  %v6995_v12 = vld [vmem:[%s11407_s18 + $0xe0] sm:$0xff] }
 0x5be   : > { %10633 = vmatprep.subr.bf16.mxu1 %v10632_v55 }
 0x5c0   : > { %9926 = vmatmul.mubr.msk.f32.gmra.mrb[22].mxu1 %vm15716_vm15, %v15714_v50  ;;  %v14605_v50 = vld [vmem:[%s14701_s4] ss:$0 sm:$0xff] }
 0x5c1   : > { %9928 = vmatprep.mubr.f32.mxu1 %v15717_v9  ;;  %10635 = vmatpush3.bf16.msra.mxu1 %v10632_v55  ;;  %v6991_v55 = vld [vmem:[%s11407_s18 + $0xc0] sm:$0xff]  ;;  %v10668_v9 = vadd.f32 %v15748_v62, %v14605_v50 }
 0x5c2   : > { %10637 = vmatprep.subr.bf16.mxu1 %v10636_v6 }
 0x5c4   : > { %9929 = vmatmul.mubr.msk.f32.gmra.mrb[24].mxu1 %vm15720_vm0, %v15718_v42 }
 0x5c5   : > { %9931 = vmatprep.mubr.f32.mxu1 %v15721_v13  ;;  %10639 = vmatpush3.bf16.msra.mxu1 %v10636_v6  ;;  %v6996_v6 = vld [vmem:[%s11407_s18 + $0xe8] sm:$0xff] }
 0x5c6   : > { %10641 = vmatprep.subr.bf16.mxu1 %v10640_v5 }
 0x5c8   : > { %9932 = vmatmul.mubr.msk.f32.gmra.mrb[26].mxu1 %vm15724_vm1, %v15722_v27  ;;  %v15751_v27 = vld [vmem:[#allocation53_spill] sm:$0xff] }
 0x5c9   : > { %9934 = vmatprep.mubr.f32.mxu1 %v15628_v11  ;;  %10643 = vmatpush3.bf16.msra.mxu1 %v10640_v5  ;;  %v15749_v5 = vld [vmem:[#allocation35_spill] sm:$0xff]  ;;  %v10674_v35 = vadd.f32 %v14605_v50, %v15751_v27 }
 0x5ca   : > { %10645 = vmatprep.subr.bf16.mxu1 %v10644_v19  ;;  %v10670_v41 = vadd.f32 %v14605_v50, %v15749_v5 }
 0x5cc   : > { %9935 = vmatmul.mubr.msk.f32.gmra.mrb[28].mxu1 %vm15726_vm2, %v15629_v30 }
 0x5cd   : > { %9937 = vmatprep.mubr.f32.mxu1 %v15727_v25  ;;  %10647 = vmatpush3.bf16.msra.mxu1 %v10644_v19  ;;  %v15750_v19 = vld [vmem:[#allocation50_spill] sm:$0xff] }
 0x5ce   : > { %10649 = vmatprep.subr.bf16.mxu1 %v10648_v26  ;;  %v10672_v31 = vadd.f32 %v15750_v19, %v14605_v50  ;;  %v15763_v19 = vld [vmem:[#allocation102_spill] sm:$0xff] }
 0x5d0   : > { %9938 = vmatmul.mubr.msk.f32.gmra.mrb[30].mxu1 %vm15729_vm3, %v15633_v45  ;;  %v15736_v45 = vld [vmem:[#allocation87_spill] sm:$0xff] }
 0x5d1   : > { %9940 = vmatprep.mubr.f32.mxu1 %v15636_v39  ;;  %10651 = vmatpush3.bf16.msra.mxu1 %v10648_v26  ;;  %v15735_v39 = vld [vmem:[#allocation91_spill] sm:$0xff]  ;;  %vm15737_vm5 = vnez %v15736_v45 }
 0x5d4   : > { %9941 = vmatmul.mubr.msk.f32.gmra.mrb[0].mxu1 %vm15639_vm14, %v15637_v60  ;;  %v15738_v60 = vld [vmem:[#allocation23_spill] sm:$0xff]  ;;  %vm15743_vm14 = vnez %v15742_v59 }
 0x5d5   : > { %9943 = vmatprep.mubr.f32.mxu1 %v15731_v20  ;;  %v15752_v20 = vld [vmem:[#allocation38_spill] sm:$0xff] }
 0x5d6   : > { %v10676_v30 = vadd.f32 %v15752_v20, %v14605_v50 }
 0x5d8   : > { %9944 = vmatmul.mubr.msk.f32.gmra.mrb[2].mxu1 %vm15643_vm9, %v15641_v21  ;;  %v15740_v21 = vld [vmem:[#allocation12_spill] sm:$0xff] }
 0x5d9   : > { %9946 = vmatprep.mubr.f32.mxu1 %v15733_v49 }
 0x5dc   : > { %9947 = vmatmul.mubr.msk.f32.gmra.mrb[4].mxu1 %vm15734_vm4, %v15645_v1  ;;  %v6967_v1 = vld [vmem:[%s11407_s18] sm:$0xff] }
 0x5dd   : > { %9949 = vmatprep.mubr.f32.mxu1 %v15735_v39  ;;  %v15753_v39 = vld [vmem:[#allocation93_spill] sm:$0xff] }
 0x5de   : > { %v10678_v45 = vadd.f32 %v14605_v50, %v15753_v39 }
 0x5e0   : > { %9950 = vmatmul.mubr.msk.f32.gmra.mrb[6].mxu1 %vm15737_vm5, %v13868_v58  ;;  %v15745_v58 = vld [vmem:[#allocation49_spill] sm:$0xff] }
 0x5e1   : > { %9952 = vmatprep.mubr.f32.mxu1 %v15738_v60 }
 0x5e4   : > { %9953 = vmatmul.mubr.msk.f32.gmra.mrb[8].mxu1 %vm15543_vm13, %v15650_v0  ;;  %v15746_v0 = vld [vmem:[#allocation51_spill] sm:$0xff] }
 0x5e5   : > { %9955 = vmatprep.mubr.f32.mxu1 %v15740_v21  ;;  %vm15747_vm13 = vnez %v15746_v0  ;;  %v15755_v0 = vld [vmem:[#allocation96_spill] sm:$0xff] }
 0x5e8   : > { %9956 = vmatmul.mubr.msk.f32.gmra.mrb[10].mxu1 %vm15743_vm14, %v15741_v2 }
 0x5e9   : > { %9958 = vmatprep.mubr.f32.mxu1 %v14257_v53  ;;  %v6970_v53 = vld [vmem:[%s11407_s18 + $0x18] sm:$0xff] }
 0x5ec   : > { %9959 = vmatmul.mubr.msk.f32.gmra.mrb[12].mxu1 %vm15658_vm10, %v14263_v16  ;;  %v6972_v16 = vld [vmem:[%s11407_s18 + $0x28] sm:$0xff]  ;;  %s14616_s18 = scalar_lea.vmem %s14703_s6, %s7610_s15 }
 0x5ed   : > { %9961 = vmatprep.mubr.f32.mxu1 %v15745_v58 }
 0x5f0   : > { %9962 = vmatmul.mubr.msk.f32.gmra.mrb[14].mxu1 %vm15747_vm13, %v15745_v58  ;;  %v10680_v58 = vadd.f32 %v15754_v15, %v14605_v50 }
 0x5f1   : > { %9996 = vmatprep.mubr.f32.mxu1 %v6967_v1 }
 0x5f4   : > { %9997 = vmatmul.mubr.f32.vlgmr.msra.gmra.mrb[16].mxu1 %v6968_v23  ;;  %v10682_v23 = vadd.f32 %v14605_v50, %v15755_v0 }
 0x5f5   : > { %9999 = vmatprep.mubr.f32.mxu1 %v6969_v56 }
 0x5f8   : > { %10000 = vmatmul.mubr.f32.gmra.mrb[18].mxu1 %v6970_v53 }
 0x5f9   : > { %10002 = vmatprep.mubr.f32.mxu1 %v6971_v18 }
 0x5fc   : > { %10003 = vmatmul.mubr.f32.gmra.mrb[20].mxu1 %v6972_v16 }
 0x5fd   : > { %10005 = vmatprep.mubr.f32.mxu1 %v6973_v4 }
 0x600   : > { %10006 = vmatmul.mubr.f32.gmra.mrb[22].mxu1 %v6974_v14  ;;  %v15756_v14 = vld [vmem:[#allocation62_spill] sm:$0xff] }
 0x601   : > { %10008 = vmatprep.mubr.f32.mxu1 %v6975_v38  ;;  %v10684_v38 = vadd.f32 %v15756_v14, %v14605_v50 }
 0x604   : > { %10009 = vmatmul.mubr.f32.gmra.mrb[24].mxu1 %v6976_v22 }
 0x605   : > { %10011 = vmatprep.mubr.f32.mxu1 %v6977_v24  ;;  %v15757_v24 = vld [vmem:[#allocation98_spill] sm:$0xff] }
 0x608   : > { %10012 = vmatmul.mubr.f32.gmra.mrb[26].mxu1 %v6978_v28  ;;  %v10686_v28 = vadd.f32 %v14605_v50, %v15757_v24 }
 0x609   : > { %10014 = vmatprep.mubr.f32.mxu1 %v6979_v48 }
 0x60c   : > { %10015 = vmatmul.mubr.f32.gmra.mrb[28].mxu1 %v6980_v29 }
 0x60d   : > { %10017 = vmatprep.mubr.f32.mxu1 %v6981_v44 }
 0x610   : > { %10018 = vmatmul.mubr.f32.gmra.mrb[30].mxu1 %v6982_v10 }
 0x611   : > { %10020 = vmatprep.mubr.f32.mxu1 %v6983_v3 }
 0x614   : > { %10021 = vmatmul.mubr.f32.gmra.mrb[0].mxu1 %v6984_v17  ;;  %v15758_v17 = vld [vmem:[#allocation68_spill] sm:$0xff] }
 0x615   : > { %10023 = vmatprep.mubr.f32.mxu1 %v6985_v36  ;;  %v10688_v36 = vadd.f32 %v15758_v17, %v14605_v50 }
 0x618   : > { %10024 = vmatmul.mubr.f32.gmra.mrb[2].mxu1 %v6986_v40 }
 0x619   : > { %10026 = vmatprep.mubr.f32.mxu1 %v6987_v37  ;;  %v15759_v37 = vld [vmem:[#allocation71_spill] sm:$0xff] }
 0x61c   : > { %10027 = vmatmul.mubr.f32.gmra.mrb[4].mxu1 %v6988_v43  ;;  %v10690_v43 = vadd.f32 %v14605_v50, %v15759_v37 }
 0x61d   : > { %10029 = vmatprep.mubr.f32.mxu1 %v6989_v52 }
 0x620   : > { %10030 = vmatmul.mubr.f32.gmra.mrb[6].mxu1 %v6990_v32 }
 0x621   : > { %10032 = vmatprep.mubr.f32.mxu1 %v6991_v55 }
 0x624   : > { %10033 = vmatmul.mubr.f32.gmra.mrb[8].mxu1 %v6992_v7 }
 0x625   : > { %10035 = vmatprep.mubr.f32.mxu1 %v6993_v33 }
 0x628   : > { %10036 = vmatmul.mubr.f32.gmra.mrb[10].mxu1 %v6994_v61  ;;  %v15760_v61 = vld [vmem:[#allocation99_spill] sm:$0xff] }
 0x629   : > { %10038 = vmatprep.mubr.f32.mxu1 %v6995_v12  ;;  %v10692_v12 = vadd.f32 %v15760_v61, %v14605_v50 }
 0x62c   : > { %10039 = vmatmul.mubr.f32.gmra.mrb[12].mxu1 %v6996_v6 }
 0x62d   : > { %10041 = vmatprep.mubr.f32.mxu1 %v6997_v57  ;;  %v15761_v57 = vld [vmem:[#allocation100_spill] sm:$0xff] }
 0x630   : > { %10042 = vmatmul.mubr.f32.gmra.mrb[14].mxu1 %v6998_v46  ;;  %v10694_v46 = vadd.f32 %v14605_v50, %v15761_v57 }
 0x6c7   : > { %v9998_v51 = vpop.f32.mrb[16].mxu1 }
 0x6c8   : > { %v10669_v42 = vadd.f32 %v10668_v9, %v9998_v51  ;;  %v7081_v54 = vpop.f32.mrb[17].mxu1 }
 0x6c9   : > { %v10671_v13 = vadd.f32 %v10670_v41, %v7081_v54 }
 0x6ca   : > { %v7273_v34 = vmul.f32 0.70710677, %v10669_v42  ;;  %v15762_v42 = vld [vmem:[#allocation101_spill] sm:$0xff] }
 0x6cb   : > { %v7272_v26 = vmul.f32 0.70710677, %v10671_v13  ;;  %v10001_v47 = vpop.f32.mrb[18].mxu1  ;;  %v10696_v54 = vadd.f32 %v15762_v42, %v14605_v50 }
 0x6cc   : > { %7305 = vst [vmem:[%s14616_s18 + $0x8] sm:$0xff] %v7273_v34  ;;  %v10673_v25 = vadd.f32 %v10672_v31, %v10001_v47  ;;  %v7091_v8 = vpop.f32.mrb[19].mxu1  ;;  %v10698_v31 = vadd.f32 %v14605_v50, %v15763_v19 }
 0x6cd   : > { %7304 = vst [vmem:[%s14616_s18] sm:$0xff] %v7272_v26  ;;  %v10675_v11 = vadd.f32 %v10674_v35, %v7091_v8 }
 0x6ce   : > { %v7275_v49 = vmul.f32 0.70710677, %v10673_v25 }
 0x6cf   : > { %v7274_v60 = vmul.f32 0.70710677, %v10675_v11  ;;  %v10004_v63 = vpop.f32.mrb[20].mxu1 }
 0x6d0   : > { %7307 = vst [vmem:[%s14616_s18 + $0x18] sm:$0xff] %v7275_v49  ;;  %v10677_v21 = vadd.f32 %v10676_v30, %v10004_v63  ;;  %v7101_v2 = vpop.f32.mrb[21].mxu1 }
 0x6d1   : > { %7306 = vst [vmem:[%s14616_s18 + $0x10] sm:$0xff] %v7274_v60  ;;  %v10679_v59 = vadd.f32 %v10678_v45, %v7101_v2 }
 0x6d2   : > { %v7277_v1 = vmul.f32 0.70710677, %v10677_v21 }
 0x6d3   : > { %v7276_v56 = vmul.f32 0.70710677, %v10679_v59  ;;  %v10007_v53 = vpop.f32.mrb[22].mxu1 }
 0x6d4   : > { %7309 = vst [vmem:[%s14616_s18 + $0x28] sm:$0xff] %v7277_v1  ;;  %v10681_v18 = vadd.f32 %v10680_v58, %v10007_v53  ;;  %v7111_v16 = vpop.f32.mrb[23].mxu1 }
 0x6d5   : > { %7308 = vst [vmem:[%s14616_s18 + $0x20] sm:$0xff] %v7276_v56  ;;  %v10683_v4 = vadd.f32 %v10682_v23, %v7111_v16 }
 0x6d6   : > { %v7279_v22 = vmul.f32 0.70710677, %v10681_v18 }
 0x6d7   : > { %v7278_v48 = vmul.f32 0.70710677, %v10683_v4  ;;  %v10010_v29 = vpop.f32.mrb[24].mxu1 }
 0x6d8   : > { %7311 = vst [vmem:[%s14616_s18 + $0x38] sm:$0xff] %v7279_v22  ;;  %v10685_v44 = vadd.f32 %v10684_v38, %v10010_v29  ;;  %v7121_v10 = vpop.f32.mrb[25].mxu1 }
 0x6d9   : > { %7310 = vst [vmem:[%s14616_s18 + $0x30] sm:$0xff] %v7278_v48  ;;  %v10687_v3 = vadd.f32 %v10686_v28, %v7121_v10 }
 0x6da   : > { %v7281_v40 = vmul.f32 0.70710677, %v10685_v44 }
 0x6db   : > { %v7280_v52 = vmul.f32 0.70710677, %v10687_v3  ;;  %v10013_v32 = vpop.f32.mrb[26].mxu1 }
 0x6dc   : > { %7313 = vst [vmem:[%s14616_s18 + $0x48] sm:$0xff] %v7281_v40  ;;  %v10689_v55 = vadd.f32 %v10688_v36, %v10013_v32  ;;  %v7131_v7 = vpop.f32.mrb[27].mxu1 }
 0x6dd   : > { %7312 = vst [vmem:[%s14616_s18 + $0x40] sm:$0xff] %v7280_v52  ;;  %v10691_v33 = vadd.f32 %v10690_v43, %v7131_v7 }
 0x6de   : > { %v7283_v6 = vmul.f32 0.70710677, %v10689_v55 }
 0x6df   : > { %v7282_v62 = vmul.f32 0.70710677, %v10691_v33  ;;  %v10016_v9 = vpop.f32.mrb[28].mxu1 }
 0x6e0   : > { %7315 = vst [vmem:[%s14616_s18 + $0x58] sm:$0xff] %v7283_v6  ;;  %v10693_v5 = vadd.f32 %v10692_v12, %v10016_v9  ;;  %v7141_v41 = vpop.f32.mrb[29].mxu1 }
 0x6e1   : > { %7314 = vst [vmem:[%s14616_s18 + $0x50] sm:$0xff] %v7282_v62  ;;  %v10695_v51 = vadd.f32 %v10694_v46, %v7141_v41 }
 0x6e2   : > { %v7285_v13 = vmul.f32 0.70710677, %v10693_v5 }
 0x6e3   : > { %v7284_v34 = vmul.f32 0.70710677, %v10695_v51  ;;  %v10019_v27 = vpop.f32.mrb[30].mxu1 }
 0x6e4   : > { %7317 = vst [vmem:[%s14616_s18 + $0x68] sm:$0xff] %v7285_v13  ;;  %v10697_v35 = vadd.f32 %v10696_v54, %v10019_v27  ;;  %v7151_v26 = vpop.f32.mrb[31].mxu1 }
 0x6e5   : > { %7316 = vst [vmem:[%s14616_s18 + $0x60] sm:$0xff] %v7284_v34  ;;  %v10699_v47 = vadd.f32 %v10698_v31, %v7151_v26 }
 0x6e6   : > { %v7287_v25 = vmul.f32 0.70710677, %v10697_v35 }
 0x6e7   : > { %v7286_v8 = vmul.f32 0.70710677, %v10699_v47  ;;  %v10022_v11 = vpop.f32.mrb[0].mxu1 }
 0x6e8   : > { %7319 = vst [vmem:[%s14616_s18 + $0x78] sm:$0xff] %v7287_v25  ;;  %v10700_v20 = vadd.f32 %v10022_v11, %v14605_v50  ;;  %v7161_v30 = vpop.f32.mrb[1].mxu1 }
 0x6e9   : > { %7318 = vst [vmem:[%s14616_s18 + $0x70] sm:$0xff] %v7286_v8  ;;  %v10701_v49 = vadd.f32 %v14605_v50, %v7161_v30 }
 0x6ea   : > { %v7289_v39 = vmul.f32 0.70710677, %v10700_v20 }
 0x6eb   : > { %v7288_v45 = vmul.f32 0.70710677, %v10701_v49  ;;  %v10025_v60 = vpop.f32.mrb[2].mxu1 }
 0x6ec   : > { %7321 = vst [vmem:[%s14616_s18 + $0x88] sm:$0xff] %v7289_v39  ;;  %v10702_v63 = vadd.f32 %v10025_v60, %v14605_v50  ;;  %v7171_v21 = vpop.f32.mrb[3].mxu1 }
 0x6ed   : > { %7320 = vst [vmem:[%s14616_s18 + $0x80] sm:$0xff] %v7288_v45  ;;  %v10703_v2 = vadd.f32 %v14605_v50, %v7171_v21 }
 0x6ee   : > { %v7291_v59 = vmul.f32 0.70710677, %v10702_v63 }
 0x6ef   : > { %v7290_v15 = vmul.f32 0.70710677, %v10703_v2  ;;  %v10028_v58 = vpop.f32.mrb[4].mxu1 }
 0x6f0   : > { %7323 = vst [vmem:[%s14616_s18 + $0x98] sm:$0xff] %v7291_v59  ;;  %v10704_v1 = vadd.f32 %v10028_v58, %v14605_v50  ;;  %v7181_v0 = vpop.f32.mrb[5].mxu1 }
 0x6f1   : > { %7322 = vst [vmem:[%s14616_s18 + $0x90] sm:$0xff] %v7290_v15  ;;  %v10705_v23 = vadd.f32 %v14605_v50, %v7181_v0 }
 0x6f2   : > { %v7293_v56 = vmul.f32 0.70710677, %v10704_v1 }
 0x6f3   : > { %v7292_v53 = vmul.f32 0.70710677, %v10705_v23  ;;  %v10031_v18 = vpop.f32.mrb[6].mxu1 }
 0x6f4   : > { %7325 = vst [vmem:[%s14616_s18 + $0xa8] sm:$0xff] %v7293_v56  ;;  %v10706_v16 = vadd.f32 %v10031_v18, %v14605_v50  ;;  %v7191_v4 = vpop.f32.mrb[7].mxu1 }
 0x6f5   : > { %7324 = vst [vmem:[%s14616_s18 + $0xa0] sm:$0xff] %v7292_v53  ;;  %v10707_v14 = vadd.f32 %v14605_v50, %v7191_v4 }
 0x6f6   : > { %v7295_v38 = vmul.f32 0.70710677, %v10706_v16 }
 0x6f7   : > { %v7294_v22 = vmul.f32 0.70710677, %v10707_v14  ;;  %v10034_v24 = vpop.f32.mrb[8].mxu1 }
 0x6f8   : > { %7327 = vst [vmem:[%s14616_s18 + $0xb8] sm:$0xff] %v7295_v38  ;;  %v10708_v28 = vadd.f32 %v10034_v24, %v14605_v50  ;;  %v7201_v48 = vpop.f32.mrb[9].mxu1 }
 0x6f9   : > { %7326 = vst [vmem:[%s14616_s18 + $0xb0] sm:$0xff] %v7294_v22  ;;  %v10709_v29 = vadd.f32 %v14605_v50, %v7201_v48 }
 0x6fa   : > { %v7297_v44 = vmul.f32 0.70710677, %v10708_v28 }
 0x6fb   : > { %v7296_v10 = vmul.f32 0.70710677, %v10709_v29  ;;  %v10037_v3 = vpop.f32.mrb[10].mxu1 }
 0x6fc   : > { %7329 = vst [vmem:[%s14616_s18 + $0xc8] sm:$0xff] %v7297_v44  ;;  %v10710_v17 = vadd.f32 %v10037_v3, %v14605_v50  ;;  %v7211_v36 = vpop.f32.mrb[11].mxu1 }
 0x6fd   : > { %7328 = vst [vmem:[%s14616_s18 + $0xc0] sm:$0xff] %v7296_v10  ;;  %v10711_v40 = vadd.f32 %v14605_v50, %v7211_v36 }
 0x6fe   : > { %v7299_v37 = vmul.f32 0.70710677, %v10710_v17 }
 0x6ff   : > { %v7298_v43 = vmul.f32 0.70710677, %v10711_v40  ;;  %v10040_v52 = vpop.f32.mrb[12].mxu1 }
 0x700   : > { %7331 = vst [vmem:[%s14616_s18 + $0xd8] sm:$0xff] %v7299_v37  ;;  %v10712_v32 = vadd.f32 %v10040_v52, %v14605_v50  ;;  %v7221_v55 = vpop.f32.mrb[13].mxu1 }
 0x701   : > { %7330 = vst [vmem:[%s14616_s18 + $0xd0] sm:$0xff] %v7298_v43  ;;  %v10713_v7 = vadd.f32 %v14605_v50, %v7221_v55 }
 0x702   : > { %v7301_v33 = vmul.f32 0.70710677, %v10712_v32 }
 0x703   : > { %v7300_v61 = vmul.f32 0.70710677, %v10713_v7  ;;  %v10043_v12 = vpop.f32.mrb[14].mxu1 }
 0x704   : > { %7333 = vst [vmem:[%s14616_s18 + $0xe8] sm:$0xff] %v7301_v33  ;;  %v10714_v6 = vadd.f32 %v10043_v12, %v14605_v50  ;;  %v7231_v57 = vpop.f32.mrb[15].mxu1 }
 0x705   : > { %7332 = vst [vmem:[%s14616_s18 + $0xe0] sm:$0xff] %v7300_v61  ;;  %v10715_v46 = vadd.f32 %v14605_v50, %v7231_v57 }
 0x706   : > { %v7303_v62 = vmul.f32 0.70710677, %v10714_v6 }
 0x707   : > { %v7302_v9 = vmul.f32 0.70710677, %v10715_v46 }
 0x708   : > { %7335 = vst [vmem:[%s14616_s18 + $0xf8] sm:$0xff] %v7303_v62 }
 0x709   : > { %7334 = vst [vmem:[%s14616_s18 + $0xf0] sm:$0xff] %v7302_v9 }
 0x70a PF: > { %s17_s21 = sadd.s32 1, %s11310_s21  }
 0x70b   : > { %p14_p3 = scmp.ge.s32.totalorder %s17_s21, 4  }
 0x70d   :  { %16 = sbr.rel (!%p14_p3) target bundleno = 1 (0x1), region = 79 }
 0x714   :  { %7357 = vsyncpa [#allocation4], 1 }
 0x715   :  { %7359 = vsyncpa [#allocation4 + $0x1], 1 }

</bundles_post_ra>
